<compile_context>
chip_gen: v7x
topology: tpu7x:2x2x1
jax: 0.10.0
libtpu: 0.0.40
codegen_flags: <defaults>
</compile_context>

<pallas_src>
import functools

import jax
import jax.numpy as jnp
from jax import lax
from jax.experimental import pallas as pl
from jax.experimental.pallas import tpu as pltpu

EPS = 1e-5          # PyTorch GroupNorm default eps
EXPANSION = 4
LANES = 128


def _round_up(x, m):
    return ((x + m - 1) // m) * m


def _pad_to(a, shape, value=0.0):
    pads = [(0, t - s) for s, t in zip(a.shape, shape)]
    if all(p == (0, 0) for p in pads):
        return a
    return jnp.pad(a, pads, constant_values=value)


# --------------------------------- kernel ---------------------------------- #

def _bottleneck_kernel(*refs, H, W, stride, has_proj, lead, mm_dtype):
    """One batch sample per grid step; everything stays VMEM-resident."""
    if has_proj:
        (x_ref, w1_ref, g1_ref, b1_ref, w2_ref, g2_ref, b2_ref,
         w3_ref, g3_ref, b3_ref, ws_ref, gs_ref, bs_ref, o_ref, y1s_ref) = refs
    else:
        (x_ref, w1_ref, g1_ref, b1_ref, w2_ref, g2_ref, b2_ref,
         w3_ref, g3_ref, b3_ref, o_ref, y1s_ref) = refs

    f32 = jnp.float32
    HW = H * W

    # Per-row (h, w) coordinates (static pattern, cheap VPU work).
    r = lax.broadcasted_iota(jnp.int32, (HW, 1), 0)
    wcol = r % W
    ok_left = wcol >= 1            # column w-1 exists
    ok_right = wcol <= W - 2       # column w+1 exists

    if stride == 1:
        smask = None
        inv_n = 1.0 / HW
    else:
        hrow = r // W
        smask = jnp.logical_and(hrow % stride == 0,
                                wcol % stride == 0).astype(f32)
        inv_n = 1.0 / (((H - 1) // stride + 1) * ((W - 1) // stride + 1))

    def inorm(y, g_ref, b_ref, use_smask):
        # Single-pass per-channel stats (sum + sum-of-squares) in f32.
        m = smask if use_smask else None
        n_inv = inv_n if use_smask else 1.0 / HW
        ym = y if m is None else y * m
        s1 = jnp.sum(ym, axis=0, keepdims=True)
        s2 = jnp.sum(ym * ym, axis=0, keepdims=True)
        mean = s1 * n_inv
        var = jnp.maximum(s2 * n_inv - mean * mean, 0.0)
        return (y - mean) * lax.rsqrt(var + EPS) * g_ref[...] + b_ref[...]

    # ---- conv1 (1x1) + bn1 + relu (bn1 always over the full H*W) -----------
    x2d = x_ref[0].astype(mm_dtype)                                  # (HW, Cin)
    y1 = jnp.dot(x2d, w1_ref[...], preferred_element_type=f32)
    y1 = jnp.maximum(inorm(y1, g1_ref, b1_ref, use_smask=False), 0.0)

    # Stash y1 into a zero-padded VMEM scratch: the nine 3x3 taps become plain
    # row-offset windows, and rows outside [0, H) read zeros from the padding.
    Pp = y1s_ref.shape[1]
    tail = y1s_ref.shape[0] - lead - HW
    y1s_ref[0:lead, :] = jnp.zeros((lead, Pp), f32)
    y1s_ref[lead + HW:lead + HW + tail, :] = jnp.zeros((tail, Pp), f32)
    y1s_ref[lead:lead + HW, :] = y1

    # ---- conv2 (3x3, pad 1) as 9 shifted matmuls accumulated in f32 --------
    acc = None
    for t in range(9):
        dh, dw = t // 3, t % 3
        off = (dh - 1) * W + (dw - 1)
        tap = y1s_ref[lead + off:lead + off + HW, :]                 # (HW, Pp)
        if dw == 0:
            tap = jnp.where(ok_left, tap, 0.0)
        elif dw == 2:
            tap = jnp.where(ok_right, tap, 0.0)
        part = jnp.dot(tap.astype(mm_dtype), w2_ref[t],
                       preferred_element_type=f32)
        acc = part if acc is None else acc + part
    y2 = jnp.maximum(inorm(acc, g2_ref, b2_ref, use_smask=True), 0.0)
    y2 = y2.astype(mm_dtype)

    # ---- conv3 (1x1) + bn3 ---------------------------------------------------
    main = jnp.dot(y2, w3_ref[...], preferred_element_type=f32)
    main = inorm(main, g3_ref, b3_ref, use_smask=True)

    # ---- shortcut: projection conv+IN from the resident x tile, or identity -
    if has_proj:
        sc = jnp.dot(x2d, ws_ref[...], preferred_element_type=f32)
        sc = inorm(sc, gs_ref, bs_ref, use_smask=True)
    else:
        sc = x_ref[0].astype(f32)

    o_ref[0] = jnp.maximum(main + sc, 0.0).astype(o_ref.dtype)


# ---------------------------- pallas_call wrapper --------------------------- #

def _call_fused(x_in, w1, g1, b1, w2, g2, b2, w3, g3, b3, sc_args, *,
                H, W, stride, mm_dtype, out_dtype, vmem_limit_bytes):
    N, HW, Cin = x_in.shape
    Pp = w1.shape[1]
    Cp = w3.shape[1]
    has_proj = sc_args is not None
    lead = _round_up(W + 1, 8)
    scratch_rows = lead + HW + (W + 1)

    def full(a):
        nd = a.ndim
        return pl.BlockSpec(tuple(a.shape), lambda n, _nd=nd: (0,) * _nd)

    in_specs = [pl.BlockSpec((1, HW, Cin), lambda n: (n, 0, 0)),
                full(w1), full(g1), full(b1),
                full(w2), full(g2), full(b2),
                full(w3), full(g3), full(b3)]
    args = [x_in, w1, g1, b1, w2, g2, b2, w3, g3, b3]
    if has_proj:
        ws, gs, bs = sc_args
        in_specs += [full(ws), full(gs), full(bs)]
        args += [ws, gs, bs]

    flops = 2 * N * HW * (Cin * Pp + 9 * Pp * Pp + Pp * Cp
                          + (Cin * Cp if has_proj else 0))
    bytes_accessed = int(sum(a.size * a.dtype.itemsize for a in args)
                         + N * HW * Cp * jnp.dtype(out_dtype).itemsize)
    cost = pl.CostEstimate(flops=int(flops),
                           transcendentals=int(N * (2 * Pp + 2 * Cp)),
                           bytes_accessed=bytes_accessed)

    kernel = functools.partial(_bottleneck_kernel, H=H, W=W, stride=stride,
                               has_proj=has_proj, lead=lead, mm_dtype=mm_dtype)

    return pl.pallas_call(
        kernel,
        out_shape=jax.ShapeDtypeStruct((N, HW, Cp), out_dtype),
        grid=(N,),
        in_specs=in_specs,
        out_specs=pl.BlockSpec((1, HW, Cp), lambda n: (n, 0, 0)),
        scratch_shapes=[pltpu.VMEM((scratch_rows, Pp), jnp.float32)],
        compiler_params=pltpu.CompilerParams(
            dimension_semantics=("parallel",),
            # For real ResNet shapes: raise toward 64-100 MiB on v5e/v6e,
            # budget < 64 MiB on v7x.  Demo shapes fit the default comfortably.
            vmem_limit_bytes=vmem_limit_bytes),
        cost_estimate=cost,
    )(*args)


@functools.partial(jax.jit,
                   static_argnames=("stride", "matmul_dtype", "vmem_limit_bytes"))
def bottleneck_forward(x_nchw, params, stride=1, matmul_dtype=jnp.float32,
                       vmem_limit_bytes=None):
    x = jnp.transpose(x_nchw, (0, 2, 3, 1)).astype(jnp.float32)     # -> NHWC
    N, H, W, Cin = x.shape
    planes = params["w1"].shape[1]
    cexp = EXPANSION * planes
    has_proj = (stride != 1) or (Cin != cexp)

    Pp = _round_up(planes, LANES)       # lane-dense intermediate channels
    Cp = _round_up(cexp, LANES)         # lane-dense output channels

    # Pad weights / affine params with zeros (padded channels stay exactly 0).
    w1 = _pad_to(params["w1"], (Cin, Pp))
    w2 = _pad_to(params["w2_hwio"].reshape(9, planes, planes), (9, Pp, Pp))
    w3 = _pad_to(params["w3"], (Pp, Cp))
    g1 = _pad_to(params["g1"], (1, Pp), 1.0)
    b1 = _pad_to(params["b1"], (1, Pp))
    g2 = _pad_to(params["g2"], (1, Pp), 1.0)
    b2 = _pad_to(params["b2"], (1, Pp))
    g3 = _pad_to(params["g3"], (1, Cp), 1.0)
    b3 = _pad_to(params["b3"], (1, Cp))

    if has_proj:
        ws = _pad_to(params["ws"], (Cin, Cp)).astype(matmul_dtype)
        sc_args = (ws, _pad_to(params["gs"], (1, Cp), 1.0),
                   _pad_to(params["bs"], (1, Cp)))
        x_in = x
    else:
        # Identity shortcut: pad x's channels to Cp so the residual add lives
        # in the padded channel space (w1 grows matching zero rows).
        x_in = _pad_to(x, (N, H, W, Cp))
        w1 = _pad_to(w1, (Cp, Pp))
        sc_args = None

    x_in = x_in.reshape(N, H * W, x_in.shape[-1]).astype(matmul_dtype)
    w1 = w1.astype(matmul_dtype)
    w2 = w2.astype(matmul_dtype)
    w3 = w3.astype(matmul_dtype)

    out = _call_fused(x_in, w1, g1, b1, w2, g2, b2, w3, g3, b3, sc_args,
                      H=H, W=W, stride=stride, mm_dtype=matmul_dtype,
                      out_dtype=matmul_dtype,
                      vmem_limit_bytes=vmem_limit_bytes)

    out = out.reshape(N, H, W, Cp)
    if stride != 1:
        out = out[:, ::stride, ::stride, :]
    out = out[..., :cexp]
    return jnp.transpose(out, (0, 3, 1, 2))                          # -> NCHW


# ----------------------------- pure-JAX reference --------------------------- #

def _conv_nhwc(x, w_hwio, stride, pad):
    return lax.conv_general_dilated(
        x, w_hwio, (stride, stride), [(pad, pad), (pad, pad)],
        dimension_numbers=("NHWC", "HWIO", "NHWC"))


def _inorm_ref(x, g, b):
    mean = jnp.mean(x, axis=(1, 2), keepdims=True)
    var = jnp.mean((x - mean) ** 2, axis=(1, 2), keepdims=True)
    return ((x - mean) * lax.rsqrt(var + EPS) * g.reshape(1, 1, 1, -1)
            + b.reshape(1, 1, 1, -1))


def bottleneck_reference(x_nchw, p, stride=1):
    x = jnp.transpose(x_nchw, (0, 2, 3, 1)).astype(jnp.float32)
    Cin = x.shape[-1]
    planes = p["w1"].shape[1]
    cexp = EXPANSION * planes
    y = jax.nn.relu(_inorm_ref(_conv_nhwc(x, p["w1"][None, None], 1, 0),
                               p["g1"], p["b1"]))
    y = jax.nn.relu(_inorm_ref(_conv_nhwc(y, p["w2_hwio"], stride, 1),
                               p["g2"], p["b2"]))
    y = _inorm_ref(_conv_nhwc(y, p["w3"][None, None], 1, 0), p["g3"], p["b3"])
    if stride != 1 or Cin != cexp:
        sc = _inorm_ref(_conv_nhwc(x, p["ws"][None, None], stride, 0),
                        p["gs"], p["bs"])
    else:
        sc = x
    return jnp.transpose(jax.nn.relu(y + sc), (0, 3, 1, 2))


def init_params(key, in_planes, planes):
    k1, k2, k3, k4 = jax.random.split(key, 4)
    cexp = EXPANSION * planes
    return {
        "w1": 0.1 * jax.random.normal(k1, (in_planes, planes), jnp.float32),
        "w2_hwio": 0.1 * jax.random.normal(k2, (3, 3, planes, planes), jnp.float32),
        "w3": 0.1 * jax.random.normal(k3, (planes, cexp), jnp.float32),
        "ws": 0.1 * jax.random.normal(k4, (in_planes, cexp), jnp.float32),
        "g1": jnp.ones((1, planes), jnp.float32), "b1": jnp.zeros((1, planes), jnp.float32),
        "g2": jnp.ones((1, planes), jnp.float32), "b2": jnp.zeros((1, planes), jnp.float32),
        "g3": jnp.ones((1, cexp), jnp.float32), "b3": jnp.zeros((1, cexp), jnp.float32),
        "gs": jnp.ones((1, cexp), jnp.float32), "bs": jnp.zeros((1, cexp), jnp.float32),
    }


# ----------------------------------- main ----------------------------------- #

if __name__ == "__main__":
    key = jax.random.PRNGKey(0)
    kx1, kx2, kx3, kp1, kp2, kp3 = jax.random.split(key, 6)

    def check(name, x, params, stride, matmul_dtype, tol):
        out = jax.block_until_ready(
            bottleneck_forward(x, params, stride=stride,
                               matmul_dtype=matmul_dtype))
        ref = jax.block_until_ready(bottleneck_reference(x, params, stride=stride))
        assert out.shape == ref.shape, (name, out.shape, ref.shape)
        err = float(jnp.max(jnp.abs(out.astype(jnp.float32) - ref)))
        assert err < tol, (name, err)

    N, in_planes, planes, H, W = 2, 4, 4, 16, 16

    # A) projection shortcut (in_planes != 4*planes), stride=1  -- f32 strict
    xA = jax.random.normal(kx1, (N, in_planes, H, W), jnp.float32)
    pA = init_params(kp1, in_planes, planes)
    check("proj_s1_f32", xA, pA, 1, jnp.float32, 2e-3)

    # B) identity shortcut (in_planes == 4*planes), stride=1    -- f32 strict
    xB = jax.random.normal(kx2, (N, EXPANSION * planes, H, W), jnp.float32)
    pB = init_params(kp2, EXPANSION * planes, planes)
    check("id_s1_f32", xB, pB, 1, jnp.float32, 2e-3)

    # C) projection shortcut with stride=2                      -- f32 strict
    xC = jax.random.normal(kx3, (N, in_planes, H, W), jnp.float32)
    pC = init_params(kp3, in_planes, planes)
    check("proj_s2_f32", xC, pC, 2, jnp.float32, 2e-3)

    # D) bf16 matmul operands (v6e/v7x fast path)                -- loose check
    check("proj_s1_bf16", xA, pA, 1, jnp.bfloat16, 0.3)

    print("KERNEL_OK")
</pallas_src>

<mosaic_0001>
module attributes {stable_mosaic.version = 11 : i64} {
  func.func @_bottleneck_kernel(%arg0: i32, %arg1: memref<1x256x4xf32, #tpu.memory_space<vmem>>, %arg2: memref<4x128xf32, #tpu.memory_space<vmem>>, %arg3: memref<1x128xf32, #tpu.memory_space<vmem>>, %arg4: memref<1x128xf32, #tpu.memory_space<vmem>>, %arg5: memref<9x128x128xf32, #tpu.memory_space<vmem>>, %arg6: memref<1x128xf32, #tpu.memory_space<vmem>>, %arg7: memref<1x128xf32, #tpu.memory_space<vmem>>, %arg8: memref<128x128xf32, #tpu.memory_space<vmem>>, %arg9: memref<1x128xf32, #tpu.memory_space<vmem>>, %arg10: memref<1x128xf32, #tpu.memory_space<vmem>>, %arg11: memref<4x128xf32, #tpu.memory_space<vmem>>, %arg12: memref<1x128xf32, #tpu.memory_space<vmem>>, %arg13: memref<1x128xf32, #tpu.memory_space<vmem>>, %arg14: memref<1x256x128xf32, #tpu.memory_space<vmem>>, %arg15: memref<297x128xf32, #tpu.memory_space<vmem>>) attributes {dimension_semantics = [#tpu.dimension_semantics<parallel>], iteration_bounds = array<i64: 2>, scalar_prefetch = 0 : i64, scratch_operands = 1 : i64, tpu.core_type = #tpu.core_type<tc>, window_params = [{transform_indices = @transform_0, window_bounds = array<i64: 1, 256, 4>}, {pipeline_mode = #tpu.pipeline_mode<synchronous>, transform_indices = @transform_1, window_bounds = array<i64: 4, 128>}, {pipeline_mode = #tpu.pipeline_mode<synchronous>, transform_indices = @transform_2, window_bounds = array<i64: 1, 128>}, {pipeline_mode = #tpu.pipeline_mode<synchronous>, transform_indices = @transform_3, window_bounds = array<i64: 1, 128>}, {pipeline_mode = #tpu.pipeline_mode<synchronous>, transform_indices = @transform_4, window_bounds = array<i64: 9, 128, 128>}, {pipeline_mode = #tpu.pipeline_mode<synchronous>, transform_indices = @transform_5, window_bounds = array<i64: 1, 128>}, {pipeline_mode = #tpu.pipeline_mode<synchronous>, transform_indices = @transform_6, window_bounds = array<i64: 1, 128>}, {pipeline_mode = #tpu.pipeline_mode<synchronous>, transform_indices = @transform_7, window_bounds = array<i64: 128, 128>}, {pipeline_mode = #tpu.pipeline_mode<synchronous>, transform_indices = @transform_8, window_bounds = array<i64: 1, 128>}, {pipeline_mode = #tpu.pipeline_mode<synchronous>, transform_indices = @transform_9, window_bounds = array<i64: 1, 128>}, {pipeline_mode = #tpu.pipeline_mode<synchronous>, transform_indices = @transform_10, window_bounds = array<i64: 4, 128>}, {pipeline_mode = #tpu.pipeline_mode<synchronous>, transform_indices = @transform_11, window_bounds = array<i64: 1, 128>}, {pipeline_mode = #tpu.pipeline_mode<synchronous>, transform_indices = @transform_12, window_bounds = array<i64: 1, 128>}, {transform_indices = @transform_13, window_bounds = array<i64: 1, 256, 128>}]} {
    %0 = tpu.iota {dimensions = array<i32: 0>} : vector<256x1xi32>
    %c16_i32 = arith.constant 16 : i32
    %c0_i32 = arith.constant 0 : i32
    %1 = arith.cmpi eq, %c16_i32, %c0_i32 : i32
    %c1_i32 = arith.constant 1 : i32
    %2 = arith.select %1, %c1_i32, %c16_i32 : i32
    %3 = vector.broadcast %2 : i32 to vector<256x1xi32>
    %4 = arith.remsi %0, %3 : vector<256x1xi32>
    %c0_i32_0 = arith.constant 0 : i32
    %5 = vector.broadcast %c0_i32_0 : i32 to vector<256x1xi32>
    %6 = arith.cmpi ne, %4, %5 : vector<256x1xi32>
    %c0_i32_1 = arith.constant 0 : i32
    %7 = vector.broadcast %c0_i32_1 : i32 to vector<256x1xi32>
    %8 = arith.cmpi slt, %4, %7 : vector<256x1xi32>
    %c0_i32_2 = arith.constant 0 : i32
    %9 = arith.cmpi slt, %2, %c0_i32_2 : i32
    %10 = vector.broadcast %9 : i1 to vector<256x1xi1>
    %11 = vector.broadcast %10 : vector<256x1xi1> to vector<256x1xi1>
    %12 = arith.xori %8, %11 : vector<256x1xi1>
    %13 = arith.andi %12, %6 : vector<256x1xi1>
    %14 = vector.broadcast %2 : i32 to vector<256x1xi32>
    %15 = arith.addi %4, %14 : vector<256x1xi32>
    %16 = arith.select %13, %15, %4 : vector<256x1xi1>, vector<256x1xi32>
    %c1_i32_3 = arith.constant 1 : i32
    %17 = vector.broadcast %c1_i32_3 : i32 to vector<256x1xi32>
    %18 = arith.cmpi sge, %16, %17 : vector<256x1xi32>
    %c14_i32 = arith.constant 14 : i32
    %19 = vector.broadcast %c14_i32 : i32 to vector<256x1xi32>
    %20 = arith.cmpi sle, %16, %19 : vector<256x1xi32>
    %c0 = arith.constant 0 : index
    %c0_4 = arith.constant 0 : index
    %c0_5 = arith.constant 0 : index
    %21 = vector.load %arg1[%c0, %c0_4, %c0_5] : memref<1x256x4xf32, #tpu.memory_space<vmem>>, vector<1x256x4xf32>
    %22 = vector.shape_cast %21 : vector<1x256x4xf32> to vector<256x4xf32>
    %c0_6 = arith.constant 0 : index
    %c0_7 = arith.constant 0 : index
    %23 = vector.load %arg2[%c0_6, %c0_7] : memref<4x128xf32, #tpu.memory_space<vmem>>, vector<4x128xf32>
    %cst = arith.constant dense<0.000000e+00> : vector<256x128xf32>
    %24 = tpu.matmul %22, %23, %cst {dimension_numbers = #tpu.dot_dimension_numbers<[1], [0], [0], [1], [0, 0, 1, 1], [], []>} : vector<256x4xf32>, vector<4x128xf32>, vector<256x128xf32> -> vector<256x128xf32>
    %cst_8 = arith.constant dense<0.000000e+00> : vector<128xf32>
    %25 = vector.multi_reduction <add>, %24, %cst_8 [0] : vector<256x128xf32> to vector<128xf32>
    %26 = vector.shape_cast %25 : vector<128xf32> to vector<1x128xf32>
    %27 = arith.mulf %24, %24 : vector<256x128xf32>
    %cst_9 = arith.constant dense<0.000000e+00> : vector<128xf32>
    %28 = vector.multi_reduction <add>, %27, %cst_9 [0] : vector<256x128xf32> to vector<128xf32>
    %29 = vector.shape_cast %28 : vector<128xf32> to vector<1x128xf32>
    %cst_10 = arith.constant 3.906250e-03 : f32
    %30 = vector.broadcast %cst_10 : f32 to vector<1x128xf32>
    %31 = arith.mulf %26, %30 : vector<1x128xf32>
    %cst_11 = arith.constant 3.906250e-03 : f32
    %32 = vector.broadcast %cst_11 : f32 to vector<1x128xf32>
    %33 = arith.mulf %29, %32 : vector<1x128xf32>
    %34 = arith.mulf %31, %31 : vector<1x128xf32>
    %35 = arith.subf %33, %34 : vector<1x128xf32>
    %cst_12 = arith.constant 0.000000e+00 : f32
    %36 = vector.broadcast %cst_12 : f32 to vector<1x128xf32>
    %37 = arith.maximumf %35, %36 : vector<1x128xf32>
    %38 = vector.broadcast %31 : vector<1x128xf32> to vector<256x128xf32>
    %39 = arith.subf %24, %38 : vector<256x128xf32>
    %cst_13 = arith.constant 9.99999974E-6 : f32
    %40 = vector.broadcast %cst_13 : f32 to vector<1x128xf32>
    %41 = arith.addf %37, %40 : vector<1x128xf32>
    %42 = math.rsqrt %41 : vector<1x128xf32>
    %43 = vector.broadcast %42 : vector<1x128xf32> to vector<256x128xf32>
    %44 = arith.mulf %39, %43 : vector<256x128xf32>
    %c0_14 = arith.constant 0 : index
    %c0_15 = arith.constant 0 : index
    %45 = vector.load %arg3[%c0_14, %c0_15] : memref<1x128xf32, #tpu.memory_space<vmem>>, vector<1x128xf32>
    %46 = vector.broadcast %45 : vector<1x128xf32> to vector<256x128xf32>
    %47 = arith.mulf %44, %46 : vector<256x128xf32>
    %c0_16 = arith.constant 0 : index
    %c0_17 = arith.constant 0 : index
    %48 = vector.load %arg4[%c0_16, %c0_17] : memref<1x128xf32, #tpu.memory_space<vmem>>, vector<1x128xf32>
    %49 = vector.broadcast %48 : vector<1x128xf32> to vector<256x128xf32>
    %50 = arith.addf %47, %49 : vector<256x128xf32>
    %cst_18 = arith.constant 0.000000e+00 : f32
    %51 = vector.broadcast %cst_18 : f32 to vector<256x128xf32>
    %52 = arith.maximumf %50, %51 : vector<256x128xf32>
    %cst_19 = arith.constant 0.000000e+00 : f32
    %53 = vector.broadcast %cst_19 : f32 to vector<24x128xf32>
    %c0_20 = arith.constant 0 : index
    %c0_21 = arith.constant 0 : index
    %54 = vector.load %arg15[%c0_20, %c0_21] : memref<297x128xf32, #tpu.memory_space<vmem>>, vector<24x128xf32>
    tpu.vector_store %arg15[%c0_20, %c0_21], %53 {strides = array<i32>} : memref<297x128xf32, #tpu.memory_space<vmem>>, vector<24x128xf32>,
    %cst_22 = arith.constant 0.000000e+00 : f32
    %55 = vector.broadcast %cst_22 : f32 to vector<17x128xf32>
    %c280 = arith.constant 280 : index
    %c0_23 = arith.constant 0 : index
    %56 = vector.load %arg15[%c280, %c0_23] : memref<297x128xf32, #tpu.memory_space<vmem>>, vector<17x128xf32>
    tpu.vector_store %arg15[%c280, %c0_23], %55 {strides = array<i32>} : memref<297x128xf32, #tpu.memory_space<vmem>>, vector<17x128xf32>,
    %c24 = arith.constant 24 : index
    %c0_24 = arith.constant 0 : index
    %57 = vector.load %arg15[%c24, %c0_24] : memref<297x128xf32, #tpu.memory_space<vmem>>, vector<256x128xf32>
    tpu.vector_store %arg15[%c24, %c0_24], %52 {strides = array<i32>} : memref<297x128xf32, #tpu.memory_space<vmem>>, vector<256x128xf32>,
    %c7 = arith.constant 7 : index
    %c0_25 = arith.constant 0 : index
    %58 = vector.load %arg15[%c7, %c0_25] : memref<297x128xf32, #tpu.memory_space<vmem>>, vector<256x128xf32>
    %cst_26 = arith.constant 0.000000e+00 : f32
    %59 = vector.shape_cast %18 : vector<256x1xi1> to vector<256x1xi1>
    %60 = vector.broadcast %59 : vector<256x1xi1> to vector<256x128xi1>
    %61 = vector.broadcast %cst_26 : f32 to vector<256x128xf32>
    %62 = arith.select %60, %58, %61 : vector<256x128xi1>, vector<256x128xf32>
    %c0_27 = arith.constant 0 : index
    %c0_28 = arith.constant 0 : index
    %c0_29 = arith.constant 0 : index
    %63 = vector.load %arg5[%c0_27, %c0_28, %c0_29] : memref<9x128x128xf32, #tpu.memory_space<vmem>>, vector<1x128x128xf32>
    %64 = vector.shape_cast %63 : vector<1x128x128xf32> to vector<128x128xf32>
    %cst_30 = arith.constant dense<0.000000e+00> : vector<256x128xf32>
    %65 = tpu.matmul %62, %64, %cst_30 {dimension_numbers = #tpu.dot_dimension_numbers<[1], [0], [0], [1], [0, 0, 1, 1], [], []>} : vector<256x128xf32>, vector<128x128xf32>, vector<256x128xf32> -> vector<256x128xf32>
    %c8 = arith.constant 8 : index
    %c0_31 = arith.constant 0 : index
    %66 = vector.load %arg15[%c8, %c0_31] : memref<297x128xf32, #tpu.memory_space<vmem>>, vector<256x128xf32>
    %c1 = arith.constant 1 : index
    %c0_32 = arith.constant 0 : index
    %c0_33 = arith.constant 0 : index
    %67 = vector.load %arg5[%c1, %c0_32, %c0_33] : memref<9x128x128xf32, #tpu.memory_space<vmem>>, vector<1x128x128xf32>
    %68 = vector.shape_cast %67 : vector<1x128x128xf32> to vector<128x128xf32>
    %cst_34 = arith.constant dense<0.000000e+00> : vector<256x128xf32>
    %69 = tpu.matmul %66, %68, %cst_34 {dimension_numbers = #tpu.dot_dimension_numbers<[1], [0], [0], [1], [0, 0, 1, 1], [], []>} : vector<256x128xf32>, vector<128x128xf32>, vector<256x128xf32> -> vector<256x128xf32>
    %70 = arith.addf %65, %69 : vector<256x128xf32>
    %c9 = arith.constant 9 : index
    %c0_35 = arith.constant 0 : index
    %71 = vector.load %arg15[%c9, %c0_35] : memref<297x128xf32, #tpu.memory_space<vmem>>, vector<256x128xf32>
    %cst_36 = arith.constant 0.000000e+00 : f32
    %72 = vector.shape_cast %20 : vector<256x1xi1> to vector<256x1xi1>
    %73 = vector.broadcast %72 : vector<256x1xi1> to vector<256x128xi1>
    %74 = vector.broadcast %cst_36 : f32 to vector<256x128xf32>
    %75 = arith.select %73, %71, %74 : vector<256x128xi1>, vector<256x128xf32>
    %c2 = arith.constant 2 : index
    %c0_37 = arith.constant 0 : index
    %c0_38 = arith.constant 0 : index
    %76 = vector.load %arg5[%c2, %c0_37, %c0_38] : memref<9x128x128xf32, #tpu.memory_space<vmem>>, vector<1x128x128xf32>
    %77 = vector.shape_cast %76 : vector<1x128x128xf32> to vector<128x128xf32>
    %cst_39 = arith.constant dense<0.000000e+00> : vector<256x128xf32>
    %78 = tpu.matmul %75, %77, %cst_39 {dimension_numbers = #tpu.dot_dimension_numbers<[1], [0], [0], [1], [0, 0, 1, 1], [], []>} : vector<256x128xf32>, vector<128x128xf32>, vector<256x128xf32> -> vector<256x128xf32>
    %79 = arith.addf %70, %78 : vector<256x128xf32>
    %c23 = arith.constant 23 : index
    %c0_40 = arith.constant 0 : index
    %80 = vector.load %arg15[%c23, %c0_40] : memref<297x128xf32, #tpu.memory_space<vmem>>, vector<256x128xf32>
    %cst_41 = arith.constant 0.000000e+00 : f32
    %81 = vector.shape_cast %18 : vector<256x1xi1> to vector<256x1xi1>
    %82 = vector.broadcast %81 : vector<256x1xi1> to vector<256x128xi1>
    %83 = vector.broadcast %cst_41 : f32 to vector<256x128xf32>
    %84 = arith.select %82, %80, %83 : vector<256x128xi1>, vector<256x128xf32>
    %c3 = arith.constant 3 : index
    %c0_42 = arith.constant 0 : index
    %c0_43 = arith.constant 0 : index
    %85 = vector.load %arg5[%c3, %c0_42, %c0_43] : memref<9x128x128xf32, #tpu.memory_space<vmem>>, vector<1x128x128xf32>
    %86 = vector.shape_cast %85 : vector<1x128x128xf32> to vector<128x128xf32>
    %cst_44 = arith.constant dense<0.000000e+00> : vector<256x128xf32>
    %87 = tpu.matmul %84, %86, %cst_44 {dimension_numbers = #tpu.dot_dimension_numbers<[1], [0], [0], [1], [0, 0, 1, 1], [], []>} : vector<256x128xf32>, vector<128x128xf32>, vector<256x128xf32> -> vector<256x128xf32>
    %88 = arith.addf %79, %87 : vector<256x128xf32>
    %c24_45 = arith.constant 24 : index
    %c0_46 = arith.constant 0 : index
    %89 = vector.load %arg15[%c24_45, %c0_46] : memref<297x128xf32, #tpu.memory_space<vmem>>, vector<256x128xf32>
    %c4 = arith.constant 4 : index
    %c0_47 = arith.constant 0 : index
    %c0_48 = arith.constant 0 : index
    %90 = vector.load %arg5[%c4, %c0_47, %c0_48] : memref<9x128x128xf32, #tpu.memory_space<vmem>>, vector<1x128x128xf32>
    %91 = vector.shape_cast %90 : vector<1x128x128xf32> to vector<128x128xf32>
    %cst_49 = arith.constant dense<0.000000e+00> : vector<256x128xf32>
    %92 = tpu.matmul %89, %91, %cst_49 {dimension_numbers = #tpu.dot_dimension_numbers<[1], [0], [0], [1], [0, 0, 1, 1], [], []>} : vector<256x128xf32>, vector<128x128xf32>, vector<256x128xf32> -> vector<256x128xf32>
    %93 = arith.addf %88, %92 : vector<256x128xf32>
    %c25 = arith.constant 25 : index
    %c0_50 = arith.constant 0 : index
    %94 = vector.load %arg15[%c25, %c0_50] : memref<297x128xf32, #tpu.memory_space<vmem>>, vector<256x128xf32>
    %cst_51 = arith.constant 0.000000e+00 : f32
    %95 = vector.shape_cast %20 : vector<256x1xi1> to vector<256x1xi1>
    %96 = vector.broadcast %95 : vector<256x1xi1> to vector<256x128xi1>
    %97 = vector.broadcast %cst_51 : f32 to vector<256x128xf32>
    %98 = arith.select %96, %94, %97 : vector<256x128xi1>, vector<256x128xf32>
    %c5 = arith.constant 5 : index
    %c0_52 = arith.constant 0 : index
    %c0_53 = arith.constant 0 : index
    %99 = vector.load %arg5[%c5, %c0_52, %c0_53] : memref<9x128x128xf32, #tpu.memory_space<vmem>>, vector<1x128x128xf32>
    %100 = vector.shape_cast %99 : vector<1x128x128xf32> to vector<128x128xf32>
    %cst_54 = arith.constant dense<0.000000e+00> : vector<256x128xf32>
    %101 = tpu.matmul %98, %100, %cst_54 {dimension_numbers = #tpu.dot_dimension_numbers<[1], [0], [0], [1], [0, 0, 1, 1], [], []>} : vector<256x128xf32>, vector<128x128xf32>, vector<256x128xf32> -> vector<256x128xf32>
    %102 = arith.addf %93, %101 : vector<256x128xf32>
    %c39 = arith.constant 39 : index
    %c0_55 = arith.constant 0 : index
    %103 = vector.load %arg15[%c39, %c0_55] : memref<297x128xf32, #tpu.memory_space<vmem>>, vector<256x128xf32>
    %cst_56 = arith.constant 0.000000e+00 : f32
    %104 = vector.shape_cast %18 : vector<256x1xi1> to vector<256x1xi1>
    %105 = vector.broadcast %104 : vector<256x1xi1> to vector<256x128xi1>
    %106 = vector.broadcast %cst_56 : f32 to vector<256x128xf32>
    %107 = arith.select %105, %103, %106 : vector<256x128xi1>, vector<256x128xf32>
    %c6 = arith.constant 6 : index
    %c0_57 = arith.constant 0 : index
    %c0_58 = arith.constant 0 : index
    %108 = vector.load %arg5[%c6, %c0_57, %c0_58] : memref<9x128x128xf32, #tpu.memory_space<vmem>>, vector<1x128x128xf32>
    %109 = vector.shape_cast %108 : vector<1x128x128xf32> to vector<128x128xf32>
    %cst_59 = arith.constant dense<0.000000e+00> : vector<256x128xf32>
    %110 = tpu.matmul %107, %109, %cst_59 {dimension_numbers = #tpu.dot_dimension_numbers<[1], [0], [0], [1], [0, 0, 1, 1], [], []>} : vector<256x128xf32>, vector<128x128xf32>, vector<256x128xf32> -> vector<256x128xf32>
    %111 = arith.addf %102, %110 : vector<256x128xf32>
    %c40 = arith.constant 40 : index
    %c0_60 = arith.constant 0 : index
    %112 = vector.load %arg15[%c40, %c0_60] : memref<297x128xf32, #tpu.memory_space<vmem>>, vector<256x128xf32>
    %c7_61 = arith.constant 7 : index
    %c0_62 = arith.constant 0 : index
    %c0_63 = arith.constant 0 : index
    %113 = vector.load %arg5[%c7_61, %c0_62, %c0_63] : memref<9x128x128xf32, #tpu.memory_space<vmem>>, vector<1x128x128xf32>
    %114 = vector.shape_cast %113 : vector<1x128x128xf32> to vector<128x128xf32>
    %cst_64 = arith.constant dense<0.000000e+00> : vector<256x128xf32>
    %115 = tpu.matmul %112, %114, %cst_64 {dimension_numbers = #tpu.dot_dimension_numbers<[1], [0], [0], [1], [0, 0, 1, 1], [], []>} : vector<256x128xf32>, vector<128x128xf32>, vector<256x128xf32> -> vector<256x128xf32>
    %116 = arith.addf %111, %115 : vector<256x128xf32>
    %c41 = arith.constant 41 : index
    %c0_65 = arith.constant 0 : index
    %117 = vector.load %arg15[%c41, %c0_65] : memref<297x128xf32, #tpu.memory_space<vmem>>, vector<256x128xf32>
    %cst_66 = arith.constant 0.000000e+00 : f32
    %118 = vector.shape_cast %20 : vector<256x1xi1> to vector<256x1xi1>
    %119 = vector.broadcast %118 : vector<256x1xi1> to vector<256x128xi1>
    %120 = vector.broadcast %cst_66 : f32 to vector<256x128xf32>
    %121 = arith.select %119, %117, %120 : vector<256x128xi1>, vector<256x128xf32>
    %c8_67 = arith.constant 8 : index
    %c0_68 = arith.constant 0 : index
    %c0_69 = arith.constant 0 : index
    %122 = vector.load %arg5[%c8_67, %c0_68, %c0_69] : memref<9x128x128xf32, #tpu.memory_space<vmem>>, vector<1x128x128xf32>
    %123 = vector.shape_cast %122 : vector<1x128x128xf32> to vector<128x128xf32>
    %cst_70 = arith.constant dense<0.000000e+00> : vector<256x128xf32>
    %124 = tpu.matmul %121, %123, %cst_70 {dimension_numbers = #tpu.dot_dimension_numbers<[1], [0], [0], [1], [0, 0, 1, 1], [], []>} : vector<256x128xf32>, vector<128x128xf32>, vector<256x128xf32> -> vector<256x128xf32>
    %125 = arith.addf %116, %124 : vector<256x128xf32>
    %cst_71 = arith.constant dense<0.000000e+00> : vector<128xf32>
    %126 = vector.multi_reduction <add>, %125, %cst_71 [0] : vector<256x128xf32> to vector<128xf32>
    %127 = vector.shape_cast %126 : vector<128xf32> to vector<1x128xf32>
    %128 = arith.mulf %125, %125 : vector<256x128xf32>
    %cst_72 = arith.constant dense<0.000000e+00> : vector<128xf32>
    %129 = vector.multi_reduction <add>, %128, %cst_72 [0] : vector<256x128xf32> to vector<128xf32>
    %130 = vector.shape_cast %129 : vector<128xf32> to vector<1x128xf32>
    %cst_73 = arith.constant 3.906250e-03 : f32
    %131 = vector.broadcast %cst_73 : f32 to vector<1x128xf32>
    %132 = arith.mulf %127, %131 : vector<1x128xf32>
    %cst_74 = arith.constant 3.906250e-03 : f32
    %133 = vector.broadcast %cst_74 : f32 to vector<1x128xf32>
    %134 = arith.mulf %130, %133 : vector<1x128xf32>
    %135 = arith.mulf %132, %132 : vector<1x128xf32>
    %136 = arith.subf %134, %135 : vector<1x128xf32>
    %cst_75 = arith.constant 0.000000e+00 : f32
    %137 = vector.broadcast %cst_75 : f32 to vector<1x128xf32>
    %138 = arith.maximumf %136, %137 : vector<1x128xf32>
    %139 = vector.broadcast %132 : vector<1x128xf32> to vector<256x128xf32>
    %140 = arith.subf %125, %139 : vector<256x128xf32>
    %cst_76 = arith.constant 9.99999974E-6 : f32
    %141 = vector.broadcast %cst_76 : f32 to vector<1x128xf32>
    %142 = arith.addf %138, %141 : vector<1x128xf32>
    %143 = math.rsqrt %142 : vector<1x128xf32>
    %144 = vector.broadcast %143 : vector<1x128xf32> to vector<256x128xf32>
    %145 = arith.mulf %140, %144 : vector<256x128xf32>
    %c0_77 = arith.constant 0 : index
    %c0_78 = arith.constant 0 : index
    %146 = vector.load %arg6[%c0_77, %c0_78] : memref<1x128xf32, #tpu.memory_space<vmem>>, vector<1x128xf32>
    %147 = vector.broadcast %146 : vector<1x128xf32> to vector<256x128xf32>
    %148 = arith.mulf %145, %147 : vector<256x128xf32>
    %c0_79 = arith.constant 0 : index
    %c0_80 = arith.constant 0 : index
    %149 = vector.load %arg7[%c0_79, %c0_80] : memref<1x128xf32, #tpu.memory_space<vmem>>, vector<1x128xf32>
    %150 = vector.broadcast %149 : vector<1x128xf32> to vector<256x128xf32>
    %151 = arith.addf %148, %150 : vector<256x128xf32>
    %cst_81 = arith.constant 0.000000e+00 : f32
    %152 = vector.broadcast %cst_81 : f32 to vector<256x128xf32>
    %153 = arith.maximumf %151, %152 : vector<256x128xf32>
    %c0_82 = arith.constant 0 : index
    %c0_83 = arith.constant 0 : index
    %154 = vector.load %arg8[%c0_82, %c0_83] : memref<128x128xf32, #tpu.memory_space<vmem>>, vector<128x128xf32>
    %cst_84 = arith.constant dense<0.000000e+00> : vector<256x128xf32>
    %155 = tpu.matmul %153, %154, %cst_84 {dimension_numbers = #tpu.dot_dimension_numbers<[1], [0], [0], [1], [0, 0, 1, 1], [], []>} : vector<256x128xf32>, vector<128x128xf32>, vector<256x128xf32> -> vector<256x128xf32>
    %cst_85 = arith.constant dense<0.000000e+00> : vector<128xf32>
    %156 = vector.multi_reduction <add>, %155, %cst_85 [0] : vector<256x128xf32> to vector<128xf32>
    %157 = vector.shape_cast %156 : vector<128xf32> to vector<1x128xf32>
    %158 = arith.mulf %155, %155 : vector<256x128xf32>
    %cst_86 = arith.constant dense<0.000000e+00> : vector<128xf32>
    %159 = vector.multi_reduction <add>, %158, %cst_86 [0] : vector<256x128xf32> to vector<128xf32>
    %160 = vector.shape_cast %159 : vector<128xf32> to vector<1x128xf32>
    %cst_87 = arith.constant 3.906250e-03 : f32
    %161 = vector.broadcast %cst_87 : f32 to vector<1x128xf32>
    %162 = arith.mulf %157, %161 : vector<1x128xf32>
    %cst_88 = arith.constant 3.906250e-03 : f32
    %163 = vector.broadcast %cst_88 : f32 to vector<1x128xf32>
    %164 = arith.mulf %160, %163 : vector<1x128xf32>
    %165 = arith.mulf %162, %162 : vector<1x128xf32>
    %166 = arith.subf %164, %165 : vector<1x128xf32>
    %cst_89 = arith.constant 0.000000e+00 : f32
    %167 = vector.broadcast %cst_89 : f32 to vector<1x128xf32>
    %168 = arith.maximumf %166, %167 : vector<1x128xf32>
    %169 = vector.broadcast %162 : vector<1x128xf32> to vector<256x128xf32>
    %170 = arith.subf %155, %169 : vector<256x128xf32>
    %cst_90 = arith.constant 9.99999974E-6 : f32
    %171 = vector.broadcast %cst_90 : f32 to vector<1x128xf32>
    %172 = arith.addf %168, %171 : vector<1x128xf32>
    %173 = math.rsqrt %172 : vector<1x128xf32>
    %174 = vector.broadcast %173 : vector<1x128xf32> to vector<256x128xf32>
    %175 = arith.mulf %170, %174 : vector<256x128xf32>
    %c0_91 = arith.constant 0 : index
    %c0_92 = arith.constant 0 : index
    %176 = vector.load %arg9[%c0_91, %c0_92] : memref<1x128xf32, #tpu.memory_space<vmem>>, vector<1x128xf32>
    %177 = vector.broadcast %176 : vector<1x128xf32> to vector<256x128xf32>
    %178 = arith.mulf %175, %177 : vector<256x128xf32>
    %c0_93 = arith.constant 0 : index
    %c0_94 = arith.constant 0 : index
    %179 = vector.load %arg10[%c0_93, %c0_94] : memref<1x128xf32, #tpu.memory_space<vmem>>, vector<1x128xf32>
    %180 = vector.broadcast %179 : vector<1x128xf32> to vector<256x128xf32>
    %181 = arith.addf %178, %180 : vector<256x128xf32>
    %c0_95 = arith.constant 0 : index
    %c0_96 = arith.constant 0 : index
    %182 = vector.load %arg11[%c0_95, %c0_96] : memref<4x128xf32, #tpu.memory_space<vmem>>, vector<4x128xf32>
    %cst_97 = arith.constant dense<0.000000e+00> : vector<256x128xf32>
    %183 = tpu.matmul %22, %182, %cst_97 {dimension_numbers = #tpu.dot_dimension_numbers<[1], [0], [0], [1], [0, 0, 1, 1], [], []>} : vector<256x4xf32>, vector<4x128xf32>, vector<256x128xf32> -> vector<256x128xf32>
    %cst_98 = arith.constant dense<0.000000e+00> : vector<128xf32>
    %184 = vector.multi_reduction <add>, %183, %cst_98 [0] : vector<256x128xf32> to vector<128xf32>
    %185 = vector.shape_cast %184 : vector<128xf32> to vector<1x128xf32>
    %186 = arith.mulf %183, %183 : vector<256x128xf32>
    %cst_99 = arith.constant dense<0.000000e+00> : vector<128xf32>
    %187 = vector.multi_reduction <add>, %186, %cst_99 [0] : vector<256x128xf32> to vector<128xf32>
    %188 = vector.shape_cast %187 : vector<128xf32> to vector<1x128xf32>
    %cst_100 = arith.constant 3.906250e-03 : f32
    %189 = vector.broadcast %cst_100 : f32 to vector<1x128xf32>
    %190 = arith.mulf %185, %189 : vector<1x128xf32>
    %cst_101 = arith.constant 3.906250e-03 : f32
    %191 = vector.broadcast %cst_101 : f32 to vector<1x128xf32>
    %192 = arith.mulf %188, %191 : vector<1x128xf32>
    %193 = arith.mulf %190, %190 : vector<1x128xf32>
    %194 = arith.subf %192, %193 : vector<1x128xf32>
    %cst_102 = arith.constant 0.000000e+00 : f32
    %195 = vector.broadcast %cst_102 : f32 to vector<1x128xf32>
    %196 = arith.maximumf %194, %195 : vector<1x128xf32>
    %197 = vector.broadcast %190 : vector<1x128xf32> to vector<256x128xf32>
    %198 = arith.subf %183, %197 : vector<256x128xf32>
    %cst_103 = arith.constant 9.99999974E-6 : f32
    %199 = vector.broadcast %cst_103 : f32 to vector<1x128xf32>
    %200 = arith.addf %196, %199 : vector<1x128xf32>
    %201 = math.rsqrt %200 : vector<1x128xf32>
    %202 = vector.broadcast %201 : vector<1x128xf32> to vector<256x128xf32>
    %203 = arith.mulf %198, %202 : vector<256x128xf32>
    %c0_104 = arith.constant 0 : index
    %c0_105 = arith.constant 0 : index
    %204 = vector.load %arg12[%c0_104, %c0_105] : memref<1x128xf32, #tpu.memory_space<vmem>>, vector<1x128xf32>
    %205 = vector.broadcast %204 : vector<1x128xf32> to vector<256x128xf32>
    %206 = arith.mulf %203, %205 : vector<256x128xf32>
    %c0_106 = arith.constant 0 : index
    %c0_107 = arith.constant 0 : index
    %207 = vector.load %arg13[%c0_106, %c0_107] : memref<1x128xf32, #tpu.memory_space<vmem>>, vector<1x128xf32>
    %208 = vector.broadcast %207 : vector<1x128xf32> to vector<256x128xf32>
    %209 = arith.addf %206, %208 : vector<256x128xf32>
    %210 = arith.addf %181, %209 : vector<256x128xf32>
    %cst_108 = arith.constant 0.000000e+00 : f32
    %211 = vector.broadcast %cst_108 : f32 to vector<256x128xf32>
    %212 = arith.maximumf %210, %211 : vector<256x128xf32>
    %c0_109 = arith.constant 0 : index
    %c0_110 = arith.constant 0 : index
    %c0_111 = arith.constant 0 : index
    %213 = vector.load %arg14[%c0_109, %c0_110, %c0_111] : memref<1x256x128xf32, #tpu.memory_space<vmem>>, vector<1x256x128xf32>
    %214 = vector.shape_cast %213 : vector<1x256x128xf32> to vector<256x128xf32>
    %215 = vector.shape_cast %212 : vector<256x128xf32> to vector<1x256x128xf32>
    tpu.vector_store %arg14[%c0_109, %c0_110, %c0_111], %215 {strides = array<i32>} : memref<1x256x128xf32, #tpu.memory_space<vmem>>, vector<1x256x128xf32>,
    return
  }
  func.func @transform_0(%arg0: i32) -> (i32, i32, i32) {
    %c0_i32 = arith.constant 0 : i32
    %c0_i32_0 = arith.constant 0 : i32
    %c0_i32_1 = arith.constant 0 : i32
    return %arg0, %c0_i32, %c0_i32_0 : i32, i32, i32
  }
  func.func @transform_1(%arg0: i32) -> (i32, i32) {
    %c0_i32 = arith.constant 0 : i32
    %c0_i32_0 = arith.constant 0 : i32
    %c0_i32_1 = arith.constant 0 : i32
    return %c0_i32, %c0_i32_0 : i32, i32
  }
  func.func @transform_2(%arg0: i32) -> (i32, i32) {
    %c0_i32 = arith.constant 0 : i32
    %c0_i32_0 = arith.constant 0 : i32
    %c0_i32_1 = arith.constant 0 : i32
    return %c0_i32, %c0_i32_0 : i32, i32
  }
  func.func @transform_3(%arg0: i32) -> (i32, i32) {
    %c0_i32 = arith.constant 0 : i32
    %c0_i32_0 = arith.constant 0 : i32
    %c0_i32_1 = arith.constant 0 : i32
    return %c0_i32, %c0_i32_0 : i32, i32
  }
  func.func @transform_4(%arg0: i32) -> (i32, i32, i32) {
    %c0_i32 = arith.constant 0 : i32
    %c0_i32_0 = arith.constant 0 : i32
    %c0_i32_1 = arith.constant 0 : i32
    %c0_i32_2 = arith.constant 0 : i32
    return %c0_i32, %c0_i32_0, %c0_i32_1 : i32, i32, i32
  }
  func.func @transform_5(%arg0: i32) -> (i32, i32) {
    %c0_i32 = arith.constant 0 : i32
    %c0_i32_0 = arith.constant 0 : i32
    %c0_i32_1 = arith.constant 0 : i32
    return %c0_i32, %c0_i32_0 : i32, i32
  }
  func.func @transform_6(%arg0: i32) -> (i32, i32) {
    %c0_i32 = arith.constant 0 : i32
    %c0_i32_0 = arith.constant 0 : i32
    %c0_i32_1 = arith.constant 0 : i32
    return %c0_i32, %c0_i32_0 : i32, i32
  }
  func.func @transform_7(%arg0: i32) -> (i32, i32) {
    %c0_i32 = arith.constant 0 : i32
    %c0_i32_0 = arith.constant 0 : i32
    %c0_i32_1 = arith.constant 0 : i32
    return %c0_i32, %c0_i32_0 : i32, i32
  }
  func.func @transform_8(%arg0: i32) -> (i32, i32) {
    %c0_i32 = arith.constant 0 : i32
    %c0_i32_0 = arith.constant 0 : i32
    %c0_i32_1 = arith.constant 0 : i32
    return %c0_i32, %c0_i32_0 : i32, i32
  }
  func.func @transform_9(%arg0: i32) -> (i32, i32) {
    %c0_i32 = arith.constant 0 : i32
    %c0_i32_0 = arith.constant 0 : i32
    %c0_i32_1 = arith.constant 0 : i32
    return %c0_i32, %c0_i32_0 : i32, i32
  }
  func.func @transform_10(%arg0: i32) -> (i32, i32) {
    %c0_i32 = arith.constant 0 : i32
    %c0_i32_0 = arith.constant 0 : i32
    %c0_i32_1 = arith.constant 0 : i32
    return %c0_i32, %c0_i32_0 : i32, i32
  }
  func.func @transform_11(%arg0: i32) -> (i32, i32) {
    %c0_i32 = arith.constant 0 : i32
    %c0_i32_0 = arith.constant 0 : i32
    %c0_i32_1 = arith.constant 0 : i32
    return %c0_i32, %c0_i32_0 : i32, i32
  }
  func.func @transform_12(%arg0: i32) -> (i32, i32) {
    %c0_i32 = arith.constant 0 : i32
    %c0_i32_0 = arith.constant 0 : i32
    %c0_i32_1 = arith.constant 0 : i32
    return %c0_i32, %c0_i32_0 : i32, i32
  }
  func.func @transform_13(%arg0: i32) -> (i32, i32, i32) {
    %c0_i32 = arith.constant 0 : i32
    %c0_i32_0 = arith.constant 0 : i32
    %c0_i32_1 = arith.constant 0 : i32
    return %arg0, %c0_i32, %c0_i32_0 : i32, i32, i32
  }
}

</mosaic_0001>

<bundles_post_ra>
// kernel: bottleneck_forward.1
= control target key start
LH: loop header
LB: loop body
LE: loop exit
PB: predicated region body
PF: predicated region fallthrough
CT: control target
= control target key end

     0   :  { %s8495_s25 = smov 0   ;;  %s11735_s0 = inlined_call_operand.vmem [shape: f32[2,256,4], index: 0, kind: input, shape index: {}]   ;;  %s11736_s1 = inlined_call_operand.vmem [shape: f32[4,128], index: 1, kind: input, shape index: {}]   ;;  %s11737_s2 = inlined_call_operand.vmem [shape: f32[1,128], index: 2, kind: input, shape index: {}]   ;;  %s11738_s3 = inlined_call_operand.vmem [shape: f32[1,128], index: 3, kind: input, shape index: {}]   ;;  %s11739_s4 = inlined_call_operand.vmem [shape: f32[9,128,128], index: 4, kind: input, shape index: {}]   ;;  %s11740_s5 = inlined_call_operand.vmem [shape: f32[1,128], index: 5, kind: input, shape index: {}]   ;;  %s11741_s6 = inlined_call_operand.vmem [shape: f32[1,128], index: 6, kind: input, shape index: {}]   ;;  %s11742_s7 = inlined_call_operand.vmem [shape: f32[128,128], index: 7, kind: input, shape index: {}]   ;;  %s11743_s8 = inlined_call_operand.vmem [shape: f32[1,128], index: 8, kind: input, shape index: {}]   ;;  %s11744_s9 = inlined_call_operand.vmem [shape: f32[1,128], index: 9, kind: input, shape index: {}]   ;;  %s11745_s10 = inlined_call_operand.vmem [shape: f32[4,128], index: 10, kind: input, shape index: {}]   ;;  %s11746_s11 = inlined_call_operand.vmem [shape: f32[1,128], index: 11, kind: input, shape index: {}]   ;;  %s11747_s12 = inlined_call_operand.vmem [shape: f32[1,128], index: 12, kind: input, shape index: {}]   ;;  %s11748_s13 = inlined_call_operand.vmem [shape: f32[2,256,128], index: 13, kind: output, shape index: {}]  }
   0x1 LB: > { %s6033_s26 = sadd.s32 4294967295, %s8422_s25   ;;  %p6037_p0 = scmp.ge.s32.totalorder %s8422_s25, 1  ;;  %s8422_s25 = sphi %s8495_s25, %s23_s25  }
   0x2   : > { %p387_p1 = scmp.lt.s32.totalorder %s8422_s25, 3 }
   0x4   : > { %p388_p2 = pnand %p6037_p0, %p387_p1 }
   0x6   : > { %391 = sbr.rel (%p388_p2) target bundleno = 1457 (0x5b1), region = 72 }
   0xd   : > { %v954_v0 = vld [vmem:[%s11736_s1] sm:$0xf]  ;;  %vm11773_vm0 = vcmask 1043456   ;;  %p431_p3 = scmp.lt.s32.totalorder %s6033_s26, 1  ;;  %vm11768_vm1 = vcmask 31744   ;;  %v6078_v34 = vld [vmem:[%s11739_s4 + $0x88] sm:$0xff] }
   0xe   : > { %6890 = vmatprep.subr.msk.mxu0 %vm11773_vm0, %v954_v0  ;;  %v6077_v33 = vld [vmem:[%s11739_s4 + $0x80] sm:$0xff]  ;;  %v6079_v36 = vld [vmem:[%s11739_s4 + $0x90] sm:$0xff]  ;;  %v6080_v37 = vld [vmem:[%s11739_s4 + $0x98] sm:$0xff] }
   0xf   : > { %6891 = vmatpush3.msk.msra.mxu0 %vm11773_vm0, %v954_v0  ;;  %s12168_s26 = smov (!%p431_p3, %s6033_s26), 1  ;;  %v7790_v35 = vpack.c.bf16 %v6078_v34, %v6077_v33  ;;  %v7794_v38 = vpack.c.bf16 %v6080_v37, %v6079_v36  ;;  %v6081_v39 = vld [vmem:[%s11739_s4 + $0xa0] sm:$0xff]  ;;  %v6082_v40 = vld [vmem:[%s11739_s4 + $0xa8] sm:$0xff]  ;;  %v6083_v44 = vld [vmem:[%s11739_s4 + $0xb0] sm:$0xff] }
  0x10   : > { %s6342_s29 = sshll.u32 %s12168_s26, 8  ;;  %v7798_v41 = vpack.c.bf16 %v6082_v40, %v6081_v39  ;;  %v6141_v42 = vld [vmem:[%s11739_s4 + $0x180] sm:$0xff]  ;;  %v6142_v43 = vld [vmem:[%s11739_s4 + $0x188] sm:$0xff]  ;;  %v6084_v46 = vld [vmem:[%s11739_s4 + $0xb8] sm:$0xff] }
  0x11   : > { %s8516_s15 = scalar_lea.vmem %s11735_s0, %s6342_s29  ;;  %7791 = vmatprep.subr.bf16.mxu0 %v7790_v35  ;;  %v7886_v45 = vpack.c.bf16 %v6142_v43, %v6141_v42  ;;  %v7802_v47 = vpack.c.bf16 %v6084_v46, %v6083_v44  ;;  %v6143_v48 = vld [vmem:[%s11739_s4 + $0x190] sm:$0xff]  ;;  %v6144_v49 = vld [vmem:[%s11739_s4 + $0x198] sm:$0xff]  ;;  %v6085_v50 = vld [vmem:[%s11739_s4 + $0xc0] sm:$0xff]  ;;  %s11674_s17 = scalar_lea.vmem %s11748_s13, %s6342_s29 }
  0x12   : > { %v922_v1 = vld [vmem:[%s8516_s15] sm:$0xff]  ;;  %v923_v2 = vld [vmem:[%s8516_s15 + $0x8] sm:$0xff]  ;;  %v924_v3 = vld [vmem:[%s8516_s15 + $0x10] sm:$0xff]  ;;  %v7890_v51 = vpack.c.bf16 %v6144_v49, %v6143_v48 }
  0x13   : > { %6892 = vmatprep.mubr.msk.f32.mxu0 %vm11768_vm1, %v922_v1  ;;  %v925_v4 = vld [vmem:[%s8516_s15 + $0x18] sm:$0xff]  ;;  %v926_v5 = vld [vmem:[%s8516_s15 + $0x20] sm:$0xff]  ;;  %v927_v6 = vld [vmem:[%s8516_s15 + $0x28] sm:$0xff]  ;;  %7887 = vmatprep.subr.bf16.mxu1 %v7886_v45 }
  0x14   : > { %6893 = vmatmul.mubr.msk.f32.vlgmr.msra.gmra.mrb[0].mxu0 %vm11768_vm1, %v923_v2  ;;  %v928_v7 = vld [vmem:[%s8516_s15 + $0x30] sm:$0xff]  ;;  %v929_v8 = vld [vmem:[%s8516_s15 + $0x38] sm:$0xff]  ;;  %v930_v9 = vld [vmem:[%s8516_s15 + $0x40] sm:$0xff]  ;;  %7889 = vmatpush3.bf16.msra.mxu1 %v7886_v45 }
  0x15   : > { %6895 = vmatprep.mubr.msk.f32.mxu0 %vm11768_vm1, %v924_v3  ;;  %v931_v10 = vld [vmem:[%s8516_s15 + $0x48] sm:$0xff]  ;;  %v932_v11 = vld [vmem:[%s8516_s15 + $0x50] sm:$0xff]  ;;  %v933_v12 = vld [vmem:[%s8516_s15 + $0x58] sm:$0xff]  ;;  %7793 = vmatpush3.bf16.msra.mxu0 %v7790_v35 }
  0x16   : > { %v934_v13 = vld [vmem:[%s8516_s15 + $0x60] sm:$0xff]  ;;  %v935_v14 = vld [vmem:[%s8516_s15 + $0x68] sm:$0xff]  ;;  %v936_v15 = vld [vmem:[%s8516_s15 + $0x70] sm:$0xff]  ;;  %7795 = vmatprep.subr.bf16.mxu0 %v7794_v38  ;;  %7891 = vmatprep.subr.bf16.mxu1 %v7890_v51 }
  0x17   : > { %v937_v16 = vld [vmem:[%s8516_s15 + $0x78] sm:$0xff]  ;;  %v938_v17 = vld [vmem:[%s8516_s15 + $0x80] sm:$0xff]  ;;  %v939_v18 = vld [vmem:[%s8516_s15 + $0x88] sm:$0xff] }
  0x18   : > { %6896 = vmatmul.mubr.msk.f32.gmra.mrb[2].mxu0 %vm11768_vm1, %v925_v4  ;;  %v940_v19 = vld [vmem:[%s8516_s15 + $0x90] sm:$0xff]  ;;  %v941_v20 = vld [vmem:[%s8516_s15 + $0x98] sm:$0xff]  ;;  %v942_v21 = vld [vmem:[%s8516_s15 + $0xa0] sm:$0xff]  ;;  %7893 = vmatpush3.bf16.msra.mxu1 %v7890_v51 }
  0x19   : > { %6898 = vmatprep.mubr.msk.f32.mxu0 %vm11768_vm1, %v926_v5  ;;  %v943_v22 = vld [vmem:[%s8516_s15 + $0xa8] sm:$0xff]  ;;  %v944_v23 = vld [vmem:[%s8516_s15 + $0xb0] sm:$0xff]  ;;  %v945_v24 = vld [vmem:[%s8516_s15 + $0xb8] sm:$0xff]  ;;  %7797 = vmatpush3.bf16.msra.mxu0 %v7794_v38 }
  0x1a   : > { %v946_v25 = vld [vmem:[%s8516_s15 + $0xc0] sm:$0xff]  ;;  %v947_v26 = vld [vmem:[%s8516_s15 + $0xc8] sm:$0xff]  ;;  %v948_v27 = vld [vmem:[%s8516_s15 + $0xd0] sm:$0xff]  ;;  %7799 = vmatprep.subr.bf16.mxu0 %v7798_v41 }
  0x1b   : > { %v949_v28 = vld [vmem:[%s8516_s15 + $0xd8] sm:$0xff]  ;;  %v950_v29 = vld [vmem:[%s8516_s15 + $0xe0] sm:$0xff]  ;;  %v951_v30 = vld [vmem:[%s8516_s15 + $0xe8] sm:$0xff] }
  0x1c   : > { %6899 = vmatmul.mubr.msk.f32.gmra.mrb[4].mxu0 %vm11768_vm1, %v927_v6  ;;  %v952_v31 = vld [vmem:[%s8516_s15 + $0xf0] sm:$0xff]  ;;  %v953_v32 = vld [vmem:[%s8516_s15 + $0xf8] sm:$0xff]  ;;  %v6086_v52 = vld [vmem:[%s11739_s4 + $0xc8] sm:$0xff] }
  0x1d   : > { %6901 = vmatprep.mubr.msk.f32.mxu0 %vm11768_vm1, %v928_v7  ;;  %7801 = vmatpush3.bf16.msra.mxu0 %v7798_v41  ;;  %v7806_v53 = vpack.c.bf16 %v6086_v52, %v6085_v50  ;;  %v6145_v54 = vld [vmem:[%s11739_s4 + $0x1a0] sm:$0xff]  ;;  %v6146_v55 = vld [vmem:[%s11739_s4 + $0x1a8] sm:$0xff]  ;;  %v6087_v56 = vld [vmem:[%s11739_s4 + $0xd0] sm:$0xff] }
  0x1e   : > { %7803 = vmatprep.subr.bf16.mxu0 %v7802_v47  ;;  %v7894_v57 = vpack.c.bf16 %v6146_v55, %v6145_v54  ;;  %v6088_v58 = vld [vmem:[%s11739_s4 + $0xd8] sm:$0xff]  ;;  %v6147_v60 = vld [vmem:[%s11739_s4 + $0x1b0] sm:$0xff]  ;;  %v6089_v62 = vld [vmem:[%s11739_s4 + $0xe0] sm:$0xff] }
  0x1f   : > { %v7810_v59 = vpack.c.bf16 %v6088_v58, %v6087_v56  ;;  %v6148_v61 = vld [vmem:[%s11739_s4 + $0x1b8] sm:$0xff]  ;;  %v6090_v0 = vld [vmem:[%s11739_s4 + $0xe8] sm:$0xff]  ;;  %v6149_v2 = vld [vmem:[%s11739_s4 + $0x1c0] sm:$0xff] }
  0x20   : > { %6902 = vmatmul.mubr.msk.f32.gmra.mrb[6].mxu0 %vm11768_vm1, %v929_v8  ;;  %7895 = vmatprep.subr.bf16.mxu1 %v7894_v57  ;;  %v7898_v63 = vpack.c.bf16 %v6148_v61, %v6147_v60  ;;  %v7814_v1 = vpack.c.bf16 %v6090_v0, %v6089_v62  ;;  %v6150_v3 = vld [vmem:[%s11739_s4 + $0x1c8] sm:$0xff]  ;;  %v6091_v4 = vld [vmem:[%s11739_s4 + $0xf0] sm:$0xff]  ;;  %v6092_v6 = vld [vmem:[%s11739_s4 + $0xf8] sm:$0xff] }
  0x21   : > { %6904 = vmatprep.mubr.msk.f32.mxu0 %vm11768_vm1, %v930_v9  ;;  %7805 = vmatpush3.bf16.msra.mxu0 %v7802_v47  ;;  %v7902_v5 = vpack.c.bf16 %v6150_v3, %v6149_v2  ;;  %v7818_v7 = vpack.c.bf16 %v6092_v6, %v6091_v4  ;;  %v6151_v8 = vld [vmem:[%s11739_s4 + $0x1d0] sm:$0xff]  ;;  %v6152_v9 = vld [vmem:[%s11739_s4 + $0x1d8] sm:$0xff] }
  0x22   : > { %7807 = vmatprep.subr.bf16.mxu0 %v7806_v53  ;;  %7897 = vmatpush3.bf16.msra.mxu1 %v7894_v57 }
  0x23   : > { %7899 = vmatprep.subr.bf16.mxu1 %v7898_v63 }
  0x24   : > { %6905 = vmatmul.mubr.msk.f32.gmra.mrb[8].mxu0 %vm11768_vm1, %v931_v10  ;;  %v7906_v10 = vpack.c.bf16 %v6152_v9, %v6151_v8 }
  0x25   : > { %6907 = vmatprep.mubr.msk.f32.mxu0 %vm11768_vm1, %v932_v11  ;;  %7809 = vmatpush3.bf16.msra.mxu0 %v7806_v53 }
  0x26   : > { %7811 = vmatprep.subr.bf16.mxu0 %v7810_v59  ;;  %7901 = vmatpush3.bf16.msra.mxu1 %v7898_v63 }
  0x27   : > { %7903 = vmatprep.subr.bf16.mxu1 %v7902_v5 }
  0x28   : > { %6908 = vmatmul.mubr.msk.f32.gmra.mrb[10].mxu0 %vm11768_vm1, %v933_v12  ;;  %v8424_v12 = vmov 0.0  }
  0x29   : > { %6910 = vmatprep.mubr.msk.f32.mxu0 %vm11768_vm1, %v934_v13  ;;  %7813 = vmatpush3.bf16.msra.mxu0 %v7810_v59  ;;  %1569 = vst [vmem:[#allocation2 + $0x8] sm:$0xff] %v8424_v12  ;;  %1568 = vst [vmem:[#allocation2] sm:$0xff] %v8424_v12 }
  0x2a   : > { %7815 = vmatprep.subr.bf16.mxu0 %v7814_v1  ;;  %7905 = vmatpush3.bf16.msra.mxu1 %v7902_v5  ;;  %1570 = vst [vmem:[#allocation2 + $0x10] sm:$0xff] %v8424_v12  ;;  %1571 = vst [vmem:[#allocation2 + $0x118] sm:$0xff] %v8424_v12 }
  0x2b   : > { %1572 = vst [vmem:[#allocation2 + $0x120] sm:$0xff] %v8424_v12  ;;  %1573 = vst [vmem:[#allocation2 + $0x128] sm:$0x1] %v8424_v12  ;;  %7907 = vmatprep.subr.bf16.mxu1 %v7906_v10 }
  0x2c   : > { %6911 = vmatmul.mubr.msk.f32.gmra.mrb[12].mxu0 %vm11768_vm1, %v935_v14 }
  0x2d   : > { %6913 = vmatprep.mubr.msk.f32.mxu0 %vm11768_vm1, %v936_v15  ;;  %7817 = vmatpush3.bf16.msra.mxu0 %v7814_v1 }
  0x2e   : > { %7819 = vmatprep.subr.bf16.mxu0 %v7818_v7  ;;  %7909 = vmatpush3.bf16.msra.mxu1 %v7906_v10 }
  0x30   : > { %6914 = vmatmul.mubr.msk.f32.gmra.mrb[14].mxu0 %vm11768_vm1, %v937_v16 }
  0x31   : > { %6916 = vmatprep.mubr.msk.f32.mxu0 %vm11768_vm1, %v938_v17  ;;  %7821 = vmatpush3.bf16.msra.mxu0 %v7818_v7  ;;  %v6153_v17 = vld [vmem:[%s11739_s4 + $0x1e0] sm:$0xff] }
  0x34   : > { %6917 = vmatmul.mubr.msk.f32.gmra.mrb[16].mxu0 %vm11768_vm1, %v939_v18  ;;  %v6154_v18 = vld [vmem:[%s11739_s4 + $0x1e8] sm:$0xff] }
  0x35   : > { %6919 = vmatprep.mubr.msk.f32.mxu0 %vm11768_vm1, %v940_v19  ;;  %v7910_v19 = vpack.c.bf16 %v6154_v18, %v6153_v17  ;;  %v1734_v17 = vld [vmem:[%s11739_s4] sm:$0xff]  ;;  %v1735_v18 = vld [vmem:[%s11739_s4 + $0x8] sm:$0xff] }
  0x37   : > { %7911 = vmatprep.subr.bf16.mxu1 %v7910_v19 }
  0x38   : > { %6920 = vmatmul.mubr.msk.f32.gmra.mrb[18].mxu0 %vm11768_vm1, %v941_v20  ;;  %7913 = vmatpush3.bf16.msra.mxu1 %v7910_v19  ;;  %v7822_v19 = vpack.c.bf16 %v1735_v18, %v1734_v17 }
  0x39   : > { %6922 = vmatprep.mubr.msk.f32.mxu0 %vm11768_vm1, %v942_v21 }
  0x3a   : > { %7823 = vmatprep.subr.bf16.mxu0 %v7822_v19 }
  0x3c   : > { %6923 = vmatmul.mubr.msk.f32.gmra.mrb[20].mxu0 %vm11768_vm1, %v943_v22  ;;  %v6155_v22 = vld [vmem:[%s11739_s4 + $0x1f0] sm:$0xff] }
  0x3d   : > { %6925 = vmatprep.mubr.msk.f32.mxu0 %vm11768_vm1, %v944_v23  ;;  %v6156_v23 = vld [vmem:[%s11739_s4 + $0x1f8] sm:$0xff] }
  0x40   : > { %6926 = vmatmul.mubr.msk.f32.gmra.mrb[22].mxu0 %vm11768_vm1, %v945_v24 }
  0x41   : > { %6928 = vmatprep.mubr.msk.f32.mxu0 %vm11768_vm1, %v946_v25  ;;  %v7914_v25 = vpack.c.bf16 %v6156_v23, %v6155_v22 }
  0x43   : > { %7915 = vmatprep.subr.bf16.mxu1 %v7914_v25 }
  0x44   : > { %6929 = vmatmul.mubr.msk.f32.gmra.mrb[24].mxu0 %vm11768_vm1, %v947_v26  ;;  %v6173_v26 = vld [vmem:[%s11739_s4 + $0x200] sm:$0xff]  ;;  %7917 = vmatpush3.bf16.msra.mxu1 %v7914_v25 }
  0x45   : > { %6931 = vmatprep.mubr.msk.f32.mxu0 %vm11768_vm1, %v948_v27  ;;  %v6174_v27 = vld [vmem:[%s11739_s4 + $0x208] sm:$0xff] }
  0x48   : > { %6932 = vmatmul.mubr.msk.f32.gmra.mrb[26].mxu0 %vm11768_vm1, %v949_v28 }
  0x49   : > { %6934 = vmatprep.mubr.msk.f32.mxu0 %vm11768_vm1, %v950_v29 }
  0x4c   : > { %6935 = vmatmul.mubr.msk.f32.gmra.mrb[28].mxu0 %vm11768_vm1, %v951_v30  ;;  %v8701_v30 = vpack.c.bf16 %v6174_v27, %v6173_v26 }
  0x4d   : > { %6937 = vmatprep.mubr.msk.f32.mxu0 %vm11768_vm1, %v952_v31 }
  0x4e   : > { %7919 = vmatprep.subr.bf16.mxu1 %v8701_v30 }
  0x50   : > { %6938 = vmatmul.mubr.msk.f32.gmra.mrb[30].mxu0 %vm11768_vm1, %v953_v32 }
  0x51   : > { %6972 = vmatprep.mubr.f32.mxu0 %v8424_v12 }
  0x54   : > { %6973 = vmatmul.mubr.f32.vlgmr.msra.gmra.mrb[32].mxu0 %v8424_v12 }
  0x55   : > { %7825 = vmatpush3.bf16.msra.mxu0 %v7822_v19 }
  0xe7   : > { %v8666_v11 = vpop.f32.mrb[0].mxu0 }
  0xe8   : > { %v1319_v13 = vmul.f32 %v8666_v11, %v8666_v11  ;;  %v8670_v14 = vpop.f32.mrb[1].mxu0 }
  0xe9   : > { %v1281_v15 = vadd.f32 %v8666_v11, %v8670_v14  ;;  %v1318_v16 = vmul.f32 %v8670_v14, %v8670_v14 }
  0xeb   : > { %v1350_v20 = vadd.f32 %v1319_v13, %v1318_v16  ;;  %v8682_v21 = vpop.f32.mrb[2].mxu0 }
  0xec   : > { %v8690_v24 = vpop.f32.mrb[3].mxu0  ;;  %v1321_v31 = vmul.f32 %v8682_v21, %v8682_v21 }
  0xed   : > { %v1282_v28 = vadd.f32 %v1281_v15, %v8690_v24  ;;  %v1320_v29 = vmul.f32 %v8690_v24, %v8690_v24 }
  0xef   : > { %v1351_v32 = vadd.f32 %v1350_v20, %v1320_v29  ;;  %v8705_v33 = vpop.f32.mrb[4].mxu0  ;;  %v1283_v34 = vadd.f32 %v8682_v21, %v1282_v28 }
  0xf0   : > { %v8708_v35 = vpop.f32.mrb[5].mxu0  ;;  %v1323_v39 = vmul.f32 %v8705_v33, %v8705_v33 }
  0xf1   : > { %v1284_v36 = vadd.f32 %v1283_v34, %v8708_v35  ;;  %v1322_v37 = vmul.f32 %v8708_v35, %v8708_v35  ;;  %v1352_v38 = vadd.f32 %v1351_v32, %v1321_v31  ;;  %v1736_v31 = vld [vmem:[%s11739_s4 + $0x10] sm:$0xff]  ;;  %v1737_v32 = vld [vmem:[%s11739_s4 + $0x18] sm:$0xff] }
  0xf2   : > { %v7826_v34 = vpack.c.bf16 %v1737_v32, %v1736_v31 }
  0xf3   : > { %v1353_v40 = vadd.f32 %v1352_v38, %v1322_v37  ;;  %v8716_v41 = vpop.f32.mrb[6].mxu0  ;;  %v1285_v42 = vadd.f32 %v8705_v33, %v1284_v36 }
  0xf4   : > { %v8719_v43 = vpop.f32.mrb[7].mxu0  ;;  %v1325_v47 = vmul.f32 %v8716_v41, %v8716_v41  ;;  %7827 = vmatprep.subr.bf16.mxu0 %v7826_v34 }
  0xf5   : > { %v1286_v44 = vadd.f32 %v1285_v42, %v8719_v43  ;;  %v1324_v45 = vmul.f32 %v8719_v43, %v8719_v43  ;;  %v1354_v46 = vadd.f32 %v1353_v40, %v1323_v39  ;;  %7829 = vmatpush3.bf16.msra.mxu0 %v7826_v34 }
  0xf7   : > { %v1355_v48 = vadd.f32 %v1354_v46, %v1324_v45  ;;  %v8726_v49 = vpop.f32.mrb[8].mxu0  ;;  %v1287_v50 = vadd.f32 %v8716_v41, %v1286_v44  ;;  %v1738_v46 = vld [vmem:[%s11739_s4 + $0x20] sm:$0xff] }
  0xf8   : > { %v8729_v51 = vpop.f32.mrb[9].mxu0  ;;  %v1327_v55 = vmul.f32 %v8726_v49, %v8726_v49 }
  0xf9   : > { %v1288_v52 = vadd.f32 %v1287_v50, %v8729_v51  ;;  %v1326_v53 = vmul.f32 %v8729_v51, %v8729_v51  ;;  %v1356_v54 = vadd.f32 %v1355_v48, %v1325_v47  ;;  %v1739_v47 = vld [vmem:[%s11739_s4 + $0x28] sm:$0xff] }
  0xfa   : > { %v7830_v48 = vpack.c.bf16 %v1739_v47, %v1738_v46  ;;  %v1746_v47 = vld [vmem:[%s11739_s4 + $0x60] sm:$0xff] }
  0xfb   : > { %v1357_v56 = vadd.f32 %v1356_v54, %v1326_v53  ;;  %v8736_v57 = vpop.f32.mrb[10].mxu0  ;;  %v1289_v58 = vadd.f32 %v8726_v49, %v1288_v52 }
  0xfc   : > { %v8739_v59 = vpop.f32.mrb[11].mxu0  ;;  %v1329_v63 = vmul.f32 %v8736_v57, %v8736_v57  ;;  %7831 = vmatprep.subr.bf16.mxu0 %v7830_v48 }
  0xfd   : > { %v1290_v60 = vadd.f32 %v1289_v58, %v8739_v59  ;;  %v1328_v61 = vmul.f32 %v8739_v59, %v8739_v59  ;;  %v1358_v62 = vadd.f32 %v1357_v56, %v1327_v55  ;;  %7833 = vmatpush3.bf16.msra.mxu0 %v7830_v48  ;;  %v1747_v48 = vld [vmem:[%s11739_s4 + $0x68] sm:$0xff] }
  0xff   : > { %v1359_v0 = vadd.f32 %v1358_v62, %v1328_v61  ;;  %v8746_v1 = vpop.f32.mrb[12].mxu0  ;;  %v1291_v2 = vadd.f32 %v8736_v57, %v1290_v60  ;;  %v1740_v61 = vld [vmem:[%s11739_s4 + $0x30] sm:$0xff]  ;;  %v1741_v62 = vld [vmem:[%s11739_s4 + $0x38] sm:$0xff] }
 0x100   : > { %v8749_v3 = vpop.f32.mrb[13].mxu0  ;;  %v1331_v7 = vmul.f32 %v8746_v1, %v8746_v1 }
 0x101   : > { %v1292_v4 = vadd.f32 %v1291_v2, %v8749_v3  ;;  %v1330_v5 = vmul.f32 %v8749_v3, %v8749_v3  ;;  %v1360_v6 = vadd.f32 %v1359_v0, %v1329_v63  ;;  %v7834_v63 = vpack.c.bf16 %v1741_v62, %v1740_v61 }
 0x103   : > { %v1361_v8 = vadd.f32 %v1360_v6, %v1330_v5  ;;  %v8756_v9 = vpop.f32.mrb[14].mxu0  ;;  %v1293_v10 = vadd.f32 %v8746_v1, %v1292_v4  ;;  %7835 = vmatprep.subr.bf16.mxu0 %v7834_v63 }
 0x104   : > { %v8759_v12 = vpop.f32.mrb[15].mxu0  ;;  %v1333_v20 = vmul.f32 %v8756_v9, %v8756_v9  ;;  %7837 = vmatpush3.bf16.msra.mxu0 %v7834_v63 }
 0x105   : > { %v1294_v13 = vadd.f32 %v1293_v10, %v8759_v12  ;;  %v1332_v15 = vmul.f32 %v8759_v12, %v8759_v12  ;;  %v1362_v16 = vadd.f32 %v1361_v8, %v1331_v7 }
 0x107   : > { %v1363_v22 = vadd.f32 %v1362_v16, %v1332_v15  ;;  %v8772_v23 = vpop.f32.mrb[16].mxu0  ;;  %v1295_v25 = vadd.f32 %v8756_v9, %v1294_v13  ;;  %v1742_v13 = vld [vmem:[%s11739_s4 + $0x40] sm:$0xff]  ;;  %v1743_v15 = vld [vmem:[%s11739_s4 + $0x48] sm:$0xff] }
 0x108   : > { %v8775_v26 = vpop.f32.mrb[17].mxu0  ;;  %v1335_v36 = vmul.f32 %v8772_v23, %v8772_v23  ;;  %v7838_v16 = vpack.c.bf16 %v1743_v15, %v1742_v13 }
 0x109   : > { %v1296_v27 = vadd.f32 %v1295_v25, %v8775_v26  ;;  %v1334_v28 = vmul.f32 %v8775_v26, %v8775_v26  ;;  %v1364_v29 = vadd.f32 %v1363_v22, %v1333_v20 }
 0x10a   : > { %7839 = vmatprep.subr.bf16.mxu0 %v7838_v16 }
 0x10b   : > { %v1365_v37 = vadd.f32 %v1364_v29, %v1334_v28  ;;  %v8788_v38 = vpop.f32.mrb[18].mxu0  ;;  %v1297_v39 = vadd.f32 %v8772_v23, %v1296_v27  ;;  %7841 = vmatpush3.bf16.msra.mxu0 %v7838_v16  ;;  %v1744_v29 = vld [vmem:[%s11739_s4 + $0x50] sm:$0xff] }
 0x10c   : > { %v8791_v40 = vpop.f32.mrb[19].mxu0  ;;  %v1337_v50 = vmul.f32 %v8788_v38, %v8788_v38 }
 0x10d   : > { %v1298_v42 = vadd.f32 %v1297_v39, %v8791_v40  ;;  %v1336_v44 = vmul.f32 %v8791_v40, %v8791_v40  ;;  %v1366_v45 = vadd.f32 %v1365_v37, %v1335_v36  ;;  %v1745_v37 = vld [vmem:[%s11739_s4 + $0x58] sm:$0xff] }
 0x10f   : > { %v1367_v52 = vadd.f32 %v1366_v45, %v1336_v44  ;;  %v8804_v53 = vpop.f32.mrb[20].mxu0  ;;  %v1299_v54 = vadd.f32 %v8788_v38, %v1298_v42  ;;  %v7842_v42 = vpack.c.bf16 %v1745_v37, %v1744_v29 }
 0x110   : > { %v8807_v55 = vpop.f32.mrb[21].mxu0  ;;  %v1339_v0 = vmul.f32 %v8804_v53, %v8804_v53 }
 0x111   : > { %v1300_v56 = vadd.f32 %v1299_v54, %v8807_v55  ;;  %v1338_v58 = vmul.f32 %v8807_v55, %v8807_v55  ;;  %v1368_v60 = vadd.f32 %v1367_v52, %v1337_v50  ;;  %7843 = vmatprep.subr.bf16.mxu0 %v7842_v42 }
 0x112   : > { %7845 = vmatpush3.bf16.msra.mxu0 %v7842_v42 }
 0x113   : > { %v1369_v2 = vadd.f32 %v1368_v60, %v1338_v58  ;;  %v8820_v4 = vpop.f32.mrb[22].mxu0  ;;  %v1301_v5 = vadd.f32 %v8804_v53, %v1300_v56  ;;  %v7846_v58 = vpack.c.bf16 %v1747_v48, %v1746_v47 }
 0x114   : > { %v8823_v6 = vpop.f32.mrb[23].mxu0  ;;  %v1341_v17 = vmul.f32 %v8820_v4, %v8820_v4 }
 0x115   : > { %v1302_v7 = vadd.f32 %v1301_v5, %v8823_v6  ;;  %v1340_v8 = vmul.f32 %v8823_v6, %v8823_v6  ;;  %v1370_v10 = vadd.f32 %v1369_v2, %v1339_v0  ;;  %7847 = vmatprep.subr.bf16.mxu0 %v7846_v58  ;;  %v1748_v0 = vld [vmem:[%s11739_s4 + $0x70] sm:$0xff] }
 0x116   : > { %7849 = vmatpush3.bf16.msra.mxu0 %v7846_v58 }
 0x117   : > { %v1371_v18 = vadd.f32 %v1370_v10, %v1340_v8  ;;  %v8836_v19 = vpop.f32.mrb[24].mxu0  ;;  %v1303_v20 = vadd.f32 %v8820_v4, %v1302_v7  ;;  %v1749_v10 = vld [vmem:[%s11739_s4 + $0x78] sm:$0xff] }
 0x118   : > { %v8839_v22 = vpop.f32.mrb[25].mxu0  ;;  %v1343_v31 = vmul.f32 %v8836_v19, %v8836_v19  ;;  %v7850_v15 = vpack.c.bf16 %v1749_v10, %v1748_v0 }
 0x119   : > { %v1304_v25 = vadd.f32 %v1303_v20, %v8839_v22  ;;  %v1342_v27 = vmul.f32 %v8839_v22, %v8839_v22  ;;  %v1372_v28 = vadd.f32 %v1371_v18, %v1341_v17 }
 0x11a   : > { %7851 = vmatprep.subr.bf16.mxu0 %v7850_v15 }
 0x11b   : > { %v1373_v32 = vadd.f32 %v1372_v28, %v1342_v27  ;;  %v8849_v34 = vpop.f32.mrb[26].mxu0  ;;  %v1305_v36 = vadd.f32 %v8836_v19, %v1304_v25  ;;  %7853 = vmatpush3.bf16.msra.mxu0 %v7850_v15 }
 0x11c   : > { %v8855_v39 = vpop.f32.mrb[27].mxu0  ;;  %v1345_v50 = vmul.f32 %v8849_v34, %v8849_v34 }
 0x11d   : > { %v1306_v44 = vadd.f32 %v1305_v36, %v8855_v39  ;;  %v1344_v45 = vmul.f32 %v8855_v39, %v8855_v39  ;;  %v1374_v46 = vadd.f32 %v1373_v32, %v1343_v31 }
 0x11f   : > { %v1375_v52 = vadd.f32 %v1374_v46, %v1344_v45  ;;  %v8868_v54 = vpop.f32.mrb[28].mxu0  ;;  %v1307_v56 = vadd.f32 %v8849_v34, %v1306_v44 }
 0x120   : > { %v8871_v60 = vpop.f32.mrb[29].mxu0  ;;  %v1347_v2 = vmul.f32 %v8868_v54, %v8868_v54 }
 0x121   : > { %v1308_v61 = vadd.f32 %v1307_v56, %v8871_v60  ;;  %v1346_v62 = vmul.f32 %v8871_v60, %v8871_v60  ;;  %v1376_v63 = vadd.f32 %v1375_v52, %v1345_v50  ;;  %v441_v56 = vlaneseq }
 0x123   : > { %v1377_v5 = vadd.f32 %v1376_v63, %v1346_v62  ;;  %v8881_v7 = vpop.f32.mrb[30].mxu0  ;;  %v1309_v8 = vadd.f32 %v8868_v54, %v1308_v61 }
 0x124   : > { %v8887_v13 = vpop.f32.mrb[31].mxu0  ;;  %v1349_v20 = vmul.f32 %v8881_v7, %v8881_v7 }
 0x125   : > { %v1310_v16 = vadd.f32 %v1309_v8, %v8887_v13  ;;  %v1348_v17 = vmul.f32 %v8887_v13, %v8887_v13  ;;  %v1378_v18 = vadd.f32 %v1377_v5, %v1347_v2 }
 0x127   : > { %v1311_v25 = vadd.f32 %v8881_v7, %v1310_v16  ;;  %v1379_v27 = vadd.f32 %v1378_v18, %v1348_v17 }
 0x129   : > { %v1312_v28 = vrot.slane %v1311_v25, 4  ;;  %v1380_v29 = vadd.f32 %v1379_v27, %v1349_v20 }
 0x12b   : > { %v1313_v31 = vadd.f32 %v1312_v28, %v1311_v25  ;;  %v1381_v32 = vrot.slane %v1380_v29, 4 }
 0x12d   : > { %v1314_v36 = vrot.slane %v1313_v31, 2  ;;  %v1382_v37 = vadd.f32 %v1381_v32, %v1380_v29  ;;  %v8990_v32 = vld [vmem:[%s11738_s3] ss:$0 sm:$0xff] }
 0x12f   : > { %v1315_v42 = vadd.f32 %v1314_v36, %v1313_v31  ;;  %v1383_v44 = vrot.slane %v1382_v37, 2 }
 0x131   : > { %v1316_v45 = vrot.slane %v1315_v42, 1  ;;  %v1384_v46 = vadd.f32 %v1383_v44, %v1382_v37 }
 0x133   : > { %v1317_v47 = vadd.f32 %v1316_v45, %v1315_v42  ;;  %v1385_v48 = vrot.slane %v1384_v46, 1 }
 0x135   : > { %v1386_v50 = vadd.f32 %v1385_v48, %v1384_v46  ;;  %v8895_v52 = vmul.f32 0.00390625, %v1317_v47 }
 0x137   : > { %v1388_v58 = vmul.f32 0.00390625, %v1386_v50  ;;  %v1389_v61 = vmul.f32 %v8895_v52, %v8895_v52  ;;  %v1422_v62 = vsub.f32 %v8887_v13, %v8895_v52  ;;  %v1392_v63 = vsub.f32 %v8670_v14, %v8895_v52 }
 0x138   : > { %v1393_v0 = vsub.f32 %v8666_v11, %v8895_v52  ;;  %v1394_v2 = vsub.f32 %v8690_v24, %v8895_v52  ;;  %v1395_v5 = vsub.f32 %v8682_v21, %v8895_v52  ;;  %v1396_v8 = vsub.f32 %v8708_v35, %v8895_v52 }
 0x139   : > { %v1390_v10 = vsub.f32 %v1388_v58, %v1389_v61  ;;  %v1397_v15 = vsub.f32 %v8705_v33, %v8895_v52  ;;  %v1398_v13 = vsub.f32 %v8719_v43, %v8895_v52  ;;  %v1399_v14 = vsub.f32 %v8716_v41, %v8895_v52 }
 0x13a   : > { %v1400_v11 = vsub.f32 %v8729_v51, %v8895_v52  ;;  %v1401_v24 = vsub.f32 %v8726_v49, %v8895_v52  ;;  %v1402_v21 = vsub.f32 %v8739_v59, %v8895_v52  ;;  %v1403_v35 = vsub.f32 %v8736_v57, %v8895_v52 }
 0x13b   : > { %v1391_v16 = vmax.f32 %v1390_v10, 0.0  ;;  %v1404_v33 = vsub.f32 %v8749_v3, %v8895_v52  ;;  %v1405_v43 = vsub.f32 %v8746_v1, %v8895_v52  ;;  %v1406_v41 = vsub.f32 %v8759_v12, %v8895_v52 }
 0x13c   : > { %v1407_v51 = vsub.f32 %v8756_v9, %v8895_v52  ;;  %v1408_v49 = vsub.f32 %v8775_v26, %v8895_v52  ;;  %v1409_v59 = vsub.f32 %v8772_v23, %v8895_v52  ;;  %v1410_v57 = vsub.f32 %v8791_v40, %v8895_v52 }
 0x13d   : > { %v1424_v17 = vadd.f32 1e-05, %v1391_v16  ;;  %v1411_v3 = vsub.f32 %v8788_v38, %v8895_v52  ;;  %v1412_v1 = vsub.f32 %v8807_v55, %v8895_v52  ;;  %v1413_v12 = vsub.f32 %v8804_v53, %v8895_v52 }
 0x13e   : > { %v1414_v9 = vsub.f32 %v8823_v6, %v8895_v52  ;;  %v1415_v26 = vsub.f32 %v8820_v4, %v8895_v52  ;;  %v1416_v23 = vsub.f32 %v8839_v22, %v8895_v52  ;;  %v1417_v40 = vsub.f32 %v8836_v19, %v8895_v52 }
 0x13f   : > { %8375 = vrsqrt.f32 %v1424_v17  ;;  %v1418_v38 = vsub.f32 %v8855_v39, %v8895_v52  ;;  %v1419_v55 = vsub.f32 %v8849_v34, %v8895_v52  ;;  %v1420_v53 = vsub.f32 %v8871_v60, %v8895_v52  ;;  %v6109_v39 = vld [vmem:[%s11739_s4 + $0x100] sm:$0xff]  ;;  %v6110_v34 = vld [vmem:[%s11739_s4 + $0x108] sm:$0xff] }
 0x140   : > { %v1421_v6 = vsub.f32 %v8868_v54, %v8895_v52  ;;  %v1423_v4 = vsub.f32 %v8881_v7, %v8895_v52  ;;  %v8963_v22 = vshrl.u32 %v441_v56, 7  ;;  %v8974_v60 = vpack.c.bf16 %v6110_v34, %v6109_v39  ;;  %v8979_v54 = vld [vmem:[%s11737_s2] ss:$0 sm:$0xff] }
 0x142   : > { %11819 = vst [vmem:[#allocation3_spill] sm:$0xff] %v8963_v22  ;;  %v8966_v19 = vadd.s32 16, %v8963_v22  ;;  %v478_v7 = vand.u32 15, %v8963_v22  ;;  %v8984_v25 = vadd.s32 32, %v8963_v22  ;;  %7855 = vmatprep.subr.bf16.mxu0 %v8974_v60 }
 0x144   : > { %v492_v20 = vand.u32 15, %v8966_v19  ;;  %vm9067_vm2 = vcmp.ge.s32.totalorder %v478_v7, 1  ;;  %v6178_v19 = vld [vmem:[%s11739_s4 + $0x228] sm:$0xff] }
 0x146   : > { %vm9182_vm3 = vcmp.ge.s32.totalorder %v492_v20, 1 }
 0x149   : > { %v8376_v18 = vpop.eup %8375 }
 0x14a   : > { %v1456_v27 = vmul.f32 %v8376_v18, %v1422_v62  ;;  %v1426_v28 = vmul.f32 %v8376_v18, %v1392_v63  ;;  %v1427_v29 = vmul.f32 %v8376_v18, %v1393_v0  ;;  %v1428_v31 = vmul.f32 %v8376_v18, %v1394_v2 }
 0x14b   : > { %v1429_v36 = vmul.f32 %v8376_v18, %v1395_v5  ;;  %v1430_v37 = vmul.f32 %v8376_v18, %v1396_v8  ;;  %v1431_v42 = vmul.f32 %v8376_v18, %v1397_v15  ;;  %v1432_v44 = vmul.f32 %v8376_v18, %v1398_v13 }
 0x14c   : > { %v1495_v45 = vmul.f32 %v8979_v54, %v1456_v27  ;;  %v1433_v46 = vmul.f32 %v8376_v18, %v1399_v14  ;;  %v1434_v47 = vmul.f32 %v8376_v18, %v1400_v11  ;;  %v1435_v48 = vmul.f32 %v8376_v18, %v1401_v24 }
 0x14d   : > { %v1436_v50 = vmul.f32 %v8376_v18, %v1402_v21  ;;  %v1437_v52 = vmul.f32 %v8376_v18, %v1403_v35  ;;  %v1438_v56 = vmul.f32 %v8376_v18, %v1404_v33  ;;  %v1439_v58 = vmul.f32 %v8376_v18, %v1405_v43 }
 0x14e   : > { %v1534_v61 = vadd.f32 %v8990_v32, %v1495_v45  ;;  %v1440_v62 = vmul.f32 %v8376_v18, %v1406_v41  ;;  %v1441_v63 = vmul.f32 %v8376_v18, %v1407_v51  ;;  %v1442_v0 = vmul.f32 %v8376_v18, %v1408_v49 }
 0x14f   : > { %v1443_v2 = vmul.f32 %v8376_v18, %v1409_v59  ;;  %v1444_v10 = vmul.f32 %v8376_v18, %v1410_v57  ;;  %v1445_v5 = vmul.f32 %v8376_v18, %v1411_v3  ;;  %v1446_v8 = vmul.f32 %v8376_v18, %v1412_v1 }
 0x150   : > { %v1566_v15 = vmax.f32 %v1534_v61, 0.0  ;;  %v1447_v13 = vmul.f32 %v8376_v18, %v1413_v12  ;;  %v1448_v16 = vmul.f32 %v8376_v18, %v1414_v9  ;;  %v1449_v17 = vmul.f32 %v8376_v18, %v1415_v26 }
 0x151   : > { %v1450_v14 = vmul.f32 %v8376_v18, %v1416_v23  ;;  %v1451_v11 = vmul.f32 %v8376_v18, %v1417_v40  ;;  %v1452_v24 = vmul.f32 %v8376_v18, %v1418_v38  ;;  %v1453_v21 = vmul.f32 %v8376_v18, %v1419_v55 }
 0x152   : > { %1604 = vst [vmem:[#allocation2 + $0x108] sm:$0xff] %v1566_v15  ;;  %v1454_v35 = vmul.f32 %v8376_v18, %v1420_v53  ;;  %v1455_v33 = vmul.f32 %v8376_v18, %v1421_v6  ;;  %v1457_v43 = vmul.f32 %v8376_v18, %v1423_v4  ;;  %v1465_v41 = vmul.f32 %v8979_v54, %v1426_v28 }
 0x153   : > { %v1466_v51 = vmul.f32 %v8979_v54, %v1427_v29  ;;  %v1467_v49 = vmul.f32 %v8979_v54, %v1428_v31  ;;  %v1468_v59 = vmul.f32 %v8979_v54, %v1429_v36  ;;  %v1469_v57 = vmul.f32 %v8979_v54, %v1430_v37 }
 0x154   : > { %v1470_v3 = vmul.f32 %v8979_v54, %v1431_v42  ;;  %v1471_v1 = vmul.f32 %v8979_v54, %v1432_v44  ;;  %v1472_v12 = vmul.f32 %v8979_v54, %v1433_v46  ;;  %v1473_v9 = vmul.f32 %v8979_v54, %v1434_v47 }
 0x155   : > { %v1474_v26 = vmul.f32 %v8979_v54, %v1435_v48  ;;  %v1475_v23 = vmul.f32 %v8979_v54, %v1436_v50  ;;  %v1476_v40 = vmul.f32 %v8979_v54, %v1437_v52  ;;  %v1477_v38 = vmul.f32 %v8979_v54, %v1438_v56 }
 0x156   : > { %v1478_v55 = vmul.f32 %v8979_v54, %v1439_v58  ;;  %v1479_v53 = vmul.f32 %v8979_v54, %v1440_v62  ;;  %v1480_v6 = vmul.f32 %v8979_v54, %v1441_v63  ;;  %v1481_v4 = vmul.f32 %v8979_v54, %v1442_v0 }
 0x157   : > { %v1482_v39 = vmul.f32 %v8979_v54, %v1443_v2  ;;  %v1483_v34 = vmul.f32 %v8979_v54, %v1444_v10  ;;  %v1484_v18 = vmul.f32 %v8979_v54, %v1445_v5  ;;  %v1485_v27 = vmul.f32 %v8979_v54, %v1446_v8 }
 0x158   : > { %v1486_v28 = vmul.f32 %v8979_v54, %v1447_v13  ;;  %v1487_v29 = vmul.f32 %v8979_v54, %v1448_v16  ;;  %v1488_v31 = vmul.f32 %v8979_v54, %v1449_v17  ;;  %v1489_v36 = vmul.f32 %v8979_v54, %v1450_v14 }
 0x159   : > { %v1490_v37 = vmul.f32 %v8979_v54, %v1451_v11  ;;  %v1491_v42 = vmul.f32 %v8979_v54, %v1452_v24  ;;  %v1492_v44 = vmul.f32 %v8979_v54, %v1453_v21  ;;  %v1493_v45 = vmul.f32 %v8979_v54, %v1454_v35 }
 0x15a   : > { %v1494_v46 = vmul.f32 %v8979_v54, %v1455_v33  ;;  %v1496_v47 = vmul.f32 %v8979_v54, %v1457_v43  ;;  %v1504_v48 = vadd.f32 %v8990_v32, %v1465_v41  ;;  %v1505_v50 = vadd.f32 %v8990_v32, %v1466_v51 }
 0x15b   : > { %v1506_v52 = vadd.f32 %v8990_v32, %v1467_v49  ;;  %v1507_v56 = vadd.f32 %v8990_v32, %v1468_v59  ;;  %v1508_v58 = vadd.f32 %v8990_v32, %v1469_v57  ;;  %v1509_v61 = vadd.f32 %v8990_v32, %v1470_v3 }
 0x15c   : > { %v1510_v62 = vadd.f32 %v8990_v32, %v1471_v1  ;;  %v1511_v63 = vadd.f32 %v8990_v32, %v1472_v12  ;;  %v1512_v0 = vadd.f32 %v8990_v32, %v1473_v9  ;;  %v1513_v54 = vadd.f32 %v8990_v32, %v1474_v26 }
 0x15d   : > { %v1514_v2 = vadd.f32 %v8990_v32, %v1475_v23  ;;  %v1515_v10 = vadd.f32 %v8990_v32, %v1476_v40  ;;  %v1516_v5 = vadd.f32 %v8990_v32, %v1477_v38  ;;  %v1517_v8 = vadd.f32 %v8990_v32, %v1478_v55 }
 0x15e   : > { %v1518_v15 = vadd.f32 %v8990_v32, %v1479_v53  ;;  %v1519_v13 = vadd.f32 %v8990_v32, %v1480_v6  ;;  %v1520_v16 = vadd.f32 %v8990_v32, %v1481_v4  ;;  %v1521_v17 = vadd.f32 %v8990_v32, %v1482_v39 }
 0x15f   : > { %v1522_v14 = vadd.f32 %v8990_v32, %v1483_v34  ;;  %v1523_v11 = vadd.f32 %v8990_v32, %v1484_v18  ;;  %v1524_v24 = vadd.f32 %v8990_v32, %v1485_v27  ;;  %v1525_v21 = vadd.f32 %v8990_v32, %v1486_v28 }
 0x160   : > { %v1526_v35 = vadd.f32 %v8990_v32, %v1487_v29  ;;  %v1527_v33 = vadd.f32 %v8990_v32, %v1488_v31  ;;  %v1528_v43 = vadd.f32 %v8990_v32, %v1489_v36  ;;  %v9051_v41 = vadd.f32 %v8990_v32, %v1490_v37 }
 0x161   : > { %v9054_v51 = vadd.f32 %v8990_v32, %v1491_v42  ;;  %v9057_v49 = vadd.f32 %v8990_v32, %v1492_v44  ;;  %v9060_v59 = vadd.f32 %v8990_v32, %v1493_v45  ;;  %v9063_v57 = vadd.f32 %v8990_v32, %v1494_v46 }
 0x162   : > { %v9072_v1 = vadd.f32 %v8990_v32, %v1496_v47  ;;  %v9074_v12 = vmax.f32 %v1504_v48, 0.0  ;;  %v9076_v9 = vmax.f32 %v1505_v50, 0.0  ;;  %v9078_v26 = vmax.f32 %v1506_v52, 0.0  ;;  %v6175_v50 = vld [vmem:[%s11739_s4 + $0x210] sm:$0xff]  ;;  %v6176_v52 = vld [vmem:[%s11739_s4 + $0x218] sm:$0xff] }
 0x163   : > { %v9080_v23 = vmax.f32 %v1507_v56, 0.0  ;;  %v9082_v40 = vmax.f32 %v1508_v58, 0.0  ;;  %v9084_v38 = vmax.f32 %v1509_v61, 0.0  ;;  %v9086_v55 = vmax.f32 %v1510_v62, 0.0 }
 0x164   : > { %v9088_v7 = vmax.f32 %v1511_v63, 0.0  ;;  %v9090_v53 = vmax.f32 %v1512_v0, 0.0  ;;  %v9092_v32 = vmax.f32 %v1513_v54, 0.0  ;;  %v9094_v6 = vmax.f32 %v1514_v2, 0.0  ;;  %1574 = vst [vmem:[#allocation2 + $0x18] sm:$0xff] %v9074_v12  ;;  %1575 = vst [vmem:[#allocation2 + $0x20] sm:$0xff] %v9076_v9  ;;  %6975 = vmatprep.mubr.f32.mxu0 %v9074_v12 }
 0x165   : > { %1576 = vst [vmem:[#allocation2 + $0x28] sm:$0xff] %v9078_v26  ;;  %v9100_v4 = vmax.f32 %v1515_v10, 0.0  ;;  %v9102_v39 = vmax.f32 %v1516_v5, 0.0  ;;  %v9104_v34 = vmax.f32 %v1517_v8, 0.0  ;;  %v9106_v18 = vmax.f32 %v1518_v15, 0.0  ;;  %1577 = vst [vmem:[#allocation2 + $0x30] sm:$0xff] %v9080_v23  ;;  %6976 = vmatmul.mubr.f32.gmra.mrb[34].mxu0 %v9076_v9 }
 0x166   : > { %1578 = vst [vmem:[#allocation2 + $0x38] sm:$0xff] %v9082_v40  ;;  %1579 = vst [vmem:[#allocation2 + $0x40] sm:$0xff] %v9084_v38  ;;  %v9113_v27 = vmax.f32 %v1519_v13, 0.0  ;;  %v9115_v28 = vmax.f32 %v1520_v16, 0.0  ;;  %v9117_v29 = vmax.f32 %v1521_v17, 0.0  ;;  %v9119_v31 = vmax.f32 %v1522_v14, 0.0  ;;  %6978 = vmatprep.mubr.f32.mxu0 %v9078_v26 }
 0x167   : > { %1580 = vst [vmem:[#allocation2 + $0x48] sm:$0xff] %v9086_v55  ;;  %1581 = vst [vmem:[#allocation2 + $0x50] sm:$0xff] %v9088_v7  ;;  %v9126_v36 = vmax.f32 %v1523_v11, 0.0  ;;  %v9128_v37 = vmax.f32 %v1524_v24, 0.0  ;;  %v9130_v42 = vmax.f32 %v1525_v21, 0.0  ;;  %v9132_v44 = vmax.f32 %v1526_v35, 0.0 }
 0x168   : > { %11822 = vst [vmem:[#allocation4_spill] sm:$0xff] %v9113_v27  ;;  %11823 = vst [vmem:[#allocation5_spill] sm:$0xff] %v9115_v28  ;;  %v9138_v45 = vmax.f32 %v1527_v33, 0.0  ;;  %v9140_v46 = vmax.f32 %v1528_v43, 0.0  ;;  %v11753_v47 = vmax.f32 %v9051_v41, 0.0  ;;  %v11752_v48 = vmax.f32 %v9054_v51, 0.0 }
 0x169   : > { %11824 = vst [vmem:[#allocation6_spill] sm:$0xff] %v9117_v29  ;;  %11825 = vst [vmem:[#allocation7_spill] sm:$0xff] %v9119_v31  ;;  %v11751_v56 = vmax.f32 %v9057_v49, 0.0  ;;  %v11750_v58 = vmax.f32 %v9060_v59, 0.0  ;;  %v11749_v61 = vmax.f32 %v9063_v57, 0.0  ;;  %v1567_v62 = vmax.f32 %v9072_v1, 0.0  ;;  %6979 = vmatmul.mubr.f32.gmra.mrb[36].mxu0 %v9080_v23 }
 0x16a   : > { %1582 = vst [vmem:[#allocation2 + $0x58] sm:$0xff] %v9090_v53  ;;  %1583 = vst [vmem:[#allocation2 + $0x60] sm:$0xff] %v9092_v32  ;;  %6981 = vmatprep.mubr.f32.mxu0 %v9082_v40  ;;  %v506_v2 = vand.u32 15, %v8984_v25  ;;  %v7922_v10 = vpack.c.bf16 %v6176_v52, %v6175_v50  ;;  %v448_v5 = vadd.s32 48, %v8963_v22  ;;  %v6177_v8 = vld [vmem:[%s11739_s4 + $0x220] sm:$0xff]  ;;  %v450_v13 = vadd.s32 64, %v8963_v22 }
 0x16b   : > { %1584 = vst [vmem:[#allocation2 + $0x68] sm:$0xff] %v9094_v6  ;;  %11826 = vst [vmem:[#allocation8_spill] sm:$0xff] %v9126_v36  ;;  %v9176_v63 = vld [vmem:[#allocation2 + $0x17] sm:$0xff]  ;;  %v9178_v0 = vld [vmem:[#allocation2 + $0x1f] sm:$0xff]  ;;  %v7926_v16 = vpack.c.bf16 %v6178_v19, %v6177_v8  ;;  %v452_v35 = vadd.s32 80, %v8963_v22 }
 0x16c   : > { %11827 = vst [vmem:[#allocation9_spill] sm:$0xff] %v9128_v37  ;;  %11828 = vst [vmem:[#allocation10_spill] sm:$0xff] %v9130_v42  ;;  %7212 = vmatprep.mubr.msk.f32.mxu1 %vm9067_vm2, %v9176_v63  ;;  %v9198_v20 = vld [vmem:[#allocation2 + $0x27] sm:$0xff]  ;;  %vm9205_vm4 = vcmp.ge.s32.totalorder %v506_v2, 1  ;;  %v520_v15 = vand.u32 15, %v448_v5  ;;  %v9211_v17 = vld [vmem:[#allocation2 + $0x2f] sm:$0xff] }
 0x16d   : > { %11829 = vst [vmem:[#allocation11_spill] sm:$0xff] %v9132_v44  ;;  %1585 = vst [vmem:[#allocation2 + $0x70] sm:$0xff] %v9100_v4  ;;  %7213 = vmatmul.mubr.f32.vlgmr.msra.gmra.mrb[0].mxu1 %v9178_v0  ;;  %6982 = vmatmul.mubr.f32.gmra.mrb[38].mxu0 %v9084_v38  ;;  %v6180_v14 = vld [vmem:[%s11739_s4 + $0x238] sm:$0xff]  ;;  %v534_v21 = vand.u32 15, %v450_v13  ;;  %v6181_v50 = vld [vmem:[%s11739_s4 + $0x240] sm:$0xff]  ;;  %v548_v2 = vand.u32 15, %v452_v35 }
 0x16e   : > { %1586 = vst [vmem:[#allocation2 + $0x78] sm:$0xff] %v9102_v39  ;;  %1587 = vst [vmem:[#allocation2 + $0x80] sm:$0xff] %v9104_v34  ;;  %7921 = vmatpush3.bf16.msra.mxu1 %v8701_v30  ;;  %7215 = vmatprep.mubr.msk.f32.mxu1 %vm9182_vm3, %v9198_v20  ;;  %v6179_v30 = vld [vmem:[%s11739_s4 + $0x230] sm:$0xff]  ;;  %vm9226_vm5 = vcmp.ge.s32.totalorder %v520_v15, 1  ;;  %v9232_v43 = vld [vmem:[#allocation2 + $0x3f] sm:$0xff] }
 0x16f   : > { %1588 = vst [vmem:[#allocation2 + $0x88] sm:$0xff] %v9106_v18  ;;  %11830 = vst [vmem:[#allocation12_spill] sm:$0xff] %v9138_v45  ;;  %7923 = vmatprep.subr.bf16.mxu1 %v7922_v10  ;;  %6984 = vmatprep.mubr.f32.mxu0 %v9086_v55  ;;  %v9220_v11 = vld [vmem:[#allocation2 + $0x37] sm:$0xff]  ;;  %v7930_v33 = vpack.c.bf16 %v6180_v14, %v6179_v30  ;;  %v9235_v1 = vld [vmem:[#allocation2 + $0x47] sm:$0xff]  ;;  %vm9247_vm6 = vcmp.ge.s32.totalorder %v534_v21, 1  ;;  %vm9269_vm7 = vcmp.ge.s32.totalorder %v548_v2, 1 }
 0x170   : > { %11831 = vst [vmem:[#allocation13_spill] sm:$0xff] %v9140_v46  ;;  %1589 = vst [vmem:[#allocation2 + $0x90] sm:$0xff] %v9113_v27  ;;  %v6182_v52 = vld [vmem:[%s11739_s4 + $0x248] sm:$0xff]  ;;  %v6183_v15 = vld [vmem:[%s11739_s4 + $0x250] sm:$0xff]  ;;  %v456_v14 = vadd.s32 112, %v8963_v22 }
 0x171   : > { %1590 = vst [vmem:[#allocation2 + $0x98] sm:$0xff] %v9115_v28  ;;  %1591 = vst [vmem:[#allocation2 + $0xa0] sm:$0xff] %v9117_v29  ;;  %7216 = vmatmul.mubr.f32.gmra.mrb[2].mxu1 %v9211_v17  ;;  %6985 = vmatmul.mubr.f32.gmra.mrb[40].mxu0 %v9088_v7  ;;  %v9253_v5 = vld [vmem:[#allocation2 + $0x4f] sm:$0xff]  ;;  %v7934_v8 = vpack.c.bf16 %v6182_v52, %v6181_v50  ;;  %v9256_v19 = vld [vmem:[#allocation2 + $0x57] sm:$0xff] }
 0x172   : > { %1592 = vst [vmem:[#allocation2 + $0xa8] sm:$0xff] %v9119_v31  ;;  %1593 = vst [vmem:[#allocation2 + $0xb0] sm:$0xff] %v9126_v36  ;;  %7218 = vmatprep.mubr.msk.f32.mxu1 %vm9205_vm4, %v9220_v11  ;;  %7925 = vmatpush3.bf16.msra.mxu1 %v7922_v10  ;;  %v454_v10 = vadd.s32 96, %v8963_v22  ;;  %v6184_v13 = vld [vmem:[%s11739_s4 + $0x258] sm:$0xff]  ;;  %v9277_v50 = vld [vmem:[#allocation2 + $0x67] sm:$0xff] }
 0x173   : > { %1594 = vst [vmem:[#allocation2 + $0xb8] sm:$0xff] %v9128_v37  ;;  %1595 = vst [vmem:[#allocation2 + $0xc0] sm:$0xff] %v9130_v42  ;;  %6987 = vmatprep.mubr.f32.mxu0 %v9090_v53  ;;  %7927 = vmatprep.subr.bf16.mxu1 %v7926_v16  ;;  %v9274_v21 = vld [vmem:[#allocation2 + $0x5f] sm:$0xff]  ;;  %v7938_v35 = vpack.c.bf16 %v6184_v13, %v6183_v15  ;;  %v458_v15 = vadd.s32 128, %v8963_v22 }
 0x174   : > { %1596 = vst [vmem:[#allocation2 + $0xc8] sm:$0xff] %v9132_v44  ;;  %1597 = vst [vmem:[#allocation2 + $0xd0] sm:$0xff] %v9138_v45  ;;  %v562_v30 = vand.u32 15, %v454_v10  ;;  %v6185_v52 = vld [vmem:[%s11739_s4 + $0x260] sm:$0xff]  ;;  %v576_v10 = vand.u32 15, %v456_v14  ;;  %v9295_v13 = vld [vmem:[#allocation2 + $0x6f] sm:$0xff] }
 0x175   : > { %1598 = vst [vmem:[#allocation2 + $0xd8] sm:$0xff] %v9140_v46  ;;  %1599 = vst [vmem:[#allocation2 + $0xe0] sm:$0xff] %v11753_v47  ;;  %7219 = vmatmul.mubr.f32.gmra.mrb[4].mxu1 %v9232_v43  ;;  %6988 = vmatmul.mubr.f32.gmra.mrb[42].mxu0 %v9092_v32  ;;  %v6188_v14 = vld [vmem:[%s11739_s4 + $0x278] sm:$0xff] }
 0x176   : > { %1600 = vst [vmem:[#allocation2 + $0xe8] sm:$0xff] %v11752_v48  ;;  %1601 = vst [vmem:[#allocation2 + $0xf0] sm:$0xff] %v11751_v56  ;;  %7221 = vmatprep.mubr.msk.f32.mxu1 %vm9226_vm5, %v9235_v1  ;;  %7929 = vmatpush3.bf16.msra.mxu1 %v7926_v16  ;;  %vm9290_vm8 = vcmp.ge.s32.totalorder %v562_v30, 1  ;;  %v6187_v30 = vld [vmem:[%s11739_s4 + $0x270] sm:$0xff]  ;;  %vm9311_vm9 = vcmp.ge.s32.totalorder %v576_v10, 1  ;;  %v9316_v56 = vld [vmem:[#allocation2 + $0x7f] sm:$0xff] }
 0x177   : > { %1602 = vst [vmem:[#allocation2 + $0xf8] sm:$0xff] %v11750_v58  ;;  %1603 = vst [vmem:[#allocation2 + $0x100] sm:$0xff] %v11749_v61  ;;  %6990 = vmatprep.mubr.f32.mxu0 %v9094_v6  ;;  %7931 = vmatprep.subr.bf16.mxu1 %v7930_v33  ;;  %v9298_v58 = vld [vmem:[#allocation2 + $0x77] sm:$0xff]  ;;  %v7946_v48 = vpack.c.bf16 %v6188_v14, %v6187_v30  ;;  %v9319_v47 = vld [vmem:[#allocation2 + $0x87] sm:$0xff]  ;;  %v462_v14 = vadd.s32 160, %v8963_v22 }
 0x178   : > { %1605 = vst [vmem:[#allocation2 + $0x110] sm:$0xff] %v1567_v62  ;;  %v6189_v10 = vld [vmem:[%s11739_s4 + $0x280] sm:$0xff] }
 0x179   : > { %7222 = vmatmul.mubr.f32.gmra.mrb[6].mxu1 %v9253_v5  ;;  %6991 = vmatmul.mubr.f32.gmra.mrb[44].mxu0 %v9100_v4 }
 0x17a   : > { %7224 = vmatprep.mubr.msk.f32.mxu1 %vm9247_vm6, %v9256_v19  ;;  %6993 = vmatprep.mubr.f32.mxu0 %v9102_v39 }
 0x17b   : > { %7933 = vmatpush3.bf16.msra.mxu1 %v7930_v33  ;;  %v6186_v33 = vld [vmem:[%s11739_s4 + $0x268] sm:$0xff] }
 0x17c   : > { %7935 = vmatprep.subr.bf16.mxu1 %v7934_v8  ;;  %v7942_v61 = vpack.c.bf16 %v6186_v33, %v6185_v52  ;;  %v590_v52 = vand.u32 15, %v458_v15  ;;  %v460_v33 = vadd.s32 144, %v8963_v22  ;;  %v6190_v15 = vld [vmem:[%s11739_s4 + $0x288] sm:$0xff] }
 0x17d   : > { %7225 = vmatmul.mubr.f32.gmra.mrb[8].mxu1 %v9274_v21  ;;  %6994 = vmatmul.mubr.f32.gmra.mrb[46].mxu0 %v9104_v34 }
 0x17e   : > { %7227 = vmatprep.mubr.msk.f32.mxu1 %vm9269_vm7, %v9277_v50  ;;  %6996 = vmatprep.mubr.f32.mxu0 %v9106_v18  ;;  %vm9332_vm10 = vcmp.ge.s32.totalorder %v590_v52, 1  ;;  %v604_v30 = vand.u32 15, %v460_v33  ;;  %v464_v33 = vadd.s32 176, %v8963_v22  ;;  %v3658_v52 = vld [vmem:[#allocation2 + $0xef] sm:$0xff] }
 0x17f   : > { %7937 = vmatpush3.bf16.msra.mxu1 %v7934_v8  ;;  %v3653_v8 = vld [vmem:[#allocation2 + $0xc7] sm:$0xff] }
 0x180   : > { %7939 = vmatprep.subr.bf16.mxu1 %v7938_v35  ;;  %vm9349_vm11 = vcmp.ge.s32.totalorder %v604_v30, 1  ;;  %v3660_v30 = vld [vmem:[#allocation2 + $0xff] sm:$0xff] }
 0x181   : > { %7228 = vmatmul.mubr.f32.gmra.mrb[10].mxu1 %v9295_v13  ;;  %6997 = vmatmul.mubr.f32.gmra.mrb[48].mxu0 %v9113_v27  ;;  %v9342_v27 = vld [vmem:[#allocation2 + $0x97] sm:$0xff] }
 0x182   : > { %7230 = vmatprep.mubr.msk.f32.mxu1 %vm9290_vm8, %v9298_v58  ;;  %6999 = vmatprep.mubr.f32.mxu0 %v9115_v28  ;;  %v9339_v28 = vpack.c.bf16 %v6190_v15, %v6189_v10  ;;  %v9354_v10 = vld [vmem:[#allocation2 + $0x9f] sm:$0xff]  ;;  %v9358_v15 = vld [vmem:[#allocation2 + $0xa7] sm:$0xff] }
 0x183   : > { %7941 = vmatpush3.bf16.msra.mxu1 %v7938_v35  ;;  %v3656_v35 = vld [vmem:[#allocation2 + $0xdf] sm:$0xff] }
 0x184   : > { %7943 = vmatprep.subr.bf16.mxu1 %v7942_v61 }
 0x185   : > { %7231 = vmatmul.mubr.f32.gmra.mrb[12].mxu1 %v9316_v56  ;;  %7000 = vmatmul.mubr.f32.gmra.mrb[50].mxu0 %v9117_v29  ;;  %v9337_v29 = vld [vmem:[#allocation2 + $0x8f] sm:$0xff] }
 0x186   : > { %7233 = vmatprep.mubr.msk.f32.mxu1 %vm9311_vm9, %v9319_v47  ;;  %7002 = vmatprep.mubr.f32.mxu0 %v9119_v31  ;;  %v9388_v31 = vld [vmem:[#allocation2 + $0xc7] sm:$0xff] }
 0x187   : > { %7945 = vmatpush3.bf16.msra.mxu1 %v7942_v61  ;;  %v618_v61 = vand.u32 15, %v462_v14  ;;  %v466_v14 = vadd.s32 192, %v8963_v22  ;;  %11856 = vst [vmem:[#allocation16_spill] sm:$0xff] %v9388_v31 }
 0x188   : > { %7947 = vmatprep.subr.bf16.mxu1 %v7946_v48 }
 0x189   : > { %7234 = vmatmul.mubr.f32.gmra.mrb[14].mxu1 %v9337_v29  ;;  %7003 = vmatmul.mubr.f32.gmra.mrb[52].mxu0 %v9126_v36  ;;  %vm9365_vm12 = vcmp.ge.s32.totalorder %v618_v61, 1  ;;  %v9373_v36 = vld [vmem:[#allocation2 + $0xb7] sm:$0xff]  ;;  %v11853_v61 = vmov 0 }
 0x18a   : > { %7236 = vmatprep.mubr.msk.f32.mxu1 %vm9332_vm10, %v9342_v27  ;;  %7005 = vmatprep.mubr.f32.mxu0 %v9128_v37  ;;  %v9370_v37 = vld [vmem:[#allocation2 + $0xaf] sm:$0xff]  ;;  %11852 = vst [vmem:[#allocation14_spill] sm:$0xff] %v9373_v36 }
 0x18b   : > { %7949 = vmatpush3.bf16.msra.mxu1 %v7946_v48  ;;  %v632_v48 = vand.u32 15, %v464_v33  ;;  %v646_v33 = vand.u32 15, %v466_v14  ;;  %v11859_v14 = vmov 0 }
 0x18c   : > { %7951 = vmatprep.subr.bf16.mxu1 %v9339_v28 }
 0x18d   : > { %7237 = vmatmul.mubr.f32.gmra.mrb[16].mxu1 %v9354_v10  ;;  %7006 = vmatmul.mubr.f32.gmra.mrb[54].mxu0 %v9130_v42  ;;  %vm9380_vm13 = vcmp.ge.s32.totalorder %v632_v48, 1  ;;  %v9385_v42 = vld [vmem:[#allocation2 + $0xbf] sm:$0xff]  ;;  %v11858_v48 = vmax.f32 %v9054_v51, 0.0  ;;  %vm9397_vm14 = vcmp.ge.s32.totalorder %v646_v33, 1  ;;  %v11863_v51 = vmax.f32 %v9060_v59, 0.0  ;;  %v6111_v59 = vld [vmem:[%s11739_s4 + $0x110] sm:$0xff] }
 0x18e   : > { %7239 = vmatprep.mubr.msk.f32.mxu1 %vm9349_vm11, %v9358_v15  ;;  %7008 = vmatprep.mubr.f32.mxu0 %v9132_v44  ;;  %v11854_v61 = vsel %vm9380_vm13, 4294967295, %v11853_v61  ;;  %v468_v44 = vadd.s32 208, %v8963_v22  ;;  %11855 = vst [vmem:[#allocation15_spill] sm:$0xff] %v9385_v42  ;;  %v11860_v14 = vsel %vm9397_vm14, 4294967295, %v11859_v14 }
 0x191   : > { %7240 = vmatmul.mubr.f32.gmra.mrb[18].mxu1 %v9370_v37  ;;  %7009 = vmatmul.mubr.f32.gmra.mrb[56].mxu0 %v9138_v45  ;;  %v11857_v45 = vmax.f32 %v9051_v41, 0.0  ;;  %v9405_v41 = vld [vmem:[#allocation2 + $0xd7] sm:$0xff] }
 0x192   : > { %7242 = vmatprep.mubr.msk.f32.mxu1 %vm9365_vm12, %v9373_v36  ;;  %7011 = vmatprep.mubr.f32.mxu0 %v9140_v46  ;;  %v660_v46 = vand.u32 15, %v468_v44  ;;  %v470_v36 = vadd.s32 224, %v8963_v22  ;;  %v11864_v44 = vmov 0 }
 0x194   : > { %vm9414_vm15 = vcmp.ge.s32.totalorder %v660_v46, 1  ;;  %v674_v33 = vand.u32 15, %v470_v36  ;;  %v6112_v36 = vld [vmem:[%s11739_s4 + $0x118] sm:$0xff]  ;;  %v1607_v46 = vld [vmem:[#allocation2 + $0xf] sm:$0xff] }
 0x195   : > { %7243 = vmatmul.mubr.f32.gmra.mrb[20].mxu1 %v9385_v42  ;;  %7012 = vmatmul.mubr.f32.gmra.mrb[58].mxu0 %v11857_v45  ;;  %v9402_v42 = vld [vmem:[#allocation2 + $0xcf] sm:$0xff]  ;;  %v11862_v45 = vmax.f32 %v9057_v49, 0.0  ;;  %v11865_v44 = vsel %vm9414_vm15, 4294967295, %v11864_v44  ;;  %v9422_v49 = vld [vmem:[#allocation2 + $0xe7] sm:$0xff] }
 0x196   : > { %7245 = vmatprep.mubr.msk.f32.mxu1 %vm9380_vm13, %v9388_v31  ;;  %7014 = vmatprep.mubr.f32.mxu0 %v11858_v48  ;;  %11861 = vst [vmem:[#allocation17_spill] sm:$0xff] %v9402_v42  ;;  %v472_v48 = vadd.s32 240, %v8963_v22  ;;  %v9419_v31 = vld [vmem:[#allocation2 + $0xdf] sm:$0xff]  ;;  %11867 = vst [vmem:[#allocation19_spill] sm:$0xff] %v9422_v49  ;;  %vm9437_vm1 = vcmp.ge.s32.totalorder %v674_v33, 1  ;;  %v7858_v22 = vpack.c.bf16 %v6112_v36, %v6111_v59  ;;  %v11871_v33 = vmov 0 }
 0x197   : > { %11866 = vst [vmem:[#allocation18_spill] sm:$0xff] %v9419_v31  ;;  %v2681_v36 = vld [vmem:[#allocation2 + $0x107] sm:$0xff] }
 0x199   : > { %7246 = vmatmul.mubr.f32.gmra.mrb[22].mxu1 %v9402_v42  ;;  %7015 = vmatmul.mubr.f32.gmra.mrb[60].mxu0 %v11862_v45  ;;  %v1606_v42 = vld [vmem:[#allocation2 + $0x7] sm:$0xff]  ;;  %v11868_v45 = vmax.f32 %v9063_v57, 0.0  ;;  %v688_v57 = vand.u32 15, %v472_v48  ;;  %v9463_v48 = vld [vmem:[#allocation2 + $0xff] sm:$0xff] }
 0x19a   : > { %7248 = vmatprep.mubr.msk.f32.mxu1 %vm9397_vm14, %v9405_v41  ;;  %7017 = vmatprep.mubr.f32.mxu0 %v11863_v51  ;;  %v11869_v51 = vmov 0 }
 0x19b   : > { %v11870_v51 = vsel %vm9437_vm1, 4294967295, %v11869_v51  ;;  %vm9458_vm0 = vcmp.ge.s32.totalorder %v688_v57, 1 }
 0x19c   : > { %v11872_v33 = vsel %vm9458_vm0, 4294967295, %v11871_v33 }
 0x19d   : > { %7249 = vmatmul.mubr.f32.gmra.mrb[24].mxu1 %v9419_v31  ;;  %7018 = vmatmul.mubr.f32.gmra.mrb[62].mxu0 %v11868_v45  ;;  %v9441_v45 = vld [vmem:[#allocation2 + $0xef] sm:$0xff]  ;;  %v9444_v31 = vld [vmem:[#allocation2 + $0xf7] sm:$0xff] }
 0x19e   : > { %7251 = vmatprep.mubr.msk.f32.mxu1 %vm9414_vm15, %v9422_v49  ;;  %7052 = vmatprep.mubr.msk.f32.mxu0 %vm9067_vm2, %v1606_v42  ;;  %v6113_v49 = vld [vmem:[%s11739_s4 + $0x120] sm:$0xff]  ;;  %v6114_v42 = vld [vmem:[%s11739_s4 + $0x128] sm:$0xff] }
 0x19f   : > { %v7862_v59 = vpack.c.bf16 %v6114_v42, %v6113_v49  ;;  %v6192_v49 = vld [vmem:[%s11739_s4 + $0x298] sm:$0xff]  ;;  %v6194_v42 = vld [vmem:[%s11739_s4 + $0x2a8] sm:$0xff] }
 0x1a1   : > { %7252 = vmatmul.mubr.f32.gmra.mrb[26].mxu1 %v9441_v45  ;;  %7053 = vmatmul.mubr.f32.vlgmr.msra.gmra.mrb[32].mxu0 %v1607_v46  ;;  %v6115_v46 = vld [vmem:[%s11739_s4 + $0x130] sm:$0xff] }
 0x1a2   : > { %7254 = vmatprep.mubr.msk.f32.mxu1 %vm9437_vm1, %v9444_v31  ;;  %7055 = vmatprep.mubr.msk.f32.mxu0 %vm9182_vm3, %v9176_v63  ;;  %v6116_v63 = vld [vmem:[%s11739_s4 + $0x138] sm:$0xff] }
 0x1a3   : > { %7857 = vmatpush3.bf16.msra.mxu0 %v8974_v60  ;;  %v2682_v60 = vld [vmem:[#allocation2 + $0x10f] sm:$0xff]  ;;  %v7866_v57 = vpack.c.bf16 %v6116_v63, %v6115_v46  ;;  %v6124_v46 = vld [vmem:[%s11739_s4 + $0x178] sm:$0xff] }
 0x1a4   : > { %7859 = vmatprep.subr.bf16.mxu0 %v7858_v22 }
 0x1a5   : > { %7255 = vmatmul.mubr.f32.gmra.mrb[28].mxu1 %v9463_v48  ;;  %7056 = vmatmul.mubr.f32.gmra.mrb[34].mxu0 %v9178_v0  ;;  %v6191_v0 = vld [vmem:[%s11739_s4 + $0x290] sm:$0xff] }
 0x1a6   : > { %7257 = vmatprep.mubr.msk.f32.mxu1 %vm9458_vm0, %v2681_v36  ;;  %7058 = vmatprep.mubr.msk.f32.mxu0 %vm9205_vm4, %v9198_v20  ;;  %v6193_v20 = vld [vmem:[%s11739_s4 + $0x2a0] sm:$0xff] }
 0x1a7   : > { %7861 = vmatpush3.bf16.msra.mxu0 %v7858_v22  ;;  %v7954_v22 = vpack.c.bf16 %v6192_v49, %v6191_v0  ;;  %v11879_v0 = vld [vmem:[#allocation16_spill] sm:$0xff]  ;;  %v11881_v49 = vld [vmem:[#allocation17_spill] sm:$0xff] }
 0x1a8   : > { %7863 = vmatprep.subr.bf16.mxu0 %v7862_v59 }
 0x1a9   : > { %7258 = vmatmul.mubr.f32.gmra.mrb[30].mxu1 %v2682_v60  ;;  %7059 = vmatmul.mubr.f32.gmra.mrb[36].mxu0 %v9211_v17  ;;  %v6118_v17 = vld [vmem:[%s11739_s4 + $0x148] sm:$0xff]  ;;  %v11878_v60 = vld [vmem:[#allocation7_spill] sm:$0xff] }
 0x1aa   : > { %7292 = vmatprep.mubr.f32.mxu1 %v9074_v12  ;;  %7061 = vmatprep.mubr.msk.f32.mxu0 %vm9226_vm5, %v9220_v11  ;;  %v6117_v12 = vld [vmem:[%s11739_s4 + $0x140] sm:$0xff]  ;;  %v6195_v11 = vld [vmem:[%s11739_s4 + $0x2b0] sm:$0xff] }
 0x1ab   : > { %7865 = vmatpush3.bf16.msra.mxu0 %v7862_v59  ;;  %v7870_v59 = vpack.c.bf16 %v6118_v17, %v6117_v12  ;;  %v11886_v12 = vld [vmem:[#allocation19_spill] sm:$0xff] }
 0x1ac   : > { %7867 = vmatprep.subr.bf16.mxu0 %v7866_v57  ;;  %v11887_v17 = vld [vmem:[#allocation3_spill] sm:$0xff] }
 0x1ad   : > { %7293 = vmatmul.mubr.f32.vlgmr.msra.gmra.mrb[0].mxu1 %v9076_v9  ;;  %7062 = vmatmul.mubr.f32.gmra.mrb[38].mxu0 %v9232_v43  ;;  %v7958_v9 = vpack.c.bf16 %v6194_v42, %v6193_v20  ;;  %v6196_v43 = vld [vmem:[%s11739_s4 + $0x2b8] sm:$0xff]  ;;  %v11884_v20 = vld [vmem:[#allocation18_spill] sm:$0xff]  ;;  %v11885_v42 = vld [vmem:[#allocation11_spill] sm:$0xff] }
 0x1ae   : > { %7953 = vmatpush3.bf16.msra.mxu1 %v9339_v28  ;;  %7295 = vmatprep.mubr.f32.mxu1 %v9078_v26  ;;  %v7962_v26 = vpack.c.bf16 %v6196_v43, %v6195_v11  ;;  %v6119_v28 = vld [vmem:[%s11739_s4 + $0x150] sm:$0xff]  ;;  %v11888_v11 = vld [vmem:[#allocation12_spill] sm:$0xff]  ;;  %v11889_v43 = vld [vmem:[#allocation13_spill] sm:$0xff] }
 0x1af   : > { %7955 = vmatprep.subr.bf16.mxu1 %v7954_v22  ;;  %7064 = vmatprep.mubr.msk.f32.mxu0 %vm9247_vm6, %v9235_v1  ;;  %v6198_v1 = vld [vmem:[%s11739_s4 + $0x2c8] sm:$0xff] }
 0x1b0   : > { %7869 = vmatpush3.bf16.msra.mxu0 %v7866_v57  ;;  %v11882_v57 = vld [vmem:[#allocation9_spill] sm:$0xff] }
 0x1b1   : > { %7296 = vmatmul.mubr.f32.gmra.mrb[2].mxu1 %v9080_v23  ;;  %7065 = vmatmul.mubr.f32.gmra.mrb[40].mxu0 %v9253_v5  ;;  %v6120_v23 = vld [vmem:[%s11739_s4 + $0x158] sm:$0xff] }
 0x1b2   : > { %7298 = vmatprep.mubr.f32.mxu1 %v9082_v40  ;;  %7957 = vmatpush3.bf16.msra.mxu1 %v7954_v22  ;;  %v6197_v40 = vld [vmem:[%s11739_s4 + $0x2c0] sm:$0xff]  ;;  %v7874_v5 = vpack.c.bf16 %v6120_v23, %v6119_v28  ;;  %v11883_v22 = vld [vmem:[#allocation10_spill] sm:$0xff] }
 0x1b3   : > { %7067 = vmatprep.mubr.msk.f32.mxu0 %vm9269_vm7, %v9256_v19  ;;  %7959 = vmatprep.subr.bf16.mxu1 %v7958_v9  ;;  %v6121_v19 = vld [vmem:[%s11739_s4 + $0x160] sm:$0xff]  ;;  %v9636_v23 = vld [vmem:[#allocation2 + $0xe8] sm:$0xff] }
 0x1b4   : > { %7871 = vmatprep.subr.bf16.mxu0 %v7870_v59  ;;  %v9633_v28 = vld [vmem:[#allocation2 + $0xe0] sm:$0xff] }
 0x1b5   : > { %7299 = vmatmul.mubr.f32.gmra.mrb[4].mxu1 %v9084_v38  ;;  %7068 = vmatmul.mubr.f32.gmra.mrb[42].mxu0 %v9274_v21  ;;  %v7966_v38 = vpack.c.bf16 %v6198_v1, %v6197_v40  ;;  %v6122_v21 = vld [vmem:[%s11739_s4 + $0x168] sm:$0xff]  ;;  %v447_v40 = vadd.s32 40, %v11887_v17  ;;  %v9645_v1 = vld [vmem:[#allocation2 + $0xf0] sm:$0xff] }
 0x1b6   : > { %7301 = vmatprep.mubr.f32.mxu1 %v9086_v55  ;;  %7961 = vmatpush3.bf16.msra.mxu1 %v7958_v9  ;;  %v6199_v55 = vld [vmem:[%s11739_s4 + $0x2d0] sm:$0xff]  ;;  %v7878_v36 = vpack.c.bf16 %v6122_v21, %v6121_v19  ;;  %v443_v9 = vadd.s32 8, %v11887_v17  ;;  %v11892_v19 = vmov 0 }
 0x1b7   : > { %7070 = vmatprep.mubr.msk.f32.mxu0 %vm9290_vm8, %v9277_v50  ;;  %7963 = vmatprep.subr.bf16.mxu1 %v7962_v26  ;;  %v6200_v50 = vld [vmem:[%s11739_s4 + $0x2d8] sm:$0xff]  ;;  %v513_v21 = vand.u32 15, %v447_v40  ;;  %v11902_v40 = vmov 0 }
 0x1b8   : > { %7873 = vmatpush3.bf16.msra.mxu0 %v7870_v59  ;;  %v445_v59 = vadd.s32 24, %v11887_v17 }
 0x1b9   : > { %7302 = vmatmul.mubr.f32.gmra.mrb[6].mxu1 %v9088_v7  ;;  %7071 = vmatmul.mubr.f32.gmra.mrb[44].mxu0 %v9295_v13  ;;  %v7970_v7 = vpack.c.bf16 %v6200_v50, %v6199_v55  ;;  %v6123_v13 = vld [vmem:[%s11739_s4 + $0x170] sm:$0xff]  ;;  %v449_v55 = vadd.s32 56, %v11887_v17  ;;  %v9658_v50 = vld [vmem:[#allocation2 + $0x100] sm:$0xff] }
 0x1ba   : > { %7304 = vmatprep.mubr.f32.mxu1 %v9090_v53  ;;  %7073 = vmatprep.mubr.msk.f32.mxu0 %vm9311_vm9, %v9298_v58  ;;  %v6201_v53 = vld [vmem:[%s11739_s4 + $0x2e0] sm:$0xff]  ;;  %v6202_v58 = vld [vmem:[%s11739_s4 + $0x2e8] sm:$0xff]  ;;  %v7882_v63 = vpack.c.bf16 %v6124_v46, %v6123_v13  ;;  %v11894_v46 = vmov 0 }
 0x1bb   : > { %7965 = vmatpush3.bf16.msra.mxu1 %v7962_v26  ;;  %7875 = vmatprep.subr.bf16.mxu0 %v7874_v5  ;;  %v2249_v26 = vld [vmem:[#allocation2 + $0x9] sm:$0xff] }
 0x1bc   : > { %7967 = vmatprep.subr.bf16.mxu1 %v7966_v38  ;;  %7877 = vmatpush3.bf16.msra.mxu0 %v7874_v5  ;;  %v2250_v5 = vld [vmem:[#allocation2 + $0x11] sm:$0xff]  ;;  %v9665_v13 = vld [vmem:[#allocation2 + $0x29] sm:$0xff] }
 0x1bd   : > { %7305 = vmatmul.mubr.f32.gmra.mrb[8].mxu1 %v9092_v32  ;;  %7074 = vmatmul.mubr.f32.gmra.mrb[46].mxu0 %v9316_v56  ;;  %v7974_v32 = vpack.c.bf16 %v6202_v58, %v6201_v53  ;;  %v6203_v56 = vld [vmem:[%s11739_s4 + $0x2f0] sm:$0xff]  ;;  %v527_v53 = vand.u32 15, %v449_v55  ;;  %v451_v58 = vadd.s32 72, %v11887_v17 }
 0x1be   : > { %7307 = vmatprep.mubr.f32.mxu1 %v9094_v6  ;;  %7076 = vmatprep.mubr.msk.f32.mxu0 %vm9332_vm10, %v9319_v47  ;;  %v6204_v6 = vld [vmem:[%s11739_s4 + $0x2f8] sm:$0xff]  ;;  %v11874_v47 = vld [vmem:[#allocation5_spill] sm:$0xff] }
 0x1bf   : > { %7969 = vmatpush3.bf16.msra.mxu1 %v7966_v38  ;;  %7879 = vmatprep.subr.bf16.mxu0 %v7878_v36  ;;  %v9648_v38 = vld [vmem:[#allocation2 + $0xf8] sm:$0xff] }
 0x1c0   : > { %7971 = vmatprep.subr.bf16.mxu1 %v7970_v7  ;;  %7881 = vmatpush3.bf16.msra.mxu0 %v7878_v36  ;;  %v2252_v36 = vld [vmem:[#allocation2 + $0x21] sm:$0xff] }
 0x1c1   : > { %7308 = vmatmul.mubr.f32.gmra.mrb[10].mxu1 %v9100_v4  ;;  %7077 = vmatmul.mubr.f32.gmra.mrb[48].mxu0 %v9337_v29  ;;  %v7978_v4 = vpack.c.bf16 %v6204_v6, %v6203_v56  ;;  %v6221_v29 = vld [vmem:[%s11739_s4 + $0x300] sm:$0xff]  ;;  %v6223_v56 = vld [vmem:[%s11739_s4 + $0x310] sm:$0xff]  ;;  %v6224_v6 = vld [vmem:[%s11739_s4 + $0x318] sm:$0xff] }
 0x1c2   : > { %7310 = vmatprep.mubr.f32.mxu1 %v9102_v39  ;;  %7079 = vmatprep.mubr.msk.f32.mxu0 %vm9349_vm11, %v9342_v27  ;;  %v6222_v39 = vld [vmem:[%s11739_s4 + $0x308] sm:$0xff] }
 0x1c3   : > { %7973 = vmatpush3.bf16.msra.mxu1 %v7970_v7  ;;  %7883 = vmatprep.subr.bf16.mxu0 %v7882_v63  ;;  %v9598_v27 = vpack.c.bf16 %v6222_v39, %v6221_v29  ;;  %v9661_v7 = vld [vmem:[#allocation2 + $0x108] sm:$0xff]  ;;  %v11896_v29 = vmov 0  ;;  %v541_v39 = vand.u32 15, %v451_v58  ;;  %v6232_v58 = vld [vmem:[%s11739_s4 + $0x358] sm:$0xff] }
 0x1c4   : > { %7975 = vmatprep.subr.bf16.mxu1 %v7974_v32  ;;  %7885 = vmatpush3.bf16.msra.mxu0 %v7882_v63  ;;  %v9674_v63 = vld [vmem:[#allocation2 + $0x110] sm:$0xff] }
 0x1c5   : > { %7311 = vmatmul.mubr.f32.gmra.mrb[12].mxu1 %v9104_v34  ;;  %7080 = vmatmul.mubr.f32.gmra.mrb[50].mxu0 %v9354_v10  ;;  %v11873_v34 = vld [vmem:[#allocation4_spill] sm:$0xff]  ;;  %v11875_v10 = vld [vmem:[#allocation14_spill] sm:$0xff] }
 0x1c6   : > { %7313 = vmatprep.mubr.f32.mxu1 %v9106_v18  ;;  %7082 = vmatprep.mubr.msk.f32.mxu0 %vm9365_vm12, %v9358_v15  ;;  %v11876_v18 = vld [vmem:[#allocation6_spill] sm:$0xff]  ;;  %v11877_v15 = vld [vmem:[#allocation15_spill] sm:$0xff] }
 0x1c7   : > { %7977 = vmatpush3.bf16.msra.mxu1 %v7974_v32  ;;  %v9676_v32 = vld [vmem:[#allocation2 + $0x31] sm:$0xff] }
 0x1c8   : > { %7979 = vmatprep.subr.bf16.mxu1 %v7978_v4 }
 0x1c9   : > { %7314 = vmatmul.mubr.f32.gmra.mrb[14].mxu1 %v11873_v34  ;;  %7083 = vmatmul.mubr.f32.gmra.mrb[52].mxu0 %v9370_v37  ;;  %v11880_v37 = vld [vmem:[#allocation8_spill] sm:$0xff]  ;;  %v453_v34 = vadd.s32 88, %v11887_v17 }
 0x1ca   : > { %7316 = vmatprep.mubr.f32.mxu1 %v11874_v47  ;;  %7085 = vmatprep.mubr.msk.f32.mxu0 %vm9380_vm13, %v11875_v10  ;;  %v7986_v47 = vpack.c.bf16 %v6224_v6, %v6223_v56  ;;  %v9696_v10 = vld [vmem:[#allocation2 + $0x41] sm:$0xff]  ;;  %vm9713_vm13 = vcmp.le.s32.totalorder %v541_v39, 14  ;;  %v11904_v56 = vmov 0  ;;  %v461_v39 = vadd.s32 152, %v11887_v17 }
 0x1cb   : > { %7981 = vmatpush3.bf16.msra.mxu1 %v7978_v4  ;;  %v9688_v4 = vld [vmem:[#allocation2 + $0x39] sm:$0xff] }
 0x1cc   : > { %7983 = vmatprep.subr.bf16.mxu1 %v9598_v27 }
 0x1cd   : > { %7317 = vmatmul.mubr.f32.gmra.mrb[16].mxu1 %v11876_v18  ;;  %7086 = vmatmul.mubr.f32.gmra.mrb[54].mxu0 %v11877_v15  ;;  %v6225_v18 = vld [vmem:[%s11739_s4 + $0x320] sm:$0xff]  ;;  %v6226_v15 = vld [vmem:[%s11739_s4 + $0x328] sm:$0xff] }
 0x1ce   : > { %7319 = vmatprep.mubr.f32.mxu1 %v11878_v60  ;;  %7088 = vmatprep.mubr.msk.f32.mxu0 %vm9397_vm14, %v11879_v0  ;;  %vm9691_vm14 = vcmp.le.s32.totalorder %v527_v53, 14  ;;  %v9711_v60 = vld [vmem:[#allocation2 + $0x49] sm:$0xff]  ;;  %v11898_v0 = vmov 0 }
 0x1cf   : > { %v11897_v29 = vsel %vm9691_vm14, 4294967295, %v11896_v29  ;;  %v11899_v0 = vsel %vm9713_vm13, 4294967295, %v11898_v0  ;;  %v6231_v53 = vld [vmem:[%s11739_s4 + $0x350] sm:$0xff] }
 0x1d1   : > { %7320 = vmatmul.mubr.f32.gmra.mrb[18].mxu1 %v11880_v37  ;;  %7089 = vmatmul.mubr.f32.gmra.mrb[56].mxu0 %v11881_v49  ;;  %v555_v37 = vand.u32 15, %v453_v34  ;;  %v455_v49 = vadd.s32 104, %v11887_v17  ;;  %v9788_v34 = vld [vmem:[#allocation2 + $0x81] sm:$0xff] }
 0x1d2   : > { %7322 = vmatprep.mubr.f32.mxu1 %v11882_v57  ;;  %7091 = vmatprep.mubr.msk.f32.mxu0 %vm9414_vm15, %v9405_v41  ;;  %v485_v41 = vand.u32 15, %v443_v9  ;;  %vm9669_vm15 = vcmp.le.s32.totalorder %v513_v21, 14  ;;  %v7990_v57 = vpack.c.bf16 %v6226_v15, %v6225_v18  ;;  %v9765_v21 = vld [vmem:[#allocation2 + $0x71] sm:$0xff]  ;;  %v9796_v18 = vld [vmem:[#allocation2 + $0x89] sm:$0xff]  ;;  %v6233_v15 = vld [vmem:[%s11739_s4 + $0x360] sm:$0xff] }
 0x1d3   : > { %v11895_v46 = vsel %vm9669_vm15, 4294967295, %v11894_v46  ;;  %v569_v9 = vand.u32 15, %v455_v49  ;;  %v11907_v49 = vmov 0 }
 0x1d5   : > { %7323 = vmatmul.mubr.f32.gmra.mrb[20].mxu1 %v11883_v22  ;;  %7092 = vmatmul.mubr.f32.gmra.mrb[58].mxu0 %v11884_v20  ;;  %v9719_v22 = vld [vmem:[#allocation2 + $0x51] sm:$0xff] }
 0x1d6   : > { %7325 = vmatprep.mubr.f32.mxu1 %v11885_v42  ;;  %7094 = vmatprep.mubr.msk.f32.mxu0 %vm9437_vm1, %v11886_v12  ;;  %vm9640_vm1 = vcmp.le.s32.totalorder %v485_v41, 14  ;;  %v6228_v20 = vld [vmem:[%s11739_s4 + $0x338] sm:$0xff]  ;;  %v11900_v12 = vmov 0  ;;  %v9742_v41 = vld [vmem:[#allocation2 + $0x61] sm:$0xff] }
 0x1d7   : > { %v9734_v42 = vld [vmem:[#allocation2 + $0x59] sm:$0xff] }
 0x1d9   : > { %7326 = vmatmul.mubr.f32.gmra.mrb[22].mxu1 %v11888_v11  ;;  %7095 = vmatmul.mubr.f32.gmra.mrb[60].mxu0 %v9441_v45  ;;  %v11890_v45 = vmov 0  ;;  %v457_v11 = vadd.s32 120, %v11887_v17 }
 0x1da   : > { %7328 = vmatprep.mubr.f32.mxu1 %v11889_v43  ;;  %7097 = vmatprep.mubr.msk.f32.mxu0 %vm9458_vm0, %v9444_v31  ;;  %v11891_v45 = vsel %vm9640_vm1, 4294967295, %v11890_v45  ;;  %v499_v31 = vand.u32 15, %v445_v59  ;;  %v6229_v59 = vld [vmem:[%s11739_s4 + $0x340] sm:$0xff] }
 0x1dc   : > { %vm9653_vm0 = vcmp.le.s32.totalorder %v499_v31, 14  ;;  %v9757_v31 = vld [vmem:[#allocation2 + $0x69] sm:$0xff] }
 0x1dd   : > { %7329 = vmatmul.mubr.f32.gmra.mrb[24].mxu1 %v9633_v28  ;;  %7098 = vmatmul.mubr.f32.gmra.mrb[62].mxu0 %v9463_v48  ;;  %v2251_v48 = vld [vmem:[#allocation2 + $0x19] sm:$0xff]  ;;  %v11893_v19 = vsel %vm9653_vm0, 4294967295, %v11892_v19 }
 0x1de   : > { %7331 = vmatprep.mubr.f32.mxu1 %v9636_v23  ;;  %7132 = vmatprep.mubr.f32.mxu0 %v2249_v26  ;;  %v6230_v26 = vld [vmem:[%s11739_s4 + $0x348] sm:$0xff] }
 0x1df   : > { %v7998_v55 = vpack.c.bf16 %v6230_v26, %v6229_v59  ;;  %v6236_v59 = vld [vmem:[%s11739_s4 + $0x378] sm:$0xff]  ;;  %v11910_v26 = vmov 0 }
 0x1e1   : > { %7332 = vmatmul.mubr.f32.gmra.mrb[26].mxu1 %v9645_v1  ;;  %7133 = vmatmul.mubr.msk.f32.vlgmr.msra.gmra.mrb[32].mxu0 %vm9640_vm1, %v2250_v5  ;;  %v583_v5 = vand.u32 15, %v457_v11  ;;  %v9819_v11 = vld [vmem:[#allocation2 + $0x99] sm:$0xff] }
 0x1e2   : > { %7334 = vmatprep.mubr.f32.mxu1 %v9648_v38  ;;  %7135 = vmatprep.mubr.f32.mxu0 %v2251_v48 }
 0x1e5   : > { %7335 = vmatmul.mubr.f32.gmra.mrb[28].mxu1 %v9658_v50  ;;  %7136 = vmatmul.mubr.msk.f32.gmra.mrb[34].mxu0 %vm9653_vm0, %v2252_v36 }
 0x1e6   : > { %7337 = vmatprep.mubr.f32.mxu1 %v9661_v7  ;;  %7138 = vmatprep.mubr.f32.mxu0 %v9665_v13 }
 0x1e9   : > { %7338 = vmatmul.mubr.f32.gmra.mrb[30].mxu1 %v9674_v63  ;;  %7139 = vmatmul.mubr.msk.f32.gmra.mrb[36].mxu0 %vm9669_vm15, %v9676_v32 }
 0x1ea   : > { %7372 = vmatprep.mubr.f32.mxu1 %v2251_v48  ;;  %7141 = vmatprep.mubr.f32.mxu0 %v9688_v4  ;;  %v459_v48 = vadd.s32 136, %v11887_v17 }
 0x1ec   : > { %v597_v6 = vand.u32 15, %v459_v48  ;;  %v465_v48 = vadd.s32 184, %v11887_v17 }
 0x1ed   : > { %7373 = vmatmul.mubr.msk.f32.vlgmr.msra.gmra.mrb[0].mxu1 %vm9640_vm1, %v2252_v36  ;;  %7142 = vmatmul.mubr.msk.f32.gmra.mrb[38].mxu0 %vm9691_vm14, %v9696_v10  ;;  %vm9736_vm1 = vcmp.le.s32.totalorder %v555_v37, 14  ;;  %v9773_v36 = vld [vmem:[#allocation2 + $0x79] sm:$0xff]  ;;  %v6234_v37 = vld [vmem:[%s11739_s4 + $0x368] sm:$0xff] }
 0x1ee   : > { %7985 = vmatpush3.bf16.msra.mxu1 %v9598_v27  ;;  %7375 = vmatprep.mubr.f32.mxu1 %v9665_v13  ;;  %v6227_v27 = vld [vmem:[%s11739_s4 + $0x330] sm:$0xff]  ;;  %v11901_v12 = vsel %vm9736_vm1, 4294967295, %v11900_v12 }
 0x1ef   : > { %7987 = vmatprep.subr.bf16.mxu1 %v7986_v47  ;;  %7144 = vmatprep.mubr.f32.mxu0 %v9711_v60  ;;  %v7994_v43 = vpack.c.bf16 %v6228_v20, %v6227_v27  ;;  %v463_v27 = vadd.s32 168, %v11887_v17  ;;  %v9811_v20 = vld [vmem:[#allocation2 + $0x91] sm:$0xff] }
 0x1f1   : > { %7376 = vmatmul.mubr.msk.f32.gmra.mrb[2].mxu1 %vm9653_vm0, %v9676_v32  ;;  %7145 = vmatmul.mubr.msk.f32.gmra.mrb[40].mxu0 %vm9713_vm13, %v9719_v22  ;;  %vm9759_vm0 = vcmp.le.s32.totalorder %v569_v9, 14  ;;  %v8006_v9 = vpack.c.bf16 %v6234_v37, %v6233_v15  ;;  %v639_v15 = vand.u32 15, %v465_v48  ;;  %v467_v37 = vadd.s32 200, %v11887_v17  ;;  %v9876_v48 = vld [vmem:[#allocation2 + $0xc1] sm:$0xff] }
 0x1f2   : > { %7378 = vmatprep.mubr.f32.mxu1 %v9688_v4  ;;  %7989 = vmatpush3.bf16.msra.mxu1 %v7986_v47  ;;  %v11903_v40 = vsel %vm9759_vm0, 4294967295, %v11902_v40  ;;  %v8002_v47 = vpack.c.bf16 %v6232_v58, %v6231_v53  ;;  %v9842_v58 = vld [vmem:[#allocation2 + $0xa9] sm:$0xff] }
 0x1f3   : > { %7147 = vmatprep.mubr.f32.mxu0 %v9734_v42  ;;  %7991 = vmatprep.subr.bf16.mxu1 %v7990_v57  ;;  %11913 = vst [vmem:[#allocation6_spill] sm:$0xff] %v9842_v58 }
 0x1f5   : > { %7379 = vmatmul.mubr.msk.f32.gmra.mrb[4].mxu1 %vm9669_vm15, %v9696_v10  ;;  %7148 = vmatmul.mubr.msk.f32.gmra.mrb[42].mxu0 %vm9736_vm1, %v9742_v41  ;;  %vm9783_vm15 = vcmp.le.s32.totalorder %v583_v5, 14  ;;  %v625_v5 = vand.u32 15, %v463_v27 }
 0x1f6   : > { %7381 = vmatprep.mubr.f32.mxu1 %v9711_v60  ;;  %7993 = vmatpush3.bf16.msra.mxu1 %v7990_v57  ;;  %v11905_v56 = vsel %vm9783_vm15, 4294967295, %v11904_v56  ;;  %v611_v57 = vand.u32 15, %v461_v39  ;;  %v6254_v39 = vld [vmem:[%s11739_s4 + $0x388] sm:$0xff] }
 0x1f7   : > { %7150 = vmatprep.mubr.f32.mxu0 %v9757_v31  ;;  %7995 = vmatprep.subr.bf16.mxu1 %v7994_v43  ;;  %11906 = vst [vmem:[#allocation4_spill] sm:$0xff] %v11905_v56  ;;  %v9911_v56 = vld [vmem:[#allocation2 + $0xe1] sm:$0xff] }
 0x1f9   : > { %7382 = vmatmul.mubr.msk.f32.gmra.mrb[6].mxu1 %vm9691_vm14, %v9719_v22  ;;  %7151 = vmatmul.mubr.msk.f32.gmra.mrb[44].mxu0 %vm9759_vm0, %v9765_v21  ;;  %vm9806_vm14 = vcmp.le.s32.totalorder %v597_v6, 14  ;;  %v6253_v6 = vld [vmem:[%s11739_s4 + $0x380] sm:$0xff] }
 0x1fa   : > { %7384 = vmatprep.mubr.f32.mxu1 %v9734_v42  ;;  %7153 = vmatprep.mubr.f32.mxu0 %v9773_v36  ;;  %v11908_v49 = vsel %vm9806_vm14, 4294967295, %v11907_v49  ;;  %v9859_v27 = vpack.c.bf16 %v6254_v39, %v6253_v6  ;;  %v9885_v6 = vld [vmem:[#allocation2 + $0xc9] sm:$0xff] }
 0x1fb   : > { %7997 = vmatpush3.bf16.msra.mxu1 %v7994_v43  ;;  %11909 = vst [vmem:[#allocation5_spill] sm:$0xff] %v11908_v49  ;;  %v6235_v43 = vld [vmem:[%s11739_s4 + $0x370] sm:$0xff]  ;;  %v9902_v49 = vld [vmem:[#allocation2 + $0xd9] sm:$0xff] }
 0x1fc   : > { %7999 = vmatprep.subr.bf16.mxu1 %v7998_v55  ;;  %v8010_v53 = vpack.c.bf16 %v6236_v59, %v6235_v43  ;;  %v9867_v43 = vld [vmem:[#allocation2 + $0xb9] sm:$0xff]  ;;  %v653_v59 = vand.u32 15, %v467_v37  ;;  %v9894_v37 = vld [vmem:[#allocation2 + $0xd1] sm:$0xff] }
 0x1fd   : > { %7385 = vmatmul.mubr.msk.f32.gmra.mrb[8].mxu1 %vm9713_vm13, %v9742_v41  ;;  %7154 = vmatmul.mubr.msk.f32.gmra.mrb[46].mxu0 %vm9783_vm15, %v9788_v34  ;;  %vm9829_vm13 = vcmp.le.s32.totalorder %v611_v57, 14  ;;  %v9857_v57 = vld [vmem:[#allocation2 + $0xb1] sm:$0xff] }
 0x1fe   : > { %7387 = vmatprep.mubr.f32.mxu1 %v9757_v31  ;;  %7156 = vmatprep.mubr.f32.mxu0 %v9796_v18  ;;  %v11911_v26 = vsel %vm9829_vm13, 4294967295, %v11910_v26 }
 0x1ff   : > { %8001 = vmatpush3.bf16.msra.mxu1 %v7998_v55  ;;  %11912 = vst [vmem:[#allocation14_spill] sm:$0xff] %v11911_v26  ;;  %v9834_v55 = vld [vmem:[#allocation2 + $0xa1] sm:$0xff]  ;;  %v9919_v26 = vld [vmem:[#allocation2 + $0xe9] sm:$0xff] }
 0x200   : > { %8003 = vmatprep.subr.bf16.mxu1 %v8002_v47  ;;  %11926 = vst [vmem:[#allocation17_spill] sm:$0xff] %v9919_v26 }
 0x201   : > { %7388 = vmatmul.mubr.msk.f32.gmra.mrb[10].mxu1 %vm9736_vm1, %v9765_v21  ;;  %7157 = vmatmul.mubr.msk.f32.gmra.mrb[48].mxu0 %vm9806_vm14, %v9811_v20  ;;  %vm9852_vm1 = vcmp.le.s32.totalorder %v625_v5, 14  ;;  %v469_v5 = vadd.s32 216, %v11887_v17 }
 0x202   : > { %7390 = vmatprep.mubr.f32.mxu1 %v9773_v36  ;;  %7159 = vmatprep.mubr.f32.mxu0 %v9819_v11 }
 0x203   : > { %8005 = vmatpush3.bf16.msra.mxu1 %v8002_v47  ;;  %v11914_v47 = vmov 0  ;;  %v667_v39 = vand.u32 15, %v469_v5 }
 0x204   : > { %8007 = vmatprep.subr.bf16.mxu1 %v8006_v9  ;;  %v11915_v47 = vsel %vm9852_vm1, 4294967295, %v11914_v47 }
 0x205   : > { %7391 = vmatmul.mubr.msk.f32.gmra.mrb[12].mxu1 %vm9759_vm0, %v9788_v34  ;;  %7160 = vmatmul.mubr.msk.f32.gmra.mrb[50].mxu0 %vm9829_vm13, %v9834_v55  ;;  %11916 = vst [vmem:[#allocation15_spill] sm:$0xff] %v11915_v47  ;;  %vm9871_vm0 = vcmp.le.s32.totalorder %v639_v15, 14  ;;  %v471_v15 = vadd.s32 232, %v11887_v17  ;;  %v9935_v47 = vld [vmem:[#allocation2 + $0xf9] sm:$0xff] }
 0x206   : > { %7393 = vmatprep.mubr.f32.mxu1 %v9796_v18  ;;  %7162 = vmatprep.mubr.f32.mxu0 %v9842_v58  ;;  %11931 = vst [vmem:[#allocation18_spill] sm:$0xff] %v9935_v47 }
 0x207   : > { %8009 = vmatpush3.bf16.msra.mxu1 %v8006_v9  ;;  %v11917_v9 = vmov 0  ;;  %v681_v5 = vand.u32 15, %v471_v15  ;;  %v9927_v15 = vld [vmem:[#allocation2 + $0xf1] sm:$0xff] }
 0x208   : > { %8011 = vmatprep.subr.bf16.mxu1 %v8010_v53  ;;  %v11918_v9 = vsel %vm9871_vm0, 4294967295, %v11917_v9  ;;  %11930 = vst [vmem:[#allocation10_spill] sm:$0xff] %v9927_v15 }
 0x209   : > { %7394 = vmatmul.mubr.msk.f32.gmra.mrb[14].mxu1 %vm9783_vm15, %v9811_v20  ;;  %7163 = vmatmul.mubr.msk.f32.gmra.mrb[52].mxu0 %vm9852_vm1, %v9857_v57  ;;  %11919 = vst [vmem:[#allocation7_spill] sm:$0xff] %v11918_v9  ;;  %vm9889_vm15 = vcmp.le.s32.totalorder %v653_v59, 14  ;;  %v11923_v59 = vmov 0  ;;  %v3635_v9 = vld [vmem:[#allocation2 + $0x37] sm:$0xff] }
 0x20a   : > { %7396 = vmatprep.mubr.f32.mxu1 %v9819_v11  ;;  %7165 = vmatprep.mubr.f32.mxu0 %v9867_v43 }
 0x20b   : > { %8013 = vmatpush3.bf16.msra.mxu1 %v8010_v53  ;;  %v11920_v53 = vmov 0 }
 0x20c   : > { %8015 = vmatprep.subr.bf16.mxu1 %v9859_v27  ;;  %v11921_v53 = vsel %vm9889_vm15, 4294967295, %v11920_v53 }
 0x20d   : > { %7397 = vmatmul.mubr.msk.f32.gmra.mrb[16].mxu1 %vm9806_vm14, %v9834_v55  ;;  %7166 = vmatmul.mubr.msk.f32.gmra.mrb[54].mxu0 %vm9871_vm0, %v9876_v48  ;;  %11922 = vst [vmem:[#allocation16_spill] sm:$0xff] %v11921_v53  ;;  %vm9906_vm14 = vcmp.le.s32.totalorder %v667_v39, 14  ;;  %v11927_v39 = vmov 0  ;;  %v9962_v53 = vld [vmem:[#allocation2 + $0x111] sm:$0xff] }
 0x20e   : > { %7399 = vmatprep.mubr.f32.mxu1 %v9842_v58  ;;  %7168 = vmatprep.mubr.f32.mxu0 %v9885_v6  ;;  %v11924_v59 = vsel %vm9906_vm14, 4294967295, %v11923_v59  ;;  %v473_v58 = vadd.s32 248, %v11887_v17 }
 0x20f   : > { %11925 = vst [vmem:[#allocation8_spill] sm:$0xff] %v11924_v59  ;;  %v6256_v59 = vld [vmem:[%s11739_s4 + $0x398] sm:$0xff] }
 0x210   : > { %v695_v17 = vand.u32 15, %v473_v58  ;;  %v9943_v58 = vld [vmem:[#allocation2 + $0x101] sm:$0xff] }
 0x211   : > { %7400 = vmatmul.mubr.msk.f32.gmra.mrb[18].mxu1 %vm9829_vm13, %v9857_v57  ;;  %7169 = vmatmul.mubr.msk.f32.gmra.mrb[56].mxu0 %vm9889_vm15, %v9894_v37  ;;  %vm9923_vm13 = vcmp.le.s32.totalorder %v681_v5, 14  ;;  %v11932_v5 = vmov 0  ;;  %11935 = vst [vmem:[#allocation19_spill] sm:$0xff] %v9943_v58 }
 0x212   : > { %7402 = vmatprep.mubr.f32.mxu1 %v9867_v43  ;;  %7171 = vmatprep.mubr.f32.mxu0 %v9902_v49  ;;  %v11928_v39 = vsel %vm9923_vm13, 4294967295, %v11927_v39 }
 0x213   : > { %11929 = vst [vmem:[#allocation9_spill] sm:$0xff] %v11928_v39  ;;  %v3633_v39 = vld [vmem:[#allocation2 + $0x27] sm:$0xff] }
 0x215   : > { %7403 = vmatmul.mubr.msk.f32.gmra.mrb[20].mxu1 %vm9852_vm1, %v9876_v48  ;;  %7172 = vmatmul.mubr.msk.f32.gmra.mrb[58].mxu0 %vm9906_vm14, %v9911_v56  ;;  %vm9939_vm1 = vcmp.le.s32.totalorder %v695_v17, 14  ;;  %v9959_v17 = vld [vmem:[#allocation2 + $0x109] sm:$0xff] }
 0x216   : > { %7405 = vmatprep.mubr.f32.mxu1 %v9885_v6  ;;  %7174 = vmatprep.mubr.f32.mxu0 %v9919_v26  ;;  %v11933_v5 = vsel %vm9939_vm1, 4294967295, %v11932_v5  ;;  %11936 = vst [vmem:[#allocation3_spill] sm:$0xff] %v9959_v17 }
 0x217   : > { %11934 = vst [vmem:[#allocation11_spill] sm:$0xff] %v11933_v5  ;;  %v3637_v5 = vld [vmem:[#allocation2 + $0x47] sm:$0xff] }
 0x219   : > { %7406 = vmatmul.mubr.msk.f32.gmra.mrb[22].mxu1 %vm9871_vm0, %v9894_v37  ;;  %7175 = vmatmul.mubr.msk.f32.gmra.mrb[60].mxu0 %vm9923_vm13, %v9927_v15 }
 0x21a   : > { %7408 = vmatprep.mubr.f32.mxu1 %v9902_v49  ;;  %7177 = vmatprep.mubr.f32.mxu0 %v9935_v47 }
 0x21d   : > { %7409 = vmatmul.mubr.msk.f32.gmra.mrb[24].mxu1 %vm9889_vm15, %v9911_v56  ;;  %7178 = vmatmul.mubr.msk.f32.gmra.mrb[62].mxu0 %vm9939_vm1, %v9943_v58 }
 0x21e   : > { %7411 = vmatprep.mubr.f32.mxu1 %v9919_v26  ;;  %v6255_v26 = vld [vmem:[%s11739_s4 + $0x390] sm:$0xff] }
 0x221   : > { %7412 = vmatmul.mubr.msk.f32.gmra.mrb[26].mxu1 %vm9906_vm14, %v9927_v15  ;;  %v6258_v15 = vld [vmem:[%s11739_s4 + $0x3a8] sm:$0xff] }
 0x222   : > { %7414 = vmatprep.mubr.f32.mxu1 %v9935_v47  ;;  %v6257_v47 = vld [vmem:[%s11739_s4 + $0x3a0] sm:$0xff] }
 0x223   : > { %v8022_v3 = vpack.c.bf16 %v6258_v15, %v6257_v47  ;;  %v6261_v47 = vld [vmem:[%s11739_s4 + $0x3c0] sm:$0xff]  ;;  %v3639_v15 = vld [vmem:[#allocation2 + $0x57] sm:$0xff] }
 0x225   : > { %7415 = vmatmul.mubr.msk.f32.gmra.mrb[28].mxu1 %vm9923_vm13, %v9943_v58  ;;  %v8018_v58 = vpack.c.bf16 %v6256_v59, %v6255_v26  ;;  %v6259_v26 = vld [vmem:[%s11739_s4 + $0x3b0] sm:$0xff]  ;;  %v6260_v59 = vld [vmem:[%s11739_s4 + $0x3b8] sm:$0xff] }
 0x226   : > { %7417 = vmatprep.mubr.f32.mxu1 %v9959_v17  ;;  %v3634_v17 = vld [vmem:[#allocation2 + $0x2f] sm:$0xff]  ;;  %v8026_v54 = vpack.c.bf16 %v6260_v59, %v6259_v26  ;;  %v6265_v26 = vld [vmem:[%s11739_s4 + $0x3e0] sm:$0xff] }
 0x227   : > { %v6266_v59 = vld [vmem:[%s11739_s4 + $0x3e8] sm:$0xff] }
 0x228   : > { %v8038_v62 = vpack.c.bf16 %v6266_v59, %v6265_v26  ;;  %v3651_v26 = vld [vmem:[#allocation2 + $0xb7] sm:$0xff]  ;;  %v3652_v59 = vld [vmem:[#allocation2 + $0xbf] sm:$0xff] }
 0x229   : > { %7418 = vmatmul.mubr.msk.f32.gmra.mrb[30].mxu1 %vm9939_vm1, %v9962_v53 }
 0x22a   : > { %7452 = vmatprep.mubr.msk.f32.mxu1 %vm9067_vm2, %v3633_v39  ;;  %v3636_v39 = vld [vmem:[#allocation2 + $0x3f] sm:$0xff]  ;;  %vm11937_vm2 = vnez %v11854_v61  ;;  %v3662_v61 = vld [vmem:[#allocation2 + $0x10f] sm:$0xff] }
 0x22d   : > { %7453 = vmatmul.mubr.f32.vlgmr.msra.gmra.mrb[0].mxu1 %v3634_v17  ;;  %v6264_v17 = vld [vmem:[%s11739_s4 + $0x3d8] sm:$0xff] }
 0x22e   : > { %8017 = vmatpush3.bf16.msra.mxu1 %v9859_v27  ;;  %7455 = vmatprep.mubr.msk.f32.mxu1 %vm9182_vm3, %v3635_v9  ;;  %v3638_v27 = vld [vmem:[#allocation2 + $0x4f] sm:$0xff]  ;;  %vm11938_vm3 = vnez %v11860_v14  ;;  %v3664_v14 = vld [vmem:[#allocation2 + $0x11f] sm:$0xff] }
 0x22f   : > { %8019 = vmatprep.subr.bf16.mxu1 %v8018_v58  ;;  %v6262_v9 = vld [vmem:[%s11739_s4 + $0x3c8] sm:$0xff] }
 0x230   : > { %v8030_v25 = vpack.c.bf16 %v6262_v9, %v6261_v47  ;;  %v6267_v47 = vld [vmem:[%s11739_s4 + $0x3f0] sm:$0xff]  ;;  %v6268_v9 = vld [vmem:[%s11739_s4 + $0x3f8] sm:$0xff] }
 0x231   : > { %7456 = vmatmul.mubr.f32.gmra.mrb[2].mxu1 %v3636_v39  ;;  %v3641_v39 = vld [vmem:[#allocation2 + $0x67] sm:$0xff]  ;;  %v8042_v16 = vpack.c.bf16 %v6268_v9, %v6267_v47  ;;  %v3659_v47 = vld [vmem:[#allocation2 + $0xf7] sm:$0xff] }
 0x232   : > { %7458 = vmatprep.mubr.msk.f32.mxu1 %vm9205_vm4, %v3637_v5  ;;  %8021 = vmatpush3.bf16.msra.mxu1 %v8018_v58  ;;  %v3640_v5 = vld [vmem:[#allocation2 + $0x5f] sm:$0xff]  ;;  %v6263_v58 = vld [vmem:[%s11739_s4 + $0x3d0] sm:$0xff]  ;;  %vm11939_vm4 = vnez %v11865_v44  ;;  %v3661_v9 = vld [vmem:[#allocation2 + $0x107] sm:$0xff] }
 0x233   : > { %8023 = vmatprep.subr.bf16.mxu1 %v8022_v3  ;;  %v8034_v24 = vpack.c.bf16 %v6264_v17, %v6263_v58  ;;  %v6270_v58 = vld [vmem:[%s11739_s4 + $0x408] sm:$0xff]  ;;  %v3647_v17 = vld [vmem:[#allocation2 + $0x97] sm:$0xff] }
 0x234   : > { %v6272_v44 = vld [vmem:[%s11739_s4 + $0x418] sm:$0xff] }
 0x235   : > { %7459 = vmatmul.mubr.f32.gmra.mrb[4].mxu1 %v3638_v27  ;;  %v3643_v27 = vld [vmem:[#allocation2 + $0x77] sm:$0xff] }
 0x236   : > { %7461 = vmatprep.mubr.msk.f32.mxu1 %vm9226_vm5, %v3639_v15  ;;  %8025 = vmatpush3.bf16.msra.mxu1 %v8022_v3  ;;  %v3642_v3 = vld [vmem:[#allocation2 + $0x6f] sm:$0xff]  ;;  %v3645_v15 = vld [vmem:[#allocation2 + $0x87] sm:$0xff]  ;;  %vm11940_vm5 = vnez %v11870_v51 }
 0x237   : > { %8027 = vmatprep.subr.bf16.mxu1 %v8026_v54 }
 0x239   : > { %7462 = vmatmul.mubr.f32.gmra.mrb[6].mxu1 %v3640_v5  ;;  %v6269_v5 = vld [vmem:[%s11739_s4 + $0x400] sm:$0xff] }
 0x23a   : > { %7464 = vmatprep.mubr.msk.f32.mxu1 %vm9247_vm6, %v3641_v39  ;;  %8029 = vmatpush3.bf16.msra.mxu1 %v8026_v54  ;;  %v3644_v54 = vld [vmem:[#allocation2 + $0x7f] sm:$0xff]  ;;  %v8046_v2 = vpack.c.bf16 %v6270_v58, %v6269_v5  ;;  %vm11941_vm6 = vnez %v11872_v33  ;;  %v3972_v5 = vld [vmem:[#allocation2 + $0x30] sm:$0xff]  ;;  %v6274_v33 = vld [vmem:[%s11739_s4 + $0x428] sm:$0xff] }
 0x23b   : > { %8031 = vmatprep.subr.bf16.mxu1 %v8030_v25  ;;  %v3648_v39 = vld [vmem:[#allocation2 + $0x9f] sm:$0xff] }
 0x23c   : > { %v6273_v58 = vld [vmem:[%s11739_s4 + $0x420] sm:$0xff] }
 0x23d   : > { %7465 = vmatmul.mubr.f32.gmra.mrb[8].mxu1 %v3642_v3  ;;  %v3650_v3 = vld [vmem:[#allocation2 + $0xaf] sm:$0xff] }
 0x23e   : > { %7467 = vmatprep.mubr.msk.f32.mxu1 %vm9269_vm7, %v3643_v27  ;;  %8033 = vmatpush3.bf16.msra.mxu1 %v8030_v25  ;;  %v3646_v25 = vld [vmem:[#allocation2 + $0x8f] sm:$0xff]  ;;  %vm11942_vm7 = vnez %v11891_v45 }
 0x23f   : > { %8035 = vmatprep.subr.bf16.mxu1 %v8034_v24  ;;  %v3654_v27 = vld [vmem:[#allocation2 + $0xcf] sm:$0xff] }
 0x241   : > { %7468 = vmatmul.mubr.f32.gmra.mrb[10].mxu1 %v3644_v54  ;;  %v3657_v54 = vld [vmem:[#allocation2 + $0xe7] sm:$0xff] }
 0x242   : > { %7470 = vmatprep.mubr.msk.f32.mxu1 %vm9290_vm8, %v3645_v15  ;;  %8037 = vmatpush3.bf16.msra.mxu1 %v8034_v24  ;;  %v3649_v24 = vld [vmem:[#allocation2 + $0xa7] sm:$0xff]  ;;  %v3663_v15 = vld [vmem:[#allocation2 + $0x117] sm:$0xff]  ;;  %vm11943_vm8 = vnez %v11893_v19 }
 0x243   : > { %8039 = vmatprep.subr.bf16.mxu1 %v8038_v62 }
 0x245   : > { %7471 = vmatmul.mubr.f32.gmra.mrb[12].mxu1 %v3646_v25  ;;  %v3971_v25 = vld [vmem:[#allocation2 + $0x28] sm:$0xff] }
 0x246   : > { %7473 = vmatprep.mubr.msk.f32.mxu1 %vm9311_vm9, %v3647_v17  ;;  %8041 = vmatpush3.bf16.msra.mxu1 %v8038_v62  ;;  %v3655_v62 = vld [vmem:[#allocation2 + $0xd7] sm:$0xff]  ;;  %vm11944_vm9 = vnez %v11895_v46 }
 0x247   : > { %8043 = vmatprep.subr.bf16.mxu1 %v8042_v16  ;;  %v3973_v17 = vld [vmem:[#allocation2 + $0x38] sm:$0xff] }
 0x249   : > { %7474 = vmatmul.mubr.f32.gmra.mrb[14].mxu1 %v3648_v39  ;;  %v8054_v39 = vpack.c.bf16 %v6274_v33, %v6273_v58  ;;  %v6284_v58 = vld [vmem:[%s11739_s4 + $0x478] sm:$0xff]  ;;  %v3983_v33 = vld [vmem:[#allocation2 + $0x88] sm:$0xff] }
 0x24a   : > { %7476 = vmatprep.mubr.msk.f32.mxu1 %vm9332_vm10, %v3649_v24  ;;  %8045 = vmatpush3.bf16.msra.mxu1 %v8042_v16  ;;  %v6271_v16 = vld [vmem:[%s11739_s4 + $0x410] sm:$0xff]  ;;  %v3974_v24 = vld [vmem:[#allocation2 + $0x40] sm:$0xff]  ;;  %vm11945_vm10 = vnez %v11897_v29  ;;  %v11951_v29 = vld [vmem:[#allocation6_spill] sm:$0xff] }
 0x24b   : > { %8047 = vmatprep.subr.bf16.mxu1 %v8046_v2  ;;  %v8050_v51 = vpack.c.bf16 %v6272_v44, %v6271_v16  ;;  %v6282_v16 = vld [vmem:[%s11739_s4 + $0x468] sm:$0xff]  ;;  %v3981_v44 = vld [vmem:[#allocation2 + $0x78] sm:$0xff] }
 0x24d   : > { %7477 = vmatmul.mubr.f32.gmra.mrb[16].mxu1 %v3650_v3  ;;  %v6275_v3 = vld [vmem:[%s11739_s4 + $0x430] sm:$0xff] }
 0x24e   : > { %7479 = vmatprep.mubr.msk.f32.mxu1 %vm9349_vm11, %v3651_v26  ;;  %v6276_v26 = vld [vmem:[%s11739_s4 + $0x438] sm:$0xff]  ;;  %vm11946_vm11 = vnez %v11899_v0 }
 0x251   : > { %7480 = vmatmul.mubr.f32.gmra.mrb[18].mxu1 %v3652_v59  ;;  %v3975_v59 = vld [vmem:[#allocation2 + $0x48] sm:$0xff] }
 0x252   : > { %7482 = vmatprep.mubr.msk.f32.mxu1 %vm9365_vm12, %v3653_v8  ;;  %v8058_v8 = vpack.c.bf16 %v6276_v26, %v6275_v3  ;;  %v3986_v3 = vld [vmem:[#allocation2 + $0xa0] sm:$0xff]  ;;  %v3987_v26 = vld [vmem:[#allocation2 + $0xa8] sm:$0xff]  ;;  %vm11947_vm12 = vnez %v11901_v12 }
 0x255   : > { %7483 = vmatmul.mubr.f32.gmra.mrb[20].mxu1 %v3654_v27  ;;  %v3976_v27 = vld [vmem:[#allocation2 + $0x50] sm:$0xff] }
 0x256   : > { %7485 = vmatprep.mubr.msk.f32.mxu1 %vm11937_vm2, %v3655_v62  ;;  %v6278_v62 = vld [vmem:[%s11739_s4 + $0x448] sm:$0xff]  ;;  %vm11948_vm2 = vnez %v11903_v40 }
 0x259   : > { %7486 = vmatmul.mubr.f32.gmra.mrb[22].mxu1 %v3656_v35  ;;  %v3977_v35 = vld [vmem:[#allocation2 + $0x58] sm:$0xff] }
 0x25a   : > { %7488 = vmatprep.mubr.msk.f32.mxu1 %vm11938_vm3, %v3657_v54 }
 0x25d   : > { %7489 = vmatmul.mubr.f32.gmra.mrb[24].mxu1 %v3658_v52  ;;  %v3978_v52 = vld [vmem:[#allocation2 + $0x60] sm:$0xff] }
 0x25e   : > { %7491 = vmatprep.mubr.msk.f32.mxu1 %vm11939_vm4, %v3659_v47  ;;  %v6279_v47 = vld [vmem:[%s11739_s4 + $0x450] sm:$0xff] }
 0x261   : > { %7492 = vmatmul.mubr.f32.gmra.mrb[26].mxu1 %v3660_v30  ;;  %v6280_v30 = vld [vmem:[%s11739_s4 + $0x458] sm:$0xff] }
 0x262   : > { %7494 = vmatprep.mubr.msk.f32.mxu1 %vm11940_vm5, %v3661_v9  ;;  %v3979_v9 = vld [vmem:[#allocation2 + $0x68] sm:$0xff] }
 0x265   : > { %7495 = vmatmul.mubr.f32.gmra.mrb[28].mxu1 %v3662_v61  ;;  %v8066_v61 = vpack.c.bf16 %v6280_v30, %v6279_v47 }
 0x266   : > { %7497 = vmatprep.mubr.msk.f32.mxu1 %vm11941_vm6, %v3663_v15  ;;  %v3980_v15 = vld [vmem:[#allocation2 + $0x70] sm:$0xff] }
 0x269   : > { %7498 = vmatmul.mubr.f32.gmra.mrb[30].mxu1 %v3664_v14  ;;  %v6281_v14 = vld [vmem:[%s11739_s4 + $0x460] sm:$0xff] }
 0x26a   : > { %7532 = vmatprep.mubr.f32.mxu1 %v3971_v25  ;;  %v8070_v25 = vpack.c.bf16 %v6282_v16, %v6281_v14 }
 0x26d   : > { %7533 = vmatmul.mubr.f32.vlgmr.msra.gmra.mrb[0].mxu1 %v3972_v5  ;;  %v6283_v5 = vld [vmem:[%s11739_s4 + $0x470] sm:$0xff] }
 0x26e   : > { %8049 = vmatpush3.bf16.msra.mxu1 %v8046_v2  ;;  %7535 = vmatprep.mubr.f32.mxu1 %v3973_v17  ;;  %v6277_v2 = vld [vmem:[%s11739_s4 + $0x440] sm:$0xff]  ;;  %v8074_v17 = vpack.c.bf16 %v6284_v58, %v6283_v5  ;;  %v4903_v58 = vld [vmem:[%s11742_s7 + $0x8] sm:$0xff] }
 0x26f   : > { %8051 = vmatprep.subr.bf16.mxu1 %v8050_v51  ;;  %v8062_v54 = vpack.c.bf16 %v6278_v62, %v6277_v2  ;;  %v3991_v2 = vld [vmem:[#allocation2 + $0xc8] sm:$0xff]  ;;  %v3992_v62 = vld [vmem:[#allocation2 + $0xd0] sm:$0xff] }
 0x271   : > { %7536 = vmatmul.mubr.f32.gmra.mrb[2].mxu1 %v3974_v24  ;;  %v3985_v24 = vld [vmem:[#allocation2 + $0x98] sm:$0xff] }
 0x272   : > { %7538 = vmatprep.mubr.f32.mxu1 %v3975_v59  ;;  %8053 = vmatpush3.bf16.msra.mxu1 %v8050_v51  ;;  %v3982_v51 = vld [vmem:[#allocation2 + $0x80] sm:$0xff]  ;;  %v3988_v59 = vld [vmem:[#allocation2 + $0xb0] sm:$0xff] }
 0x273   : > { %8055 = vmatprep.subr.bf16.mxu1 %v8054_v39 }
 0x275   : > { %7539 = vmatmul.mubr.f32.gmra.mrb[4].mxu1 %v3976_v27  ;;  %v3990_v27 = vld [vmem:[#allocation2 + $0xc0] sm:$0xff] }
 0x276   : > { %7541 = vmatprep.mubr.f32.mxu1 %v3977_v35  ;;  %8057 = vmatpush3.bf16.msra.mxu1 %v8054_v39  ;;  %v3984_v39 = vld [vmem:[#allocation2 + $0x90] sm:$0xff]  ;;  %v3993_v35 = vld [vmem:[#allocation2 + $0xd8] sm:$0xff] }
 0x277   : > { %8059 = vmatprep.subr.bf16.mxu1 %v8058_v8 }
 0x279   : > { %7542 = vmatmul.mubr.f32.gmra.mrb[6].mxu1 %v3978_v52  ;;  %v4307_v52 = vld [vmem:[#allocation2 + $0x119] sm:$0xff] }
 0x27a   : > { %7544 = vmatprep.mubr.f32.mxu1 %v3979_v9  ;;  %8061 = vmatpush3.bf16.msra.mxu1 %v8058_v8  ;;  %v3989_v8 = vld [vmem:[#allocation2 + $0xb8] sm:$0xff] }
 0x27b   : > { %8063 = vmatprep.subr.bf16.mxu1 %v8062_v54 }
 0x27d   : > { %7545 = vmatmul.mubr.f32.gmra.mrb[8].mxu1 %v3980_v15 }
 0x27e   : > { %7547 = vmatprep.mubr.f32.mxu1 %v3981_v44  ;;  %8065 = vmatpush3.bf16.msra.mxu1 %v8062_v54  ;;  %v8383_v54 = vld [vmem:[#allocation2 + $0x8] sm:$0xff] }
 0x27f   : > { %8067 = vmatprep.subr.bf16.mxu1 %v8066_v61 }
 0x281   : > { %7548 = vmatmul.mubr.f32.gmra.mrb[10].mxu1 %v3982_v51 }
 0x282   : > { %7550 = vmatprep.mubr.f32.mxu1 %v3983_v33  ;;  %8069 = vmatpush3.bf16.msra.mxu1 %v8066_v61  ;;  %v4308_v61 = vld [vmem:[#allocation2 + $0x121] sm:$0xff] }
 0x283   : > { %8071 = vmatprep.subr.bf16.mxu1 %v8070_v25 }
 0x285   : > { %7551 = vmatmul.mubr.f32.gmra.mrb[12].mxu1 %v3984_v39  ;;  %v4905_v39 = vld [vmem:[%s11742_s7 + $0x18] sm:$0xff] }
 0x286   : > { %7553 = vmatprep.mubr.f32.mxu1 %v3985_v24  ;;  %8073 = vmatpush3.bf16.msra.mxu1 %v8070_v25 }
 0x287   : > { %8075 = vmatprep.subr.bf16.mxu1 %v8074_v17 }
 0x289   : > { %7554 = vmatmul.mubr.f32.gmra.mrb[14].mxu1 %v3986_v3  ;;  %v4906_v3 = vld [vmem:[%s11742_s7 + $0x20] sm:$0xff] }
 0x28a   : > { %7556 = vmatprep.mubr.f32.mxu1 %v3987_v26  ;;  %8077 = vmatpush3.bf16.msra.mxu1 %v8074_v17  ;;  %v4904_v17 = vld [vmem:[%s11742_s7 + $0x10] sm:$0xff]  ;;  %v4907_v26 = vld [vmem:[%s11742_s7 + $0x28] sm:$0xff] }
 0x28b   : > { %v8082_v24 = vpack.c.bf16 %v4905_v39, %v4904_v17 }
 0x28d   : > { %7557 = vmatmul.mubr.f32.gmra.mrb[16].mxu1 %v3988_v59  ;;  %v4908_v59 = vld [vmem:[%s11742_s7 + $0x30] sm:$0xff] }
 0x28e   : > { %7559 = vmatprep.mubr.f32.mxu1 %v3989_v8  ;;  %v8086_v8 = vpack.c.bf16 %v4907_v26, %v4906_v3 }
 0x291   : > { %7560 = vmatmul.mubr.f32.gmra.mrb[18].mxu1 %v3990_v27  ;;  %v4909_v27 = vld [vmem:[%s11742_s7 + $0x38] sm:$0xff] }
 0x292   : > { %7562 = vmatprep.mubr.f32.mxu1 %v3991_v2  ;;  %v8090_v2 = vpack.c.bf16 %v4909_v27, %v4908_v59 }
 0x295   : > { %7563 = vmatmul.mubr.f32.gmra.mrb[20].mxu1 %v3992_v62  ;;  %v4910_v62 = vld [vmem:[%s11742_s7 + $0x40] sm:$0xff] }
 0x296   : > { %7565 = vmatprep.mubr.f32.mxu1 %v3993_v35  ;;  %v4911_v35 = vld [vmem:[%s11742_s7 + $0x48] sm:$0xff] }
 0x299   : > { %7566 = vmatmul.mubr.f32.gmra.mrb[22].mxu1 %v9633_v28 }
 0x29a   : > { %7568 = vmatprep.mubr.f32.mxu1 %v9636_v23 }
 0x29d   : > { %7569 = vmatmul.mubr.f32.gmra.mrb[24].mxu1 %v9645_v1 }
 0x29e   : > { %7571 = vmatprep.mubr.f32.mxu1 %v9648_v38 }
 0x2a1   : > { %7572 = vmatmul.mubr.f32.gmra.mrb[26].mxu1 %v9658_v50 }
 0x2a2   : > { %7574 = vmatprep.mubr.f32.mxu1 %v9661_v7 }
 0x2a5   : > { %7575 = vmatmul.mubr.f32.gmra.mrb[28].mxu1 %v9674_v63 }
 0x2a6   : > { %7577 = vmatprep.mubr.f32.mxu1 %v8383_v54 }
 0x2a9   : > { %7578 = vmatmul.mubr.f32.gmra.mrb[30].mxu1 %v8383_v54  ;;  %v8094_v54 = vpack.c.bf16 %v4911_v35, %v4910_v62 }
 0x2aa   : > { %7612 = vmatprep.mubr.f32.mxu1 %v9665_v13 }
 0x2ad   : > { %7613 = vmatmul.mubr.msk.f32.vlgmr.msra.gmra.mrb[0].mxu1 %vm11942_vm7, %v9676_v32  ;;  %v11949_v32 = vld [vmem:[#allocation4_spill] sm:$0xff] }
 0x2ae   : > { %7615 = vmatprep.mubr.f32.mxu1 %v9688_v4  ;;  %vm11950_vm3 = vnez %v11949_v32  ;;  %v4912_v32 = vld [vmem:[%s11742_s7 + $0x50] sm:$0xff] }
 0x2b1   : > { %7616 = vmatmul.mubr.msk.f32.gmra.mrb[2].mxu1 %vm11943_vm8, %v9696_v10 }
 0x2b2   : > { %7618 = vmatprep.mubr.f32.mxu1 %v9711_v60  ;;  %v11952_v60 = vld [vmem:[#allocation5_spill] sm:$0xff] }
 0x2b3   : > { %vm11953_vm4 = vnez %v11952_v60 }
 0x2b4   : > { %v10106_v28 = vpop.f32.mrb[32].mxu0 }
 0x2b5   : > { %7619 = vmatmul.mubr.msk.f32.gmra.mrb[4].mxu1 %vm11944_vm9, %v9719_v22  ;;  %v10111_v23 = vpop.f32.mrb[33].mxu0 }
 0x2b6   : > { %7621 = vmatprep.mubr.f32.mxu1 %v9734_v42  ;;  %v11954_v42 = vld [vmem:[#allocation14_spill] sm:$0xff] }
 0x2b7   : > { %vm11955_vm5 = vnez %v11954_v42  ;;  %v4914_v42 = vld [vmem:[%s11742_s7 + $0x60] sm:$0xff] }
 0x2b8   : > { %v10114_v45 = vpop.f32.mrb[34].mxu0 }
 0x2b9   : > { %7622 = vmatmul.mubr.msk.f32.gmra.mrb[6].mxu1 %vm11945_vm10, %v9742_v41  ;;  %v10119_v1 = vpop.f32.mrb[35].mxu0 }
 0x2ba   : > { %7624 = vmatprep.mubr.f32.mxu1 %v9757_v31  ;;  %v11956_v31 = vld [vmem:[#allocation15_spill] sm:$0xff] }
 0x2bb   : > { %vm11957_vm6 = vnez %v11956_v31  ;;  %v4915_v31 = vld [vmem:[%s11742_s7 + $0x68] sm:$0xff] }
 0x2bc   : > { %v10122_v38 = vpop.f32.mrb[36].mxu0 }
 0x2bd   : > { %7625 = vmatmul.mubr.msk.f32.gmra.mrb[8].mxu1 %vm11946_vm11, %v9765_v21  ;;  %v10127_v19 = vpop.f32.mrb[37].mxu0 }
 0x2be   : > { %7627 = vmatprep.mubr.f32.mxu1 %v9773_v36  ;;  %v8102_v36 = vpack.c.bf16 %v4915_v31, %v4914_v42 }
 0x2c0   : > { %v10130_v50 = vpop.f32.mrb[38].mxu0 }
 0x2c1   : > { %7628 = vmatmul.mubr.msk.f32.gmra.mrb[10].mxu1 %vm11947_vm12, %v9788_v34  ;;  %v10135_v7 = vpop.f32.mrb[39].mxu0 }
 0x2c2   : > { %7630 = vmatprep.mubr.f32.mxu1 %v9796_v18  ;;  %v11959_v18 = vld [vmem:[#allocation17_spill] sm:$0xff] }
 0x2c4   : > { %v10138_v13 = vpop.f32.mrb[40].mxu0 }
 0x2c5   : > { %7631 = vmatmul.mubr.msk.f32.gmra.mrb[12].mxu1 %vm11948_vm2, %v9811_v20  ;;  %v10143_v46 = vpop.f32.mrb[41].mxu0 }
 0x2c6   : > { %7633 = vmatprep.mubr.f32.mxu1 %v9819_v11  ;;  %v11960_v11 = vld [vmem:[#allocation10_spill] sm:$0xff] }
 0x2c8   : > { %v10146_v63 = vpop.f32.mrb[42].mxu0 }
 0x2c9   : > { %7634 = vmatmul.mubr.msk.f32.gmra.mrb[14].mxu1 %vm11950_vm3, %v9834_v55  ;;  %v10151_v4 = vpop.f32.mrb[43].mxu0 }
 0x2ca   : > { %7636 = vmatprep.mubr.f32.mxu1 %v11951_v29  ;;  %v4913_v29 = vld [vmem:[%s11742_s7 + $0x58] sm:$0xff] }
 0x2cb   : > { %v8098_v60 = vpack.c.bf16 %v4913_v29, %v4912_v32 }
 0x2cc   : > { %v10154_v10 = vpop.f32.mrb[44].mxu0 }
 0x2cd   : > { %7637 = vmatmul.mubr.msk.f32.gmra.mrb[16].mxu1 %vm11953_vm4, %v9857_v57  ;;  %v10159_v0 = vpop.f32.mrb[45].mxu0 }
 0x2ce   : > { %7639 = vmatprep.mubr.f32.mxu1 %v9867_v43  ;;  %v11962_v43 = vld [vmem:[#allocation18_spill] sm:$0xff] }
 0x2d0   : > { %v10162_v22 = vpop.f32.mrb[46].mxu0 }
 0x2d1   : > { %7640 = vmatmul.mubr.msk.f32.gmra.mrb[18].mxu1 %vm11955_vm5, %v9876_v48  ;;  %v10167_v12 = vpop.f32.mrb[47].mxu0  ;;  %v11963_v48 = vld [vmem:[#allocation19_spill] sm:$0xff] }
 0x2d2   : > { %7642 = vmatprep.mubr.f32.mxu1 %v9885_v6 }
 0x2d4   : > { %v10170_v41 = vpop.f32.mrb[48].mxu0 }
 0x2d5   : > { %7643 = vmatmul.mubr.msk.f32.gmra.mrb[20].mxu1 %vm11957_vm6, %v9894_v37  ;;  %v10175_v40 = vpop.f32.mrb[49].mxu0  ;;  %v11965_v37 = vld [vmem:[#allocation3_spill] sm:$0xff] }
 0x2d6   : > { %7645 = vmatprep.mubr.f32.mxu1 %v9902_v49 }
 0x2d8   : > { %v10178_v21 = vpop.f32.mrb[50].mxu0 }
 0x2d9   : > { %7646 = vmatmul.mubr.msk.f32.gmra.mrb[22].mxu1 %vm9871_vm0, %v9911_v56  ;;  %v10183_v34 = vpop.f32.mrb[51].mxu0  ;;  %vm11968_vm0 = vcmask 1043456  }
 0x2da   : > { %7648 = vmatprep.mubr.f32.mxu1 %v11959_v18  ;;  %v4916_v18 = vld [vmem:[%s11742_s7 + $0x70] sm:$0xff] }
 0x2dc   : > { %v10186_v20 = vpop.f32.mrb[52].mxu0 }
 0x2dd   : > { %7649 = vmatmul.mubr.msk.f32.gmra.mrb[24].mxu1 %vm9889_vm15, %v11960_v11  ;;  %v10191_v57 = vpop.f32.mrb[53].mxu0  ;;  %v4917_v11 = vld [vmem:[%s11742_s7 + $0x78] sm:$0xff] }
 0x2de   : > { %7651 = vmatprep.mubr.f32.mxu1 %v11962_v43 }
 0x2e0   : > { %v10194_v49 = vpop.f32.mrb[54].mxu0 }
 0x2e1   : > { %7652 = vmatmul.mubr.msk.f32.gmra.mrb[26].mxu1 %vm9906_vm14, %v11963_v48  ;;  %v10199_v56 = vpop.f32.mrb[55].mxu0 }
 0x2e2   : > { %7654 = vmatprep.mubr.f32.mxu1 %v11965_v37  ;;  %v8106_v37 = vpack.c.bf16 %v4917_v11, %v4916_v18 }
 0x2e4   : > { %v10202_v47 = vpop.f32.mrb[56].mxu0 }
 0x2e5   : > { %7655 = vmatmul.mubr.msk.f32.gmra.mrb[28].mxu1 %vm9923_vm13, %v9962_v53  ;;  %v10207_v9 = vpop.f32.mrb[57].mxu0  ;;  %v4902_v53 = vld [vmem:[%s11742_s7] sm:$0xff]  ;;  %vm11970_vm13 = vcmask 31744  }
 0x2e6   : > { %7657 = vmatprep.mubr.f32.mxu1 %v4307_v52  ;;  %v8078_v33 = vpack.c.bf16 %v4903_v58, %v4902_v53  ;;  %v10292_v58 = vld [vmem:[%s11745_s10] sm:$0xf]  ;;  %vm11971_vm14 = vmmov %vm11970_vm13 }
 0x2e7   : > { %vm11972_vm15 = vmmov %vm11970_vm13 }
 0x2e8   : > { %v10209_v15 = vpop.f32.mrb[58].mxu0  ;;  %8079 = vmatprep.subr.bf16.mxu0 %v8078_v33  ;;  %vm11973_vm7 = vmmov %vm11970_vm13 }
 0x2e9   : > { %7658 = vmatmul.mubr.msk.f32.gmra.mrb[30].mxu1 %vm9939_vm1, %v4308_v61  ;;  %v10213_v16 = vpop.f32.mrb[59].mxu0  ;;  %8081 = vmatpush3.bf16.msra.mxu0 %v8078_v33  ;;  %vm11969_vm1 = vmmov %vm11968_vm0 }
 0x2ea   : > { %8083 = vmatprep.subr.bf16.mxu0 %v8082_v24  ;;  %vm11974_vm8 = vmmov %vm11973_vm7 }
 0x2eb   : > { %vm11975_vm9 = vmmov %vm11973_vm7 }
 0x2ec   : > { %v10215_v44 = vpop.f32.mrb[60].mxu0  ;;  %vm11976_vm10 = vmmov %vm11973_vm7 }
 0x2ed   : > { %v10217_v25 = vpop.f32.mrb[61].mxu0  ;;  %8085 = vmatpush3.bf16.msra.mxu0 %v8082_v24  ;;  %vm11977_vm11 = vmmov %vm11973_vm7 }
 0x2ee   : > { %8087 = vmatprep.subr.bf16.mxu0 %v8086_v8  ;;  %vm11978_vm12 = vmmov %vm11973_vm7 }
 0x2ef   : > { %vm11979_vm2 = vmmov %vm11973_vm7 }
 0x2f0   : > { %v10219_v51 = vpop.f32.mrb[62].mxu0  ;;  %vm11980_vm3 = vmmov %vm11979_vm2 }
 0x2f1   : > { %v10221_v5 = vpop.f32.mrb[63].mxu0  ;;  %8089 = vmatpush3.bf16.msra.mxu0 %v8086_v8  ;;  %vm11981_vm4 = vmmov %vm11979_vm2 }
 0x2f2   : > { %8091 = vmatprep.subr.bf16.mxu0 %v8090_v2  ;;  %vm11982_vm5 = vmmov %vm11979_vm2 }
 0x2f3   : > { %vm11983_vm6 = vmmov %vm11979_vm2 }
 0x2f5   : > { %8093 = vmatpush3.bf16.msra.mxu0 %v8090_v2 }
 0x2f6   : > { %8095 = vmatprep.subr.bf16.mxu0 %v8094_v54 }
 0x2f9   : > { %8097 = vmatpush3.bf16.msra.mxu0 %v8094_v54 }
 0x2fa   : > { %8099 = vmatprep.subr.bf16.mxu0 %v8098_v60 }
 0x2fd   : > { %8101 = vmatpush3.bf16.msra.mxu0 %v8098_v60 }
 0x2fe   : > { %8103 = vmatprep.subr.bf16.mxu0 %v8102_v36 }
 0x301   : > { %8105 = vmatpush3.bf16.msra.mxu0 %v8102_v36 }
 0x302   : > { %8107 = vmatprep.subr.bf16.mxu0 %v8106_v37 }
 0x305   : > { %8109 = vmatpush3.bf16.msra.mxu0 %v8106_v37 }
 0x306   : > { %7740 = vmatprep.subr.msk.mxu0 %vm11968_vm0, %v10292_v58  ;;  %vm11984_vm0 = vmmov %vm11979_vm2 }
 0x380   : > { %v7614_v55 = vpop.f32.mrb[0].mxu1 }
 0x381   : > { %v10272_v43 = vadd.f32 %v7614_v55, %v10106_v28  ;;  %v4424_v48 = vpop.f32.mrb[1].mxu1 }
 0x382   : > { %v10275_v6 = vadd.f32 %v4424_v48, %v10111_v23 }
 0x383   : > { %v4653_v52 = vmul.f32 %v10272_v43, %v10272_v43 }
 0x384   : > { %v4652_v30 = vmul.f32 %v10275_v6, %v10275_v6  ;;  %v7617_v61 = vpop.f32.mrb[2].mxu1  ;;  %v4615_v28 = vadd.f32 %v10275_v6, %v10272_v43 }
 0x385   : > { %v10282_v14 = vadd.f32 %v7617_v61, %v10114_v45  ;;  %v4434_v53 = vpop.f32.mrb[3].mxu1 }
 0x386   : > { %v10287_v23 = vadd.f32 %v4434_v53, %v10119_v1  ;;  %v4684_v33 = vadd.f32 %v4653_v52, %v4652_v30 }
 0x387   : > { %v4655_v1 = vmul.f32 %v10282_v14, %v10282_v14 }
 0x388   : > { %v4616_v17 = vadd.f32 %v10287_v23, %v4615_v28  ;;  %v4654_v45 = vmul.f32 %v10287_v23, %v10287_v23  ;;  %v7620_v39 = vpop.f32.mrb[4].mxu1 }
 0x389   : > { %v10298_v24 = vadd.f32 %v7620_v39, %v10122_v38  ;;  %v4444_v3 = vpop.f32.mrb[5].mxu1 }
 0x38a   : > { %v4685_v26 = vadd.f32 %v4684_v33, %v4654_v45  ;;  %v10303_v59 = vadd.f32 %v4444_v3, %v10127_v19  ;;  %v4617_v8 = vadd.f32 %v10282_v14, %v4616_v17 }
 0x38b   : > { %v4657_v19 = vmul.f32 %v10298_v24, %v10298_v24 }
 0x38c   : > { %v4618_v27 = vadd.f32 %v10303_v59, %v4617_v8  ;;  %v4656_v38 = vmul.f32 %v10303_v59, %v10303_v59  ;;  %v4686_v2 = vadd.f32 %v4685_v26, %v4655_v1  ;;  %v7623_v62 = vpop.f32.mrb[6].mxu1 }
 0x38d   : > { %v10312_v35 = vadd.f32 %v7623_v62, %v10130_v50  ;;  %v4454_v54 = vpop.f32.mrb[7].mxu1 }
 0x38e   : > { %v4687_v32 = vadd.f32 %v4686_v2, %v4656_v38  ;;  %v10317_v29 = vadd.f32 %v4454_v54, %v10135_v7  ;;  %v4619_v60 = vadd.f32 %v10298_v24, %v4618_v27 }
 0x38f   : > { %v4659_v55 = vmul.f32 %v10312_v35, %v10312_v35 }
 0x390   : > { %v4620_v42 = vadd.f32 %v10317_v29, %v4619_v60  ;;  %v4658_v31 = vmul.f32 %v10317_v29, %v10317_v29  ;;  %v4688_v36 = vadd.f32 %v4687_v32, %v4657_v19  ;;  %v7626_v18 = vpop.f32.mrb[8].mxu1 }
 0x391   : > { %v10324_v50 = vadd.f32 %v7626_v18, %v10138_v13  ;;  %v4464_v11 = vpop.f32.mrb[9].mxu1 }
 0x392   : > { %v4689_v48 = vadd.f32 %v4688_v36, %v4658_v31  ;;  %v10329_v7 = vadd.f32 %v4464_v11, %v10143_v46  ;;  %v4621_v37 = vadd.f32 %v10312_v35, %v4620_v42 }
 0x393   : > { %v4661_v33 = vmul.f32 %v10324_v50, %v10324_v50 }
 0x394   : > { %v4622_v52 = vadd.f32 %v10329_v7, %v4621_v37  ;;  %v4660_v30 = vmul.f32 %v10329_v7, %v10329_v7  ;;  %v4690_v61 = vadd.f32 %v4689_v48, %v4659_v55  ;;  %v7629_v53 = vpop.f32.mrb[10].mxu1 }
 0x395   : > { %v10336_v13 = vadd.f32 %v7629_v53, %v10146_v63  ;;  %v4474_v28 = vpop.f32.mrb[11].mxu1 }
 0x396   : > { %v4691_v17 = vadd.f32 %v4690_v61, %v4660_v30  ;;  %v10341_v46 = vadd.f32 %v4474_v28, %v10151_v4  ;;  %v4623_v45 = vadd.f32 %v10324_v50, %v4622_v52 }
 0x397   : > { %v4663_v27 = vmul.f32 %v10336_v13, %v10336_v13 }
 0x398   : > { %v4624_v39 = vadd.f32 %v10341_v46, %v4623_v45  ;;  %v4662_v3 = vmul.f32 %v10341_v46, %v10341_v46  ;;  %v4692_v1 = vadd.f32 %v4691_v17, %v4661_v33  ;;  %v7632_v26 = vpop.f32.mrb[12].mxu1 }
 0x399   : > { %v10348_v63 = vadd.f32 %v7632_v26, %v10154_v10  ;;  %v4484_v8 = vpop.f32.mrb[13].mxu1 }
 0x39a   : > { %v4693_v38 = vadd.f32 %v4692_v1, %v4662_v3  ;;  %v10353_v4 = vadd.f32 %v4484_v8, %v10159_v0  ;;  %v4625_v2 = vadd.f32 %v10336_v13, %v4624_v39 }
 0x39b   : > { %v4665_v42 = vmul.f32 %v10348_v63, %v10348_v63 }
 0x39c   : > { %v4626_v62 = vadd.f32 %v10353_v4, %v4625_v2  ;;  %v4664_v54 = vmul.f32 %v10353_v4, %v10353_v4  ;;  %v4694_v19 = vadd.f32 %v4693_v38, %v4663_v27  ;;  %v7635_v32 = vpop.f32.mrb[14].mxu1 }
 0x39d   : > { %v10360_v10 = vadd.f32 %v7635_v32, %v10162_v22  ;;  %v4494_v60 = vpop.f32.mrb[15].mxu1 }
 0x39e   : > { %v4695_v31 = vadd.f32 %v4694_v19, %v4664_v54  ;;  %v10365_v0 = vadd.f32 %v4494_v60, %v10167_v12  ;;  %v4627_v36 = vadd.f32 %v10348_v63, %v4626_v62 }
 0x39f   : > { %v4667_v52 = vmul.f32 %v10360_v10, %v10360_v10 }
 0x3a0   : > { %v4628_v18 = vadd.f32 %v10365_v0, %v4627_v36  ;;  %v4666_v11 = vmul.f32 %v10365_v0, %v10365_v0  ;;  %v4696_v55 = vadd.f32 %v4695_v31, %v4665_v42  ;;  %v7638_v48 = vpop.f32.mrb[16].mxu1 }
 0x3a1   : > { %v10372_v22 = vadd.f32 %v7638_v48, %v10170_v41  ;;  %v4504_v37 = vpop.f32.mrb[17].mxu1 }
 0x3a2   : > { %v4697_v30 = vadd.f32 %v4696_v55, %v4666_v11  ;;  %v10377_v12 = vadd.f32 %v4504_v37, %v10175_v40  ;;  %v4629_v61 = vadd.f32 %v10360_v10, %v4628_v18 }
 0x3a3   : > { %v4669_v39 = vmul.f32 %v10372_v22, %v10372_v22 }
 0x3a4   : > { %v4630_v53 = vadd.f32 %v10377_v12, %v4629_v61  ;;  %v4668_v28 = vmul.f32 %v10377_v12, %v10377_v12  ;;  %v4698_v33 = vadd.f32 %v4697_v30, %v4667_v52  ;;  %v7641_v17 = vpop.f32.mrb[18].mxu1 }
 0x3a5   : > { %v10384_v41 = vadd.f32 %v7641_v17, %v10178_v21  ;;  %v4514_v45 = vpop.f32.mrb[19].mxu1 }
 0x3a6   : > { %v4699_v3 = vadd.f32 %v4698_v33, %v4668_v28  ;;  %v10389_v40 = vadd.f32 %v4514_v45, %v10183_v34  ;;  %v4631_v1 = vadd.f32 %v10372_v22, %v4630_v53 }
 0x3a7   : > { %v4671_v62 = vmul.f32 %v10384_v41, %v10384_v41 }
 0x3a8   : > { %v4632_v26 = vadd.f32 %v10389_v40, %v4631_v1  ;;  %v4670_v8 = vmul.f32 %v10389_v40, %v10389_v40  ;;  %v4700_v27 = vadd.f32 %v4699_v3, %v4669_v39  ;;  %v7644_v38 = vpop.f32.mrb[20].mxu1 }
 0x3a9   : > { %v10396_v21 = vadd.f32 %v7644_v38, %v10186_v20  ;;  %v4524_v2 = vpop.f32.mrb[21].mxu1 }
 0x3aa   : > { %v4701_v54 = vadd.f32 %v4700_v27, %v4670_v8  ;;  %v10401_v34 = vadd.f32 %v4524_v2, %v10191_v57  ;;  %v4633_v19 = vadd.f32 %v10384_v41, %v4632_v26 }
 0x3ab   : > { %v4673_v18 = vmul.f32 %v10396_v21, %v10396_v21 }
 0x3ac   : > { %v4634_v32 = vadd.f32 %v10401_v34, %v4633_v19  ;;  %v4672_v60 = vmul.f32 %v10401_v34, %v10401_v34  ;;  %v4702_v42 = vadd.f32 %v4701_v54, %v4671_v62  ;;  %v7647_v31 = vpop.f32.mrb[22].mxu1 }
 0x3ad   : > { %v10408_v20 = vadd.f32 %v7647_v31, %v10194_v49  ;;  %v4534_v36 = vpop.f32.mrb[23].mxu1 }
 0x3ae   : > { %v4703_v11 = vadd.f32 %v4702_v42, %v4672_v60  ;;  %v10413_v57 = vadd.f32 %v4534_v36, %v10199_v56  ;;  %v4635_v55 = vadd.f32 %v10396_v21, %v4634_v32 }
 0x3af   : > { %v4675_v53 = vmul.f32 %v10408_v20, %v10408_v20 }
 0x3b0   : > { %v4636_v48 = vadd.f32 %v10413_v57, %v4635_v55  ;;  %v4674_v37 = vmul.f32 %v10413_v57, %v10413_v57  ;;  %v4704_v52 = vadd.f32 %v4703_v11, %v4673_v18  ;;  %v7650_v30 = vpop.f32.mrb[24].mxu1 }
 0x3b1   : > { %v10420_v49 = vadd.f32 %v7650_v30, %v10202_v47  ;;  %v4544_v61 = vpop.f32.mrb[25].mxu1 }
 0x3b2   : > { %v4705_v28 = vadd.f32 %v4704_v52, %v4674_v37  ;;  %v10425_v56 = vadd.f32 %v4544_v61, %v10207_v9  ;;  %v4637_v33 = vadd.f32 %v10408_v20, %v4636_v48 }
 0x3b3   : > { %v4677_v26 = vmul.f32 %v10420_v49, %v10420_v49 }
 0x3b4   : > { %v4638_v17 = vadd.f32 %v10425_v56, %v4637_v33  ;;  %v4676_v45 = vmul.f32 %v10425_v56, %v10425_v56  ;;  %v4706_v39 = vadd.f32 %v4705_v28, %v4675_v53  ;;  %v7653_v3 = vpop.f32.mrb[26].mxu1 }
 0x3b5   : > { %v10432_v47 = vadd.f32 %v7653_v3, %v10209_v15  ;;  %v4554_v1 = vpop.f32.mrb[27].mxu1 }
 0x3b6   : > { %v4707_v8 = vadd.f32 %v4706_v39, %v4676_v45  ;;  %v10437_v9 = vadd.f32 %v4554_v1, %v10213_v16  ;;  %v4639_v27 = vadd.f32 %v10420_v49, %v4638_v17 }
 0x3b7   : > { %v4679_v32 = vmul.f32 %v10432_v47, %v10432_v47 }
 0x3b8   : > { %v4640_v38 = vadd.f32 %v10437_v9, %v4639_v27  ;;  %v4678_v2 = vmul.f32 %v10437_v9, %v10437_v9  ;;  %v4708_v62 = vadd.f32 %v4707_v8, %v4677_v26  ;;  %v7656_v54 = vpop.f32.mrb[28].mxu1 }
 0x3b9   : > { %v10444_v15 = vadd.f32 %v7656_v54, %v10215_v44  ;;  %v4564_v19 = vpop.f32.mrb[29].mxu1 }
 0x3ba   : > { %v4709_v60 = vadd.f32 %v4708_v62, %v4678_v2  ;;  %v10449_v16 = vadd.f32 %v4564_v19, %v10217_v25  ;;  %v4641_v42 = vadd.f32 %v10432_v47, %v4640_v38 }
 0x3bb   : > { %v4681_v48 = vmul.f32 %v10444_v15, %v10444_v15 }
 0x3bc   : > { %v4642_v31 = vadd.f32 %v10449_v16, %v4641_v42  ;;  %v4680_v36 = vmul.f32 %v10449_v16, %v10449_v16  ;;  %v4710_v18 = vadd.f32 %v4709_v60, %v4679_v32  ;;  %v7659_v11 = vpop.f32.mrb[30].mxu1 }
 0x3bd   : > { %v10456_v44 = vadd.f32 %v7659_v11, %v10219_v51  ;;  %v4574_v55 = vpop.f32.mrb[31].mxu1 }
 0x3be   : > { %v4711_v37 = vadd.f32 %v4710_v18, %v4680_v36  ;;  %v8141_v25 = vadd.f32 %v4574_v55, %v10221_v5  ;;  %v4643_v52 = vadd.f32 %v10444_v15, %v4642_v31 }
 0x3bf   : > { %v4683_v28 = vmul.f32 %v10456_v44, %v10456_v44 }
 0x3c0   : > { %v4644_v30 = vadd.f32 %v8141_v25, %v4643_v52  ;;  %v4682_v61 = vmul.f32 %v8141_v25, %v8141_v25  ;;  %v4712_v53 = vadd.f32 %v4711_v37, %v4681_v48 }
 0x3c2   : > { %v4645_v33 = vadd.f32 %v10456_v44, %v4644_v30  ;;  %v4713_v17 = vadd.f32 %v4712_v53, %v4682_v61 }
 0x3c4   : > { %v4646_v51 = vrot.slane %v4645_v33, 4  ;;  %v4714_v45 = vadd.f32 %v4713_v17, %v4683_v28 }
 0x3c6   : > { %v4647_v39 = vadd.f32 %v4646_v51, %v4645_v33  ;;  %v4715_v3 = vrot.slane %v4714_v45, 4 }
 0x3c8   : > { %v4648_v1 = vrot.slane %v4647_v39, 2  ;;  %v4716_v26 = vadd.f32 %v4715_v3, %v4714_v45 }
 0x3ca   : > { %v4649_v8 = vadd.f32 %v4648_v1, %v4647_v39  ;;  %v4717_v27 = vrot.slane %v4716_v26, 2 }
 0x3cc   : > { %v4650_v5 = vrot.slane %v4649_v8, 1  ;;  %v4718_v38 = vadd.f32 %v4717_v27, %v4716_v26 }
 0x3ce   : > { %v4651_v2 = vadd.f32 %v4650_v5, %v4649_v8  ;;  %v4719_v62 = vrot.slane %v4718_v38, 1 }
 0x3d0   : > { %v4720_v54 = vadd.f32 %v4719_v62, %v4718_v38  ;;  %v10465_v19 = vmul.f32 0.00390625, %v4651_v2  ;;  %v10549_v38 = vld [vmem:[%s11740_s5] ss:$0 sm:$0xff] }
 0x3d2   : > { %v4722_v32 = vmul.f32 0.00390625, %v4720_v54  ;;  %v4723_v60 = vmul.f32 %v10465_v19, %v10465_v19  ;;  %v4756_v42 = vsub.f32 %v8141_v25, %v10465_v19  ;;  %v4736_v36 = vsub.f32 %v10341_v46, %v10465_v19 }
 0x3d3   : > { %v4737_v18 = vsub.f32 %v10336_v13, %v10465_v19  ;;  %v4738_v55 = vsub.f32 %v10353_v4, %v10465_v19  ;;  %v4739_v48 = vsub.f32 %v10348_v63, %v10465_v19  ;;  %v4740_v37 = vsub.f32 %v10365_v0, %v10465_v19 }
 0x3d4   : > { %v4724_v31 = vsub.f32 %v4722_v32, %v4723_v60  ;;  %v4741_v25 = vsub.f32 %v10360_v10, %v10465_v19  ;;  %v4742_v52 = vsub.f32 %v10377_v12, %v10465_v19  ;;  %v4743_v46 = vsub.f32 %v10372_v22, %v10465_v19 }
 0x3d5   : > { %v4744_v13 = vsub.f32 %v10389_v40, %v10465_v19  ;;  %v4745_v4 = vsub.f32 %v10384_v41, %v10465_v19  ;;  %v4746_v63 = vsub.f32 %v10401_v34, %v10465_v19  ;;  %v4747_v0 = vsub.f32 %v10396_v21, %v10465_v19 }
 0x3d6   : > { %v4725_v11 = vmax.f32 %v4724_v31, 0.0  ;;  %v4748_v10 = vsub.f32 %v10413_v57, %v10465_v19  ;;  %v4749_v12 = vsub.f32 %v10408_v20, %v10465_v19  ;;  %v4750_v22 = vsub.f32 %v10425_v56, %v10465_v19 }
 0x3d7   : > { %v4751_v40 = vsub.f32 %v10420_v49, %v10465_v19  ;;  %v4752_v41 = vsub.f32 %v10437_v9, %v10465_v19  ;;  %v4753_v34 = vsub.f32 %v10432_v47, %v10465_v19  ;;  %v4754_v21 = vsub.f32 %v10449_v16, %v10465_v19 }
 0x3d8   : > { %v4758_v30 = vadd.f32 1e-05, %v4725_v11  ;;  %v4755_v57 = vsub.f32 %v10444_v15, %v10465_v19  ;;  %v4757_v20 = vsub.f32 %v10456_v44, %v10465_v19  ;;  %v4726_v56 = vsub.f32 %v10275_v6, %v10465_v19 }
 0x3d9   : > { %v4727_v49 = vsub.f32 %v10272_v43, %v10465_v19  ;;  %v4728_v9 = vsub.f32 %v10287_v23, %v10465_v19  ;;  %v4729_v47 = vsub.f32 %v10282_v14, %v10465_v19  ;;  %v4730_v16 = vsub.f32 %v10303_v59, %v10465_v19 }
 0x3da   : > { %8377 = vrsqrt.f32 %v4758_v30  ;;  %v4731_v15 = vsub.f32 %v10298_v24, %v10465_v19  ;;  %v4732_v44 = vsub.f32 %v10317_v29, %v10465_v19  ;;  %v4733_v6 = vsub.f32 %v10312_v35, %v10465_v19 }
 0x3db   : > { %v4734_v43 = vsub.f32 %v10329_v7, %v10465_v19  ;;  %v4735_v23 = vsub.f32 %v10324_v50, %v10465_v19 }
 0x3e4   : > { %v8378_v61 = vpop.eup %8377 }
 0x3e5   : > { %v10532_v14 = vmul.f32 %v8378_v61, %v4756_v42  ;;  %v4760_v53 = vmul.f32 %v8378_v61, %v4726_v56  ;;  %v4761_v59 = vmul.f32 %v8378_v61, %v4727_v49  ;;  %v4762_v28 = vmul.f32 %v8378_v61, %v4728_v9 }
 0x3e6   : > { %v4763_v33 = vmul.f32 %v8378_v61, %v4729_v47  ;;  %v4764_v24 = vmul.f32 %v8378_v61, %v4730_v16  ;;  %v4765_v17 = vmul.f32 %v8378_v61, %v4731_v15  ;;  %v4766_v51 = vmul.f32 %v8378_v61, %v4732_v44 }
 0x3e7   : > { %v4767_v45 = vmul.f32 %v8378_v61, %v4733_v6  ;;  %v4768_v29 = vmul.f32 %v8378_v61, %v4734_v43  ;;  %v4769_v39 = vmul.f32 %v8378_v61, %v4735_v23  ;;  %v4770_v3 = vmul.f32 %v8378_v61, %v4736_v36  ;;  %v10570_v36 = vld [vmem:[%s11741_s6] ss:$0 sm:$0xff] }
 0x3e8   : > { %v4771_v35 = vmul.f32 %v8378_v61, %v4737_v18  ;;  %v4772_v1 = vmul.f32 %v8378_v61, %v4738_v55  ;;  %v10534_v26 = vmul.f32 %v8378_v61, %v4739_v48  ;;  %v10536_v7 = vmul.f32 %v8378_v61, %v4740_v37 }
 0x3e9   : > { %v10538_v50 = vmul.f32 %v8378_v61, %v4741_v25  ;;  %v10540_v8 = vmul.f32 %v8378_v61, %v4742_v52  ;;  %v10542_v27 = vmul.f32 %v8378_v61, %v4743_v46  ;;  %v10544_v5 = vmul.f32 %v8378_v61, %v4744_v13 }
 0x3ea   : > { %v10551_v2 = vmul.f32 %v8378_v61, %v4745_v4  ;;  %v10553_v62 = vmul.f32 %v8378_v61, %v4746_v63  ;;  %v10555_v54 = vmul.f32 %v8378_v61, %v4747_v0  ;;  %v10557_v19 = vmul.f32 %v8378_v61, %v4748_v10 }
 0x3eb   : > { %v10559_v32 = vmul.f32 %v8378_v61, %v4749_v12  ;;  %v10561_v60 = vmul.f32 %v8378_v61, %v4750_v22  ;;  %v10563_v42 = vmul.f32 %v8378_v61, %v4751_v40  ;;  %v10565_v31 = vmul.f32 %v8378_v61, %v4752_v41 }
 0x3ec   : > { %v10572_v18 = vmul.f32 %v8378_v61, %v4753_v34  ;;  %v10574_v11 = vmul.f32 %v8378_v61, %v4754_v21  ;;  %v10576_v55 = vmul.f32 %v8378_v61, %v4755_v57  ;;  %v10578_v48 = vmul.f32 %v8378_v61, %v4757_v20 }
 0x3ed   : > { %v4800_v37 = vmul.f32 %v10549_v38, %v4761_v59  ;;  %v4799_v25 = vmul.f32 %v10549_v38, %v4760_v53  ;;  %v4801_v52 = vmul.f32 %v10549_v38, %v4762_v28  ;;  %v4802_v46 = vmul.f32 %v10549_v38, %v4763_v33 }
 0x3ee   : > { %v4803_v63 = vmul.f32 %v10549_v38, %v4764_v24  ;;  %v4804_v22 = vmul.f32 %v10549_v38, %v4765_v17  ;;  %v4805_v34 = vmul.f32 %v10549_v38, %v4766_v51  ;;  %v4806_v20 = vmul.f32 %v10549_v38, %v4767_v45 }
 0x3ef   : > { %v4839_v13 = vadd.f32 %v10570_v36, %v4800_v37  ;;  %v4838_v30 = vadd.f32 %v10570_v36, %v4799_v25  ;;  %v4840_v4 = vadd.f32 %v10570_v36, %v4801_v52  ;;  %v4841_v12 = vadd.f32 %v10570_v36, %v4802_v46 }
 0x3f0   : > { %v4842_v41 = vadd.f32 %v10570_v36, %v4803_v63  ;;  %v4843_v57 = vadd.f32 %v10570_v36, %v4804_v22  ;;  %v4844_v49 = vadd.f32 %v10570_v36, %v4805_v34  ;;  %v4807_v9 = vmul.f32 %v10549_v38, %v4768_v29 }
 0x3f1   : > { %v4871_v0 = vmax.f32 %v4839_v13, 0.0  ;;  %v4870_v10 = vmax.f32 %v4838_v30, 0.0  ;;  %v4872_v40 = vmax.f32 %v4840_v4, 0.0  ;;  %v4873_v21 = vmax.f32 %v4841_v12, 0.0 }
 0x3f2   : > { %v4874_v56 = vmax.f32 %v4842_v41, 0.0  ;;  %v4875_v47 = vmax.f32 %v4843_v57, 0.0  ;;  %v4845_v16 = vadd.f32 %v10570_v36, %v4806_v20  ;;  %v4808_v15 = vmul.f32 %v10549_v38, %v4769_v39 }
 0x3f3   : > { %7692 = vmatprep.mubr.f32.mxu0 %v4870_v10  ;;  %v4876_v61 = vmax.f32 %v4844_v49, 0.0  ;;  %v4809_v44 = vmul.f32 %v10549_v38, %v4770_v3  ;;  %v4810_v23 = vmul.f32 %v10549_v38, %v4771_v35  ;;  %v4811_v28 = vmul.f32 %v10549_v38, %v4772_v1 }
 0x3f4   : > { %7693 = vmatmul.mubr.f32.vlgmr.msra.gmra.mrb[64].mxu0 %v4871_v0  ;;  %v4877_v6 = vmax.f32 %v4845_v16, 0.0  ;;  %v4847_v43 = vadd.f32 %v10570_v36, %v4808_v15  ;;  %v4812_v17 = vmul.f32 %v10549_v38, %v10534_v26  ;;  %v4813_v29 = vmul.f32 %v10549_v38, %v10536_v7 }
 0x3f5   : > { %7741 = vmatpush3.msk.msra.mxu0 %vm11969_vm1, %v10292_v58  ;;  %7695 = vmatprep.mubr.f32.mxu0 %v4872_v40  ;;  %v4846_v58 = vadd.f32 %v10570_v36, %v4807_v9  ;;  %v4848_v59 = vadd.f32 %v10570_v36, %v4809_v44  ;;  %v4849_v24 = vadd.f32 %v10570_v36, %v4810_v23  ;;  %vm11985_vm1 = vmmov %vm11984_vm0 }
 0x3f6   : > { %v4879_v33 = vmax.f32 %v4847_v43, 0.0  ;;  %v4850_v45 = vadd.f32 %v10570_v36, %v4811_v28  ;;  %v4851_v3 = vadd.f32 %v10570_v36, %v4812_v17  ;;  %v4814_v35 = vmul.f32 %v10549_v38, %v10538_v50  ;;  %v8386_v17 = vld [vmem:[%s8516_s15 + $0x10] sm:$0xff] }
 0x3f7   : > { %v4878_v53 = vmax.f32 %v4846_v58, 0.0  ;;  %v4880_v51 = vmax.f32 %v4848_v59, 0.0  ;;  %v4881_v39 = vmax.f32 %v4849_v24, 0.0  ;;  %v4852_v37 = vadd.f32 %v10570_v36, %v4813_v29  ;;  %v8390_v29 = vld [vmem:[%s8516_s15 + $0x30] sm:$0xff] }
 0x3f8   : > { %7696 = vmatmul.mubr.f32.gmra.mrb[66].mxu0 %v4873_v21  ;;  %v4882_v1 = vmax.f32 %v4850_v45, 0.0  ;;  %v4815_v26 = vmul.f32 %v10549_v38, %v10540_v8  ;;  %v4883_v25 = vmax.f32 %v4851_v3, 0.0  ;;  %v4853_v52 = vadd.f32 %v10570_v36, %v4814_v35  ;;  %v8389_v45 = vld [vmem:[%s8516_s15 + $0x28] sm:$0xff]  ;;  %v8392_v3 = vld [vmem:[%s8516_s15 + $0x40] sm:$0xff] }
 0x3f9   : > { %7698 = vmatprep.mubr.f32.mxu0 %v4874_v56  ;;  %v4816_v7 = vmul.f32 %v10549_v38, %v10542_v27  ;;  %v4884_v46 = vmax.f32 %v4852_v37, 0.0  ;;  %v4817_v50 = vmul.f32 %v10549_v38, %v10544_v5  ;;  %v4818_v8 = vmul.f32 %v10549_v38, %v10551_v2  ;;  %v8393_v35 = vld [vmem:[%s8516_s15 + $0x48] sm:$0xff]  ;;  %v8395_v37 = vld [vmem:[%s8516_s15 + $0x58] sm:$0xff] }
 0x3fa   : > { %v4854_v13 = vadd.f32 %v10570_v36, %v4815_v26  ;;  %v4885_v30 = vmax.f32 %v4853_v52, 0.0  ;;  %v4819_v27 = vmul.f32 %v10549_v38, %v10553_v62  ;;  %v4820_v5 = vmul.f32 %v10549_v38, %v10555_v54  ;;  %v8396_v26 = vld [vmem:[%s8516_s15 + $0x60] sm:$0xff]  ;;  %v8398_v52 = vld [vmem:[%s8516_s15 + $0x70] sm:$0xff] }
 0x3fb   : > { %v4855_v4 = vadd.f32 %v10570_v36, %v4816_v7  ;;  %v4856_v0 = vadd.f32 %v10570_v36, %v4817_v50  ;;  %v4857_v12 = vadd.f32 %v10570_v36, %v4818_v8  ;;  %v4821_v2 = vmul.f32 %v10549_v38, %v10557_v19  ;;  %v8399_v7 = vld [vmem:[%s8516_s15 + $0x78] sm:$0xff]  ;;  %v8402_v50 = vld [vmem:[%s8516_s15 + $0x90] sm:$0xff]  ;;  %v8405_v8 = vld [vmem:[%s8516_s15 + $0xa8] sm:$0xff] }
 0x3fc   : > { %7699 = vmatmul.mubr.f32.gmra.mrb[68].mxu0 %v4875_v47  ;;  %v4886_v63 = vmax.f32 %v4854_v13, 0.0  ;;  %v4858_v40 = vadd.f32 %v10570_v36, %v4819_v27  ;;  %v4859_v34 = vadd.f32 %v10570_v36, %v4820_v5  ;;  %v4822_v62 = vmul.f32 %v10549_v38, %v10559_v32  ;;  %v8401_v13 = vld [vmem:[%s8516_s15 + $0x88] sm:$0xff]  ;;  %v8408_v27 = vld [vmem:[%s8516_s15 + $0xc0] sm:$0xff]  ;;  %v8411_v5 = vld [vmem:[%s8516_s15 + $0xd8] sm:$0xff] }
 0x3fd   : > { %7701 = vmatprep.mubr.f32.mxu0 %v4876_v61  ;;  %v4887_v10 = vmax.f32 %v4855_v4, 0.0  ;;  %v4888_v22 = vmax.f32 %v4856_v0, 0.0  ;;  %v4889_v41 = vmax.f32 %v4857_v12, 0.0  ;;  %v4860_v57 = vadd.f32 %v10570_v36, %v4821_v2  ;;  %v8404_v4 = vld [vmem:[%s8516_s15 + $0xa0] sm:$0xff]  ;;  %v8407_v0 = vld [vmem:[%s8516_s15 + $0xb8] sm:$0xff]  ;;  %v8410_v12 = vld [vmem:[%s8516_s15 + $0xd0] sm:$0xff] }
 0x3fe   : > { %v4890_v21 = vmax.f32 %v4858_v40, 0.0  ;;  %v4823_v54 = vmul.f32 %v10549_v38, %v10561_v60  ;;  %v4891_v20 = vmax.f32 %v4859_v34, 0.0  ;;  %v4861_v56 = vadd.f32 %v10570_v36, %v4822_v62  ;;  %v8413_v40 = vld [vmem:[%s8516_s15 + $0xe8] sm:$0xff]  ;;  %v8414_v2 = vld [vmem:[%s8516_s15 + $0xf0] sm:$0xff] }
 0x3ff   : > { %v4824_v19 = vmul.f32 %v10549_v38, %v10563_v42  ;;  %v4892_v49 = vmax.f32 %v4860_v57, 0.0  ;;  %v4825_v32 = vmul.f32 %v10549_v38, %v10565_v31  ;;  %v4826_v60 = vmul.f32 %v10549_v38, %v10572_v18 }
 0x400   : > { %7702 = vmatmul.mubr.f32.gmra.mrb[70].mxu0 %v4877_v6  ;;  %v4862_v9 = vadd.f32 %v10570_v36, %v4823_v54  ;;  %v4893_v47 = vmax.f32 %v4861_v56, 0.0  ;;  %v4827_v42 = vmul.f32 %v10549_v38, %v10574_v11  ;;  %v4828_v31 = vmul.f32 %v10549_v38, %v10576_v55 }
 0x401   : > { %7704 = vmatprep.mubr.f32.mxu0 %v4878_v53  ;;  %v4863_v16 = vadd.f32 %v10570_v36, %v4824_v19  ;;  %v4864_v61 = vadd.f32 %v10570_v36, %v4825_v32  ;;  %v4865_v44 = vadd.f32 %v10570_v36, %v4826_v60  ;;  %v4829_v18 = vmul.f32 %v10549_v38, %v10532_v14 }
 0x402   : > { %v4894_v15 = vmax.f32 %v4862_v9, 0.0  ;;  %v4866_v43 = vadd.f32 %v10570_v36, %v4827_v42  ;;  %v4867_v11 = vadd.f32 %v10570_v36, %v4828_v31  ;;  %v4830_v53 = vmul.f32 %v10549_v38, %v10578_v48  ;;  %v8384_v38 = vld [vmem:[%s8516_s15] sm:$0xff]  ;;  %v8385_v48 = vld [vmem:[%s8516_s15 + $0x8] sm:$0xff] }
 0x403   : > { %v4895_v58 = vmax.f32 %v4863_v16, 0.0  ;;  %v4896_v6 = vmax.f32 %v4864_v61, 0.0  ;;  %v4897_v23 = vmax.f32 %v4865_v44, 0.0  ;;  %v4868_v55 = vadd.f32 %v10570_v36, %v4829_v18 }
 0x404   : > { %7705 = vmatmul.mubr.f32.gmra.mrb[72].mxu0 %v4879_v33  ;;  %v4898_v59 = vmax.f32 %v4866_v43, 0.0  ;;  %v4899_v28 = vmax.f32 %v4867_v11, 0.0  ;;  %v4869_v14 = vadd.f32 %v10570_v36, %v4830_v53  ;;  %v8387_v36 = vld [vmem:[%s8516_s15 + $0x18] sm:$0xff] }
 0x405   : > { %7707 = vmatprep.mubr.f32.mxu0 %v4880_v51  ;;  %v4900_v33 = vmax.f32 %v4868_v55, 0.0  ;;  %v8388_v51 = vld [vmem:[%s8516_s15 + $0x20] sm:$0xff] }
 0x406   : > { %v4901_v24 = vmax.f32 %v4869_v14, 0.0 }
 0x408   : > { %7708 = vmatmul.mubr.f32.gmra.mrb[74].mxu0 %v4881_v39  ;;  %v8391_v39 = vld [vmem:[%s8516_s15 + $0x38] sm:$0xff] }
 0x409   : > { %7710 = vmatprep.mubr.f32.mxu0 %v4882_v1  ;;  %v8394_v1 = vld [vmem:[%s8516_s15 + $0x50] sm:$0xff] }
 0x40c   : > { %7711 = vmatmul.mubr.f32.gmra.mrb[76].mxu0 %v4883_v25  ;;  %v8397_v25 = vld [vmem:[%s8516_s15 + $0x68] sm:$0xff] }
 0x40d   : > { %7713 = vmatprep.mubr.f32.mxu0 %v4884_v46  ;;  %v8400_v46 = vld [vmem:[%s8516_s15 + $0x80] sm:$0xff] }
 0x410   : > { %7714 = vmatmul.mubr.f32.gmra.mrb[78].mxu0 %v4885_v30  ;;  %v8403_v30 = vld [vmem:[%s8516_s15 + $0x98] sm:$0xff] }
 0x411   : > { %7716 = vmatprep.mubr.f32.mxu0 %v4886_v63  ;;  %v8406_v63 = vld [vmem:[%s8516_s15 + $0xb0] sm:$0xff] }
 0x414   : > { %7717 = vmatmul.mubr.f32.gmra.mrb[80].mxu0 %v4887_v10  ;;  %v8409_v10 = vld [vmem:[%s8516_s15 + $0xc8] sm:$0xff] }
 0x415   : > { %7719 = vmatprep.mubr.f32.mxu0 %v4888_v22  ;;  %v8412_v22 = vld [vmem:[%s8516_s15 + $0xe0] sm:$0xff] }
 0x418   : > { %7720 = vmatmul.mubr.f32.gmra.mrb[82].mxu0 %v4889_v41  ;;  %v8415_v41 = vld [vmem:[%s8516_s15 + $0xf8] sm:$0xff] }
 0x419   : > { %7722 = vmatprep.mubr.f32.mxu0 %v4890_v21 }
 0x41c   : > { %7723 = vmatmul.mubr.f32.gmra.mrb[84].mxu0 %v4891_v20 }
 0x41d   : > { %7725 = vmatprep.mubr.f32.mxu0 %v4892_v49 }
 0x420   : > { %7726 = vmatmul.mubr.f32.gmra.mrb[86].mxu0 %v4893_v47 }
 0x421   : > { %7728 = vmatprep.mubr.f32.mxu0 %v4894_v15 }
 0x424   : > { %7729 = vmatmul.mubr.f32.gmra.mrb[88].mxu0 %v4895_v58 }
 0x425   : > { %7731 = vmatprep.mubr.f32.mxu0 %v4896_v6 }
 0x428   : > { %7732 = vmatmul.mubr.f32.gmra.mrb[90].mxu0 %v4897_v23 }
 0x429   : > { %7734 = vmatprep.mubr.f32.mxu0 %v4898_v59 }
 0x42c   : > { %7735 = vmatmul.mubr.f32.gmra.mrb[92].mxu0 %v4899_v28 }
 0x42d   : > { %7737 = vmatprep.mubr.f32.mxu0 %v4900_v33 }
 0x430   : > { %7738 = vmatmul.mubr.f32.gmra.mrb[94].mxu0 %v4901_v24 }
 0x431   : > { %7742 = vmatprep.mubr.msk.f32.mxu0 %vm11970_vm13, %v8384_v38  ;;  %vm11986_vm13 = vmmov %vm11984_vm0 }
 0x434   : > { %7743 = vmatmul.mubr.msk.f32.vlgmr.msra.gmra.mrb[96].mxu0 %vm11971_vm14, %v8385_v48  ;;  %vm11987_vm14 = vmmov %vm11984_vm0 }
 0x435   : > { %7745 = vmatprep.mubr.msk.f32.mxu0 %vm11972_vm15, %v8386_v17  ;;  %vm11988_vm15 = vmmov %vm11984_vm0 }
 0x438   : > { %7746 = vmatmul.mubr.msk.f32.gmra.mrb[98].mxu0 %vm11973_vm7, %v8387_v36  ;;  %vm11989_vm7 = vmmov %vm11984_vm0 }
 0x439   : > { %7748 = vmatprep.mubr.msk.f32.mxu0 %vm11974_vm8, %v8388_v51  ;;  %vm11990_vm8 = vmmov %vm11984_vm0 }
 0x43c   : > { %7749 = vmatmul.mubr.msk.f32.gmra.mrb[100].mxu0 %vm11975_vm9, %v8389_v45  ;;  %vm11991_vm9 = vmmov %vm11984_vm0 }
 0x43d   : > { %7751 = vmatprep.mubr.msk.f32.mxu0 %vm11976_vm10, %v8390_v29  ;;  %vm11992_vm10 = vmmov %vm11984_vm0 }
 0x440   : > { %7752 = vmatmul.mubr.msk.f32.gmra.mrb[102].mxu0 %vm11977_vm11, %v8391_v39  ;;  %vm11993_vm11 = vmmov %vm11984_vm0 }
 0x441   : > { %7754 = vmatprep.mubr.msk.f32.mxu0 %vm11978_vm12, %v8392_v3  ;;  %vm11994_vm12 = vmmov %vm11984_vm0 }
 0x444   : > { %7755 = vmatmul.mubr.msk.f32.gmra.mrb[104].mxu0 %vm11979_vm2, %v8393_v35  ;;  %vm11995_vm2 = vmmov %vm11984_vm0 }
 0x445   : > { %7757 = vmatprep.mubr.msk.f32.mxu0 %vm11980_vm3, %v8394_v1  ;;  %vm11996_vm3 = vmmov %vm11984_vm0 }
 0x448   : > { %7758 = vmatmul.mubr.msk.f32.gmra.mrb[106].mxu0 %vm11981_vm4, %v8395_v37  ;;  %vm11997_vm4 = vmmov %vm11984_vm0 }
 0x449   : > { %7760 = vmatprep.mubr.msk.f32.mxu0 %vm11982_vm5, %v8396_v26  ;;  %vm11998_vm5 = vmmov %vm11984_vm0 }
 0x44c   : > { %7761 = vmatmul.mubr.msk.f32.gmra.mrb[108].mxu0 %vm11983_vm6, %v8397_v25  ;;  %vm11999_vm6 = vmmov %vm11984_vm0 }
 0x44d   : > { %7763 = vmatprep.mubr.msk.f32.mxu0 %vm11984_vm0, %v8398_v52 }
 0x450   : > { %7764 = vmatmul.mubr.msk.f32.gmra.mrb[110].mxu0 %vm11985_vm1, %v8399_v7  ;;  %vm12000_vm1 = vmmov %vm11984_vm0 }
 0x451   : > { %7766 = vmatprep.mubr.msk.f32.mxu0 %vm11986_vm13, %v8400_v46 }
 0x454   : > { %7767 = vmatmul.mubr.msk.f32.gmra.mrb[112].mxu0 %vm11987_vm14, %v8401_v13 }
 0x455   : > { %7769 = vmatprep.mubr.msk.f32.mxu0 %vm11988_vm15, %v8402_v50 }
 0x458   : > { %7770 = vmatmul.mubr.msk.f32.gmra.mrb[114].mxu0 %vm11989_vm7, %v8403_v30 }
 0x459   : > { %7772 = vmatprep.mubr.msk.f32.mxu0 %vm11990_vm8, %v8404_v4 }
 0x45c   : > { %7773 = vmatmul.mubr.msk.f32.gmra.mrb[116].mxu0 %vm11991_vm9, %v8405_v8 }
 0x45d   : > { %7775 = vmatprep.mubr.msk.f32.mxu0 %vm11992_vm10, %v8406_v63 }
 0x460   : > { %7776 = vmatmul.mubr.msk.f32.gmra.mrb[118].mxu0 %vm11993_vm11, %v8407_v0 }
 0x461   : > { %7778 = vmatprep.mubr.msk.f32.mxu0 %vm11994_vm12, %v8408_v27 }
 0x464   : > { %7779 = vmatmul.mubr.msk.f32.gmra.mrb[120].mxu0 %vm11995_vm2, %v8409_v10 }
 0x465   : > { %7781 = vmatprep.mubr.msk.f32.mxu0 %vm11996_vm3, %v8410_v12 }
 0x468   : > { %7782 = vmatmul.mubr.msk.f32.gmra.mrb[122].mxu0 %vm11997_vm4, %v8411_v5 }
 0x469   : > { %7784 = vmatprep.mubr.msk.f32.mxu0 %vm11998_vm5, %v8412_v22 }
 0x46c   : > { %7785 = vmatmul.mubr.msk.f32.gmra.mrb[124].mxu0 %vm11999_vm6, %v8413_v40 }
 0x46d   : > { %7787 = vmatprep.mubr.msk.f32.mxu0 %vm11984_vm0, %v8414_v2 }
 0x470   : > { %7788 = vmatmul.mubr.msk.f32.gmra.mrb[126].mxu0 %vm12000_vm1, %v8415_v41 }
 0x4c7   : > { %v10729_v34 = vpop.f32.mrb[64].mxu0 }
 0x4c8   : > { %v5181_v62 = vmul.f32 %v10729_v34, %v10729_v34  ;;  %v10733_v21 = vpop.f32.mrb[65].mxu0 }
 0x4c9   : > { %v5143_v57 = vadd.f32 %v10729_v34, %v10733_v21  ;;  %v5180_v54 = vmul.f32 %v10733_v21, %v10733_v21 }
 0x4cb   : > { %v5212_v20 = vadd.f32 %v5181_v62, %v5180_v54  ;;  %v10739_v56 = vpop.f32.mrb[66].mxu0 }
 0x4cc   : > { %v10741_v19 = vpop.f32.mrb[67].mxu0  ;;  %v5183_v32 = vmul.f32 %v10739_v56, %v10739_v56 }
 0x4cd   : > { %v5144_v49 = vadd.f32 %v5143_v57, %v10741_v19  ;;  %v5182_v9 = vmul.f32 %v10741_v19, %v10741_v19 }
 0x4cf   : > { %v5213_v47 = vadd.f32 %v5212_v20, %v5182_v9  ;;  %v10748_v16 = vpop.f32.mrb[68].mxu0  ;;  %v5145_v60 = vadd.f32 %v10739_v56, %v5144_v49 }
 0x4d0   : > { %v10751_v15 = vpop.f32.mrb[69].mxu0  ;;  %v5185_v44 = vmul.f32 %v10748_v16, %v10748_v16 }
 0x4d1   : > { %v5146_v61 = vadd.f32 %v5145_v60, %v10751_v15  ;;  %v5184_v42 = vmul.f32 %v10751_v15, %v10751_v15  ;;  %v5214_v58 = vadd.f32 %v5213_v47, %v5183_v32 }
 0x4d3   : > { %v5215_v31 = vadd.f32 %v5214_v58, %v5184_v42  ;;  %v10758_v6 = vpop.f32.mrb[70].mxu0  ;;  %v5147_v43 = vadd.f32 %v10748_v16, %v5146_v61 }
 0x4d4   : > { %v10761_v18 = vpop.f32.mrb[71].mxu0  ;;  %v5187_v59 = vmul.f32 %v10758_v6, %v10758_v6 }
 0x4d5   : > { %v5148_v23 = vadd.f32 %v5147_v43, %v10761_v18  ;;  %v5186_v11 = vmul.f32 %v10761_v18, %v10761_v18  ;;  %v5216_v53 = vadd.f32 %v5215_v31, %v5185_v44 }
 0x4d7   : > { %v5217_v55 = vadd.f32 %v5216_v53, %v5186_v11  ;;  %v10768_v28 = vpop.f32.mrb[72].mxu0  ;;  %v5149_v14 = vadd.f32 %v10758_v6, %v5148_v23 }
 0x4d8   : > { %v10771_v33 = vpop.f32.mrb[73].mxu0  ;;  %v5189_v17 = vmul.f32 %v10768_v28, %v10768_v28 }
 0x4d9   : > { %v5150_v24 = vadd.f32 %v5149_v14, %v10771_v33  ;;  %v5188_v38 = vmul.f32 %v10771_v33, %v10771_v33  ;;  %v5218_v48 = vadd.f32 %v5217_v55, %v5187_v59 }
 0x4db   : > { %v5219_v36 = vadd.f32 %v5218_v48, %v5188_v38  ;;  %v10778_v51 = vpop.f32.mrb[74].mxu0  ;;  %v5151_v45 = vadd.f32 %v10768_v28, %v5150_v24 }
 0x4dc   : > { %v10781_v29 = vpop.f32.mrb[75].mxu0  ;;  %v5191_v1 = vmul.f32 %v10778_v51, %v10778_v51 }
 0x4dd   : > { %v5152_v39 = vadd.f32 %v5151_v45, %v10781_v29  ;;  %v5190_v3 = vmul.f32 %v10781_v29, %v10781_v29  ;;  %v5220_v35 = vadd.f32 %v5219_v36, %v5189_v17 }
 0x4df   : > { %v5221_v37 = vadd.f32 %v5220_v35, %v5190_v3  ;;  %v10788_v26 = vpop.f32.mrb[76].mxu0  ;;  %v5153_v25 = vadd.f32 %v10778_v51, %v5152_v39 }
 0x4e0   : > { %v10791_v52 = vpop.f32.mrb[77].mxu0  ;;  %v5193_v50 = vmul.f32 %v10788_v26, %v10788_v26 }
 0x4e1   : > { %v5154_v7 = vadd.f32 %v5153_v25, %v10791_v52  ;;  %v5192_v46 = vmul.f32 %v10791_v52, %v10791_v52  ;;  %v5222_v13 = vadd.f32 %v5221_v37, %v5191_v1 }
 0x4e3   : > { %v5223_v30 = vadd.f32 %v5222_v13, %v5192_v46  ;;  %v10798_v4 = vpop.f32.mrb[78].mxu0  ;;  %v5155_v8 = vadd.f32 %v10788_v26, %v5154_v7 }
 0x4e4   : > { %v10801_v63 = vpop.f32.mrb[79].mxu0  ;;  %v5195_v12 = vmul.f32 %v10798_v4, %v10798_v4 }
 0x4e5   : > { %v5156_v0 = vadd.f32 %v5155_v8, %v10801_v63  ;;  %v5194_v27 = vmul.f32 %v10801_v63, %v10801_v63  ;;  %v5224_v10 = vadd.f32 %v5223_v30, %v5193_v50 }
 0x4e7   : > { %v5225_v5 = vadd.f32 %v5224_v10, %v5194_v27  ;;  %v10808_v22 = vpop.f32.mrb[80].mxu0  ;;  %v5157_v40 = vadd.f32 %v10798_v4, %v5156_v0 }
 0x4e8   : > { %v10811_v2 = vpop.f32.mrb[81].mxu0  ;;  %v5197_v54 = vmul.f32 %v10808_v22, %v10808_v22 }
 0x4e9   : > { %v5158_v41 = vadd.f32 %v5157_v40, %v10811_v2  ;;  %v5196_v62 = vmul.f32 %v10811_v2, %v10811_v2  ;;  %v5226_v57 = vadd.f32 %v5225_v5, %v5195_v12 }
 0x4eb   : > { %v5227_v20 = vadd.f32 %v5226_v57, %v5196_v62  ;;  %v10818_v49 = vpop.f32.mrb[82].mxu0  ;;  %v5159_v9 = vadd.f32 %v10808_v22, %v5158_v41 }
 0x4ec   : > { %v10821_v32 = vpop.f32.mrb[83].mxu0  ;;  %v5199_v42 = vmul.f32 %v10818_v49, %v10818_v49 }
 0x4ed   : > { %v5160_v47 = vadd.f32 %v5159_v9, %v10821_v32  ;;  %v5198_v60 = vmul.f32 %v10821_v32, %v10821_v32  ;;  %v5228_v61 = vadd.f32 %v5227_v20, %v5197_v54 }
 0x4ef   : > { %v5229_v58 = vadd.f32 %v5228_v61, %v5198_v60  ;;  %v10828_v44 = vpop.f32.mrb[84].mxu0  ;;  %v5161_v31 = vadd.f32 %v10818_v49, %v5160_v47 }
 0x4f0   : > { %v10831_v43 = vpop.f32.mrb[85].mxu0  ;;  %v5201_v59 = vmul.f32 %v10828_v44, %v10828_v44 }
 0x4f1   : > { %v5162_v23 = vadd.f32 %v5161_v31, %v10831_v43  ;;  %v5200_v11 = vmul.f32 %v10831_v43, %v10831_v43  ;;  %v5230_v53 = vadd.f32 %v5229_v58, %v5199_v42 }
 0x4f3   : > { %v5231_v55 = vadd.f32 %v5230_v53, %v5200_v11  ;;  %v10838_v14 = vpop.f32.mrb[86].mxu0  ;;  %v5163_v24 = vadd.f32 %v10828_v44, %v5162_v23 }
 0x4f4   : > { %v10841_v38 = vpop.f32.mrb[87].mxu0  ;;  %v5203_v45 = vmul.f32 %v10838_v14, %v10838_v14 }
 0x4f5   : > { %v5164_v48 = vadd.f32 %v5163_v24, %v10841_v38  ;;  %v5202_v17 = vmul.f32 %v10841_v38, %v10841_v38  ;;  %v5232_v36 = vadd.f32 %v5231_v55, %v5201_v59 }
 0x4f7   : > { %v5233_v39 = vadd.f32 %v5232_v36, %v5202_v17  ;;  %v10848_v3 = vpop.f32.mrb[88].mxu0  ;;  %v5165_v35 = vadd.f32 %v10838_v14, %v5164_v48 }
 0x4f8   : > { %v10851_v1 = vpop.f32.mrb[89].mxu0  ;;  %v5205_v46 = vmul.f32 %v10848_v3, %v10848_v3 }
 0x4f9   : > { %v5166_v37 = vadd.f32 %v5165_v35, %v10851_v1  ;;  %v5204_v25 = vmul.f32 %v10851_v1, %v10851_v1  ;;  %v5234_v7 = vadd.f32 %v5233_v39, %v5203_v45 }
 0x4fb   : > { %v5235_v13 = vadd.f32 %v5234_v7, %v5204_v25  ;;  %v10858_v50 = vpop.f32.mrb[90].mxu0  ;;  %v5167_v30 = vadd.f32 %v10848_v3, %v5166_v37 }
 0x4fc   : > { %v10861_v8 = vpop.f32.mrb[91].mxu0  ;;  %v5207_v12 = vmul.f32 %v10858_v50, %v10858_v50 }
 0x4fd   : > { %v5168_v0 = vadd.f32 %v5167_v30, %v10861_v8  ;;  %v5206_v27 = vmul.f32 %v10861_v8, %v10861_v8  ;;  %v5236_v10 = vadd.f32 %v5235_v13, %v5205_v46 }
 0x4ff   : > { %v5237_v5 = vadd.f32 %v5236_v10, %v5206_v27  ;;  %v10868_v40 = vpop.f32.mrb[92].mxu0  ;;  %v5169_v41 = vadd.f32 %v10858_v50, %v5168_v0 }
 0x500   : > { %v10871_v62 = vpop.f32.mrb[93].mxu0  ;;  %v5209_v9 = vmul.f32 %v10868_v40, %v10868_v40 }
 0x501   : > { %v5170_v57 = vadd.f32 %v5169_v41, %v10871_v62  ;;  %v5208_v54 = vmul.f32 %v10871_v62, %v10871_v62  ;;  %v5238_v20 = vadd.f32 %v5237_v5, %v5207_v12 }
 0x503   : > { %v5239_v47 = vadd.f32 %v5238_v20, %v5208_v54  ;;  %v10878_v60 = vpop.f32.mrb[94].mxu0  ;;  %v5171_v61 = vadd.f32 %v10868_v40, %v5170_v57 }
 0x504   : > { %v10881_v42 = vpop.f32.mrb[95].mxu0  ;;  %v5211_v11 = vmul.f32 %v10878_v60, %v10878_v60 }
 0x505   : > { %v5172_v58 = vadd.f32 %v5171_v61, %v10881_v42  ;;  %v5210_v31 = vmul.f32 %v10881_v42, %v10881_v42  ;;  %v5240_v23 = vadd.f32 %v5239_v47, %v5209_v9 }
 0x507   : > { %v5173_v53 = vadd.f32 %v10878_v60, %v5172_v58  ;;  %v5241_v59 = vadd.f32 %v5240_v23, %v5210_v31  ;;  %v10889_v55 = vpop.f32.mrb[96].mxu0 }
 0x508   : > { %v5665_v24 = vmul.f32 %v10889_v55, %v10889_v55  ;;  %v10893_v48 = vpop.f32.mrb[97].mxu0 }
 0x509   : > { %v5174_v17 = vrot.slane %v5173_v53, 4  ;;  %v5242_v36 = vadd.f32 %v5241_v59, %v5211_v11  ;;  %v5627_v45 = vadd.f32 %v10889_v55, %v10893_v48  ;;  %v5664_v39 = vmul.f32 %v10893_v48, %v10893_v48 }
 0x50b   : > { %v5175_v35 = vadd.f32 %v5174_v17, %v5173_v53  ;;  %v5243_v37 = vrot.slane %v5242_v36, 4  ;;  %v5696_v25 = vadd.f32 %v5665_v24, %v5664_v39  ;;  %v10899_v7 = vpop.f32.mrb[98].mxu0 }
 0x50c   : > { %v10901_v46 = vpop.f32.mrb[99].mxu0  ;;  %v5667_v54 = vmul.f32 %v10899_v7, %v10899_v7 }
 0x50d   : > { %v5176_v13 = vrot.slane %v5175_v35, 2  ;;  %v5244_v30 = vadd.f32 %v5243_v37, %v5242_v36  ;;  %v5628_v0 = vadd.f32 %v5627_v45, %v10901_v46  ;;  %v5666_v27 = vmul.f32 %v10901_v46, %v10901_v46 }
 0x50f   : > { %v5177_v10 = vadd.f32 %v5176_v13, %v5175_v35  ;;  %v5245_v12 = vrot.slane %v5244_v30, 2  ;;  %v5697_v5 = vadd.f32 %v5696_v25, %v5666_v27  ;;  %v10906_v41 = vpop.f32.mrb[100].mxu0  ;;  %v5629_v57 = vadd.f32 %v10899_v7, %v5628_v0 }
 0x510   : > { %v10911_v20 = vpop.f32.mrb[101].mxu0  ;;  %v5669_v24 = vmul.f32 %v10906_v41, %v10906_v41 }
 0x511   : > { %v5178_v9 = vrot.slane %v5177_v10, 1  ;;  %v5246_v47 = vadd.f32 %v5245_v12, %v5244_v30  ;;  %v5630_v61 = vadd.f32 %v5629_v57, %v10911_v20  ;;  %v5668_v58 = vmul.f32 %v10911_v20, %v10911_v20 }
 0x512   : > { %v5698_v31 = vadd.f32 %v5697_v5, %v5667_v54 }
 0x513   : > { %v5179_v23 = vadd.f32 %v5178_v9, %v5177_v10  ;;  %v5247_v11 = vrot.slane %v5246_v47, 1  ;;  %v10916_v53 = vpop.f32.mrb[102].mxu0  ;;  %v5631_v59 = vadd.f32 %v10906_v41, %v5630_v61 }
 0x514   : > { %v5699_v17 = vadd.f32 %v5698_v31, %v5668_v58  ;;  %v10921_v36 = vpop.f32.mrb[103].mxu0  ;;  %v5671_v31 = vmul.f32 %v10916_v53, %v10916_v53 }
 0x515   : > { %v5248_v45 = vadd.f32 %v5247_v11, %v5246_v47  ;;  %v10923_v39 = vmul.f32 0.00390625, %v5179_v23  ;;  %v5632_v35 = vadd.f32 %v5631_v59, %v10921_v36  ;;  %v5670_v37 = vmul.f32 %v10921_v36, %v10921_v36 }
 0x516   : > { %v5700_v25 = vadd.f32 %v5699_v17, %v5669_v24 }
 0x517   : > { %v5250_v13 = vmul.f32 0.00390625, %v5248_v45  ;;  %v5251_v30 = vmul.f32 %v10923_v39, %v10923_v39  ;;  %v10934_v10 = vpop.f32.mrb[104].mxu0 }
 0x518   : > { %v10944_v9 = vpop.f32.mrb[105].mxu0  ;;  %v5701_v61 = vadd.f32 %v5700_v25, %v5670_v37 }
 0x519   : > { %v5252_v47 = vsub.f32 %v5250_v13, %v5251_v30  ;;  %v5633_v13 = vadd.f32 %v10916_v53, %v5632_v35  ;;  %v5672_v11 = vmul.f32 %v10944_v9, %v10944_v9 }
 0x51a   : > { %v5702_v30 = vadd.f32 %v5701_v61, %v5671_v31 }
 0x51b   : > { %v5253_v17 = vmax.f32 %v5252_v47, 0.0  ;;  %v10966_v23 = vpop.f32.mrb[106].mxu0  ;;  %v5634_v59 = vadd.f32 %v5633_v13, %v10944_v9 }
 0x51c   : > { %12001 = vst [vmem:[#allocation12_spill] sm:$0xff] %v10966_v23  ;;  %v10976_v24 = vpop.f32.mrb[107].mxu0  ;;  %v5703_v47 = vadd.f32 %v5702_v30, %v5672_v11  ;;  %v5675_v61 = vmul.f32 %v10966_v23, %v10966_v23 }
 0x51d   : > { %12002 = vst [vmem:[#allocation13_spill] sm:$0xff] %v10976_v24  ;;  %v5286_v45 = vadd.f32 1e-05, %v5253_v17  ;;  %v5673_v17 = vmul.f32 %v10934_v10, %v10934_v10  ;;  %v5635_v5 = vadd.f32 %v10934_v10, %v5634_v59  ;;  %v5674_v35 = vmul.f32 %v10976_v24, %v10976_v24 }
 0x51f   : > { %v11002_v58 = vpop.f32.mrb[108].mxu0  ;;  %8379 = vrsqrt.f32 %v5286_v45  ;;  %v5636_v25 = vadd.f32 %v5635_v5, %v10976_v24  ;;  %v5704_v12 = vadd.f32 %v5703_v47, %v5673_v17 }
 0x520   : > { %v11007_v54 = vpop.f32.mrb[109].mxu0 }
 0x521   : > { %v5705_v31 = vadd.f32 %v5704_v12, %v5674_v35  ;;  %v5637_v13 = vadd.f32 %v10966_v23, %v5636_v25  ;;  %v5676_v11 = vmul.f32 %v11007_v54, %v11007_v54  ;;  %v12003_v12 = vsub.f32 %v10733_v21, %v10923_v39 }
 0x522   : > { %v12004_v25 = vsub.f32 %v10729_v34, %v10923_v39  ;;  %v12007_v21 = vsub.f32 %v10751_v15, %v10923_v39  ;;  %v12008_v34 = vsub.f32 %v10748_v16, %v10923_v39  ;;  %v12011_v15 = vsub.f32 %v10771_v33, %v10923_v39 }
 0x523   : > { %v11012_v57 = vpop.f32.mrb[110].mxu0  ;;  %v5638_v30 = vadd.f32 %v5637_v13, %v11007_v54  ;;  %v5706_v27 = vadd.f32 %v5705_v31, %v5675_v61  ;;  %v12005_v61 = vsub.f32 %v10741_v19, %v10923_v39  ;;  %v12009_v19 = vsub.f32 %v10761_v18, %v10923_v39 }
 0x524   : > { %v11019_v37 = vpop.f32.mrb[111].mxu0  ;;  %v12012_v16 = vsub.f32 %v10768_v28, %v10923_v39  ;;  %v12013_v18 = vsub.f32 %v10781_v29, %v10923_v39  ;;  %v12015_v33 = vsub.f32 %v10791_v52, %v10923_v39  ;;  %v12016_v28 = vsub.f32 %v10788_v26, %v10923_v39 }
 0x525   : > { %v5707_v47 = vadd.f32 %v5706_v27, %v5676_v11  ;;  %v5639_v17 = vadd.f32 %v11002_v58, %v5638_v30  ;;  %v12006_v27 = vsub.f32 %v10739_v56, %v10923_v39  ;;  %v12010_v56 = vsub.f32 %v10758_v6, %v10923_v39 }
 0x526   : > { %v12014_v6 = vsub.f32 %v10778_v51, %v10923_v39  ;;  %v12017_v29 = vsub.f32 %v10801_v63, %v10923_v39  ;;  %v12018_v51 = vsub.f32 %v10798_v4, %v10923_v39  ;;  %v12019_v52 = vsub.f32 %v10811_v2, %v10923_v39 }
 0x527   : > { %v11022_v45 = vpop.f32.mrb[112].mxu0  ;;  %v12021_v26 = vsub.f32 %v10808_v22, %v10923_v39  ;;  %v12023_v63 = vsub.f32 %v10821_v32, %v10923_v39  ;;  %v12025_v4 = vsub.f32 %v10818_v49, %v10923_v39  ;;  %v12027_v2 = vsub.f32 %v10831_v43, %v10923_v39 }
 0x528   : > { %v11029_v59 = vpop.f32.mrb[113].mxu0  ;;  %v12029_v22 = vsub.f32 %v10828_v44, %v10923_v39  ;;  %v12031_v32 = vsub.f32 %v10841_v38, %v10923_v39  ;;  %v12033_v49 = vsub.f32 %v10838_v14, %v10923_v39  ;;  %v12035_v43 = vsub.f32 %v10851_v1, %v10923_v39 }
 0x529   : > { %v8380_v5 = vpop.eup %8379  ;;  %v12037_v44 = vsub.f32 %v10848_v3, %v10923_v39  ;;  %v12039_v38 = vsub.f32 %v10861_v8, %v10923_v39  ;;  %v12041_v14 = vsub.f32 %v10858_v50, %v10923_v39  ;;  %v12044_v1 = vsub.f32 %v10871_v62, %v10923_v39 }
 0x52a   : > { %v11040_v35 = vmul.f32 %v8380_v5, %v12003_v12  ;;  %v11045_v23 = vmul.f32 %v8380_v5, %v12004_v25  ;;  %v11050_v31 = vmul.f32 %v8380_v5, %v12005_v61  ;;  %v11055_v13 = vmul.f32 %v8380_v5, %v12006_v27 }
 0x52b   : > { %v11032_v0 = vpop.f32.mrb[114].mxu0  ;;  %v11060_v11 = vmul.f32 %v8380_v5, %v12007_v21  ;;  %v11065_v30 = vmul.f32 %v8380_v5, %v12008_v34  ;;  %v11070_v12 = vmul.f32 %v8380_v5, %v12009_v19  ;;  %v11075_v25 = vmul.f32 %v8380_v5, %v12010_v56 }
 0x52c   : > { %v11035_v24 = vpop.f32.mrb[115].mxu0  ;;  %v11080_v61 = vmul.f32 %v8380_v5, %v12011_v15  ;;  %v11085_v27 = vmul.f32 %v8380_v5, %v12012_v16  ;;  %v11090_v21 = vmul.f32 %v8380_v5, %v12013_v18  ;;  %v11095_v34 = vmul.f32 %v8380_v5, %v12014_v6 }
 0x52d   : > { %v11102_v56 = vmul.f32 %v8380_v5, %v12015_v33  ;;  %v11107_v15 = vmul.f32 %v8380_v5, %v12016_v28  ;;  %v11112_v16 = vmul.f32 %v8380_v5, %v12017_v29  ;;  %v11117_v18 = vmul.f32 %v8380_v5, %v12018_v51 }
 0x52e   : > { %v11124_v33 = vmul.f32 %v8380_v5, %v12019_v52  ;;  %v11129_v28 = vmul.f32 %v8380_v5, %v12021_v26  ;;  %v11134_v29 = vmul.f32 %v8380_v5, %v12023_v63  ;;  %v11139_v51 = vmul.f32 %v8380_v5, %v12025_v4 }
 0x52f   : > { %v11097_v19 = vpop.f32.mrb[116].mxu0  ;;  %v11144_v52 = vmul.f32 %v8380_v5, %v12027_v2  ;;  %v11149_v26 = vmul.f32 %v8380_v5, %v12029_v22  ;;  %v11154_v63 = vmul.f32 %v8380_v5, %v12031_v32  ;;  %v11159_v4 = vmul.f32 %v8380_v5, %v12033_v49 }
 0x530   : > { %v11119_v6 = vpop.f32.mrb[117].mxu0  ;;  %12020 = vst [vmem:[#allocation4_spill] sm:$0xff] %v11124_v33  ;;  %12022 = vst [vmem:[#allocation6_spill] sm:$0xff] %v11129_v28  ;;  %v11164_v2 = vmul.f32 %v8380_v5, %v12035_v43  ;;  %v11169_v22 = vmul.f32 %v8380_v5, %v12037_v44  ;;  %v11174_v32 = vmul.f32 %v8380_v5, %v12039_v38 }
 0x531   : > { %12024 = vst [vmem:[#allocation5_spill] sm:$0xff] %v11134_v29  ;;  %12026 = vst [vmem:[#allocation14_spill] sm:$0xff] %v11139_v51  ;;  %v11179_v49 = vmul.f32 %v8380_v5, %v12041_v14  ;;  %v11186_v43 = vmul.f32 %v8380_v5, %v12044_v1  ;;  %v12046_v3 = vsub.f32 %v10868_v40, %v10923_v39 }
 0x532   : > { %12028 = vst [vmem:[#allocation15_spill] sm:$0xff] %v11144_v52  ;;  %12030 = vst [vmem:[#allocation7_spill] sm:$0xff] %v11149_v26  ;;  %v12048_v8 = vsub.f32 %v10881_v42, %v10923_v39  ;;  %v12050_v50 = vsub.f32 %v10878_v60, %v10923_v39  ;;  %v5678_v60 = vmul.f32 %v11019_v37, %v11019_v37 }
 0x533   : > { %12032 = vst [vmem:[#allocation17_spill] sm:$0xff] %v11154_v63  ;;  %12034 = vst [vmem:[#allocation10_spill] sm:$0xff] %v11159_v4  ;;  %v11181_v4 = vpop.f32.mrb[118].mxu0  ;;  %v11191_v44 = vmul.f32 %v8380_v5, %v12046_v3  ;;  %v5681_v26 = vmul.f32 %v11022_v45, %v11022_v45 }
 0x534   : > { %12036 = vst [vmem:[#allocation16_spill] sm:$0xff] %v11164_v2  ;;  %12038 = vst [vmem:[#allocation18_spill] sm:$0xff] %v11169_v22  ;;  %v11196_v38 = vmul.f32 %v8380_v5, %v12048_v8  ;;  %v11201_v14 = vmul.f32 %v8380_v5, %v12050_v50  ;;  %v5677_v8 = vmul.f32 %v11002_v58, %v11002_v58 }
 0x535   : > { %12040 = vst [vmem:[#allocation19_spill] sm:$0xff] %v11174_v32  ;;  %12042 = vst [vmem:[#allocation8_spill] sm:$0xff] %v11179_v49  ;;  %v11203_v49 = vpop.f32.mrb[119].mxu0  ;;  %v5640_v50 = vadd.f32 %v5639_v17, %v11019_v37  ;;  %v5680_v22 = vmul.f32 %v11029_v59, %v11029_v59 }
 0x536   : > { %12043 = vst [vmem:[#allocation3_spill] sm:$0xff] %v11181_v4  ;;  %12045 = vst [vmem:[#allocation9_spill] sm:$0xff] %v11186_v43 }
 0x537   : > { %12047 = vst [vmem:[#allocation11_spill] sm:$0xff] %v11191_v44  ;;  %12049 = vst [vmem:[#allocation20_spill] sm:$0xff] %v11196_v38  ;;  %v11205_v62 = vpop.f32.mrb[120].mxu0  ;;  %v5679_v38 = vmul.f32 %v11012_v57, %v11012_v57  ;;  %v5641_v32 = vadd.f32 %v11012_v57, %v5640_v50 }
 0x538   : > { %12051 = vst [vmem:[#allocation21_spill] sm:$0xff] %v11201_v14  ;;  %12052 = vst [vmem:[#allocation22_spill] sm:$0xff] %v11203_v49  ;;  %v11207_v1 = vpop.f32.mrb[121].mxu0  ;;  %v5708_v14 = vadd.f32 %v5707_v47, %v5677_v8  ;;  %v5682_v47 = vmul.f32 %v11035_v24, %v11035_v24  ;;  %v5683_v8 = vmul.f32 %v11032_v0, %v11032_v0 }
 0x539   : > { %12053 = vst [vmem:[#allocation23_spill] sm:$0xff] %v11205_v62  ;;  %12054 = vst [vmem:[#allocation24_spill] sm:$0xff] %v11207_v1  ;;  %v5642_v2 = vadd.f32 %v5641_v32, %v11029_v59  ;;  %v5684_v32 = vmul.f32 %v11119_v6, %v11119_v6 }
 0x53a   : > { %v5709_v44 = vadd.f32 %v5708_v14, %v5678_v60 }
 0x53b   : > { %v11209_v43 = vpop.f32.mrb[122].mxu0  ;;  %v5643_v51 = vadd.f32 %v11022_v45, %v5642_v2  ;;  %v5685_v2 = vmul.f32 %v11097_v19, %v11097_v19 }
 0x53c   : > { %12055 = vst [vmem:[#allocation25_spill] sm:$0xff] %v11209_v43  ;;  %v11211_v40 = vpop.f32.mrb[123].mxu0  ;;  %v5710_v63 = vadd.f32 %v5709_v44, %v5679_v38 }
 0x53d   : > { %12056 = vst [vmem:[#allocation26_spill] sm:$0xff] %v11211_v40  ;;  %v5644_v17 = vadd.f32 %v5643_v51, %v11035_v24  ;;  %v5686_v51 = vmul.f32 %v11203_v49, %v11203_v49 }
 0x53e   : > { %v5711_v52 = vadd.f32 %v5710_v63, %v5680_v22 }
 0x53f   : > { %v11213_v3 = vpop.f32.mrb[124].mxu0  ;;  %v5645_v50 = vadd.f32 %v11032_v0, %v5644_v17 }
 0x540   : > { %12057 = vst [vmem:[#allocation27_spill] sm:$0xff] %v11213_v3  ;;  %v11215_v42 = vpop.f32.mrb[125].mxu0  ;;  %v5712_v14 = vadd.f32 %v5711_v52, %v5681_v26 }
 0x541   : > { %12058 = vst [vmem:[#allocation28_spill] sm:$0xff] %v11215_v42  ;;  %v5646_v44 = vadd.f32 %v5645_v50, %v11119_v6 }
 0x542   : > { %v5713_v60 = vadd.f32 %v5712_v14, %v5682_v47  ;;  %v5687_v47 = vmul.f32 %v11181_v4, %v11181_v4 }
 0x543   : > { %v11221_v39 = vpop.f32.mrb[126].mxu0  ;;  %v5647_v38 = vadd.f32 %v11097_v19, %v5646_v44 }
 0x544   : > { %12059 = vst [vmem:[#allocation29_spill] sm:$0xff] %v11221_v39  ;;  %v11223_v5 = vpop.f32.mrb[127].mxu0  ;;  %v5714_v63 = vadd.f32 %v5713_v60, %v5683_v8  ;;  %v5688_v8 = vmul.f32 %v11207_v1, %v11207_v1 }
 0x545   : > { %12060 = vst [vmem:[#allocation30_spill] sm:$0xff] %v11223_v5  ;;  %v5648_v52 = vadd.f32 %v5647_v38, %v11203_v49  ;;  %v12078_v49 = vld [vmem:[#allocation21_spill] sm:$0xff] }
 0x546   : > { %v5715_v22 = vadd.f32 %v5714_v63, %v5684_v32  ;;  %v5689_v32 = vmul.f32 %v11205_v62, %v11205_v62 }
 0x547   : > { %v5649_v14 = vadd.f32 %v11181_v4, %v5648_v52  ;;  %v12077_v4 = vld [vmem:[#allocation20_spill] sm:$0xff] }
 0x548   : > { %v5716_v26 = vadd.f32 %v5715_v22, %v5685_v2  ;;  %v5690_v2 = vmul.f32 %v11211_v40, %v11211_v40 }
 0x549   : > { %v5650_v60 = vadd.f32 %v5649_v14, %v11207_v1 }
 0x54a   : > { %v5717_v17 = vadd.f32 %v5716_v26, %v5686_v51  ;;  %v5691_v51 = vmul.f32 %v11209_v43, %v11209_v43 }
 0x54b   : > { %v5651_v63 = vadd.f32 %v11205_v62, %v5650_v60  ;;  %v12076_v62 = vld [vmem:[#allocation11_spill] sm:$0xff] }
 0x54c   : > { %v5718_v50 = vadd.f32 %v5717_v17, %v5687_v47  ;;  %v5692_v47 = vmul.f32 %v11215_v42, %v11215_v42 }
 0x54d   : > { %v5652_v22 = vadd.f32 %v5651_v63, %v11211_v40  ;;  %v12075_v40 = vld [vmem:[#allocation9_spill] sm:$0xff] }
 0x54e   : > { %v5719_v44 = vadd.f32 %v5718_v50, %v5688_v8  ;;  %v5693_v8 = vmul.f32 %v11213_v3, %v11213_v3 }
 0x54f   : > { %v5653_v26 = vadd.f32 %v11209_v43, %v5652_v22  ;;  %v12074_v43 = vld [vmem:[#allocation8_spill] sm:$0xff] }
 0x550   : > { %v5720_v38 = vadd.f32 %v5719_v44, %v5689_v32  ;;  %v5694_v32 = vmul.f32 %v11223_v5, %v11223_v5 }
 0x551   : > { %v5654_v17 = vadd.f32 %v5653_v26, %v11215_v42  ;;  %v12073_v42 = vld [vmem:[#allocation19_spill] sm:$0xff] }
 0x552   : > { %v5721_v52 = vadd.f32 %v5720_v38, %v5690_v2  ;;  %v5695_v2 = vmul.f32 %v11221_v39, %v11221_v39 }
 0x553   : > { %v5655_v50 = vadd.f32 %v11213_v3, %v5654_v17  ;;  %v11280_v17 = vld [vmem:[%s11743_s8] ss:$0 sm:$0xff]  ;;  %v12072_v3 = vld [vmem:[#allocation18_spill] sm:$0xff] }
 0x554   : > { %v5722_v14 = vadd.f32 %v5721_v52, %v5691_v51  ;;  %v11284_v33 = vmul.f32 %v11280_v17, %v11040_v35  ;;  %v11304_v35 = vmul.f32 %v11280_v17, %v11065_v30  ;;  %v11326_v30 = vmul.f32 %v11280_v17, %v11090_v21 }
 0x555   : > { %v5656_v44 = vadd.f32 %v5655_v50, %v11223_v5  ;;  %v5356_v1 = vmul.f32 %v11280_v17, %v12076_v62 }
 0x556   : > { %v5723_v60 = vadd.f32 %v5722_v14, %v5692_v47 }
 0x557   : > { %v5657_v22 = vadd.f32 %v11221_v39, %v5656_v44  ;;  %v11296_v44 = vmul.f32 %v11280_v17, %v11055_v13  ;;  %v11316_v13 = vmul.f32 %v11280_v17, %v11080_v61  ;;  %v11338_v61 = vmul.f32 %v11280_v17, %v11107_v15 }
 0x558   : > { %v5724_v63 = vadd.f32 %v5723_v60, %v5693_v8  ;;  %v5341_v15 = vmul.f32 %v11280_v17, %v11112_v16  ;;  %v12068_v16 = vld [vmem:[#allocation7_spill] sm:$0xff] }
 0x559   : > { %v5658_v26 = vrot.slane %v5657_v22, 4  ;;  %v5348_v39 = vmul.f32 %v11280_v17, %v12068_v16  ;;  %v5353_v16 = vmul.f32 %v11280_v17, %v12073_v42 }
 0x55a   : > { %v5725_v38 = vadd.f32 %v5724_v63, %v5694_v32  ;;  %v11288_v32 = vmul.f32 %v11280_v17, %v11045_v23  ;;  %v11308_v23 = vmul.f32 %v11280_v17, %v11070_v12  ;;  %v11330_v12 = vmul.f32 %v11280_v17, %v11095_v34 }
 0x55b   : > { %v5659_v52 = vadd.f32 %v5658_v26, %v5657_v22 }
 0x55c   : > { %v5726_v51 = vadd.f32 %v5725_v38, %v5695_v2  ;;  %v11300_v2 = vmul.f32 %v11280_v17, %v11060_v11  ;;  %v11320_v11 = vmul.f32 %v11280_v17, %v11085_v27 }
 0x55d   : > { %v5660_v28 = vrot.slane %v5659_v52, 2 }
 0x55e   : > { %v5727_v29 = vrot.slane %v5726_v51, 4 }
 0x55f   : > { %v5661_v14 = vadd.f32 %v5660_v28, %v5659_v52 }
 0x560   : > { %v5728_v47 = vadd.f32 %v5727_v29, %v5726_v51  ;;  %v11292_v29 = vmul.f32 %v11280_v17, %v11050_v31  ;;  %v11312_v31 = vmul.f32 %v11280_v17, %v11075_v25  ;;  %v11334_v25 = vmul.f32 %v11280_v17, %v11102_v56 }
 0x561   : > { %v5662_v8 = vrot.slane %v5661_v14, 1 }
 0x562   : > { %v5729_v50 = vrot.slane %v5728_v47, 2 }
 0x563   : > { %v5663_v28 = vadd.f32 %v5662_v8, %v5661_v14  ;;  %v12065_v8 = vld [vmem:[#allocation5_spill] sm:$0xff] }
 0x564   : > { %v5730_v60 = vadd.f32 %v5729_v50, %v5728_v47  ;;  %v12064_v50 = vld [vmem:[#allocation6_spill] sm:$0xff]  ;;  %v5345_v34 = vmul.f32 %v11280_v17, %v12065_v8  ;;  %v12071_v8 = vld [vmem:[#allocation16_spill] sm:$0xff] }
 0x565   : > { %v11322_v38 = vmul.f32 0.00390625, %v5663_v28  ;;  %v12061_v28 = vld [vmem:[#allocation13_spill] sm:$0xff]  ;;  %v5344_v56 = vmul.f32 %v11280_v17, %v12064_v50 }
 0x566   : > { %v5731_v63 = vrot.slane %v5730_v60, 1  ;;  %v6304_v50 = vld [vmem:[%s11744_s9] ss:$0 sm:$0xff] }
 0x567   : > { %v5735_v26 = vmul.f32 %v11322_v38, %v11322_v38  ;;  %v11449_v42 = vadd.f32 %v6304_v50, %v11288_v32  ;;  %v11458_v62 = vadd.f32 %v6304_v50, %v11300_v2  ;;  %v11473_v32 = vadd.f32 %v6304_v50, %v11320_v11 }
 0x568   : > { %v5732_v22 = vadd.f32 %v5731_v63, %v5730_v60  ;;  %v12066_v60 = vld [vmem:[#allocation14_spill] sm:$0xff]  ;;  %v12067_v63 = vld [vmem:[#allocation15_spill] sm:$0xff]  ;;  %v11482_v2 = vadd.f32 %v6304_v50, %v11334_v25  ;;  %v11493_v11 = vadd.f32 %v6304_v50, %v5344_v56 }
 0x569   : > { %v5346_v51 = vmul.f32 %v11280_v17, %v12066_v60  ;;  %v5347_v21 = vmul.f32 %v11280_v17, %v12067_v63  ;;  %v5351_v60 = vmul.f32 %v11280_v17, %v12071_v8  ;;  %v5352_v63 = vmul.f32 %v11280_v17, %v12072_v3  ;;  %12079 = vst [vmem:[#allocation13_spill] sm:$0xff] %v11473_v32 }
 0x56a   : > { %v5734_v27 = vmul.f32 0.00390625, %v5732_v22  ;;  %v12062_v22 = vld [vmem:[#allocation12_spill] sm:$0xff]  ;;  %v5358_v8 = vmul.f32 %v11280_v17, %v12078_v49  ;;  %v11446_v3 = vadd.f32 %v6304_v50, %v11284_v33  ;;  %v11464_v49 = vadd.f32 %v6304_v50, %v11308_v23  ;;  %12082 = vst [vmem:[#allocation6_spill] sm:$0xff] %v11482_v2 }
 0x56b   : > { %v11467_v33 = vadd.f32 %v6304_v50, %v11312_v31  ;;  %v11487_v23 = vadd.f32 %v6304_v50, %v5341_v15  ;;  %v11495_v32 = vadd.f32 %v6304_v50, %v5345_v34  ;;  %v11507_v15 = vadd.f32 %v6304_v50, %v5351_v60 }
 0x56c   : > { %v5736_v47 = vsub.f32 %v5734_v27, %v5735_v26  ;;  %v12063_v27 = vld [vmem:[#allocation4_spill] sm:$0xff]  ;;  %v12103_v60 = vsub.f32 %v10889_v55, %v11322_v38  ;;  %v12108_v55 = vsub.f32 %v10921_v36, %v11322_v38  ;;  %v12113_v36 = vsub.f32 %v12062_v22, %v11322_v38 }
 0x56d   : > { %v5343_v14 = vmul.f32 %v11280_v17, %v12063_v27  ;;  %v12070_v27 = vld [vmem:[#allocation10_spill] sm:$0xff]  ;;  %12084 = vst [vmem:[#allocation14_spill] sm:$0xff] %v11487_v23  ;;  %12094 = vst [vmem:[#allocation11_spill] sm:$0xff] %v11507_v15  ;;  %v12118_v22 = vsub.f32 %v11029_v59, %v11322_v38  ;;  %v12123_v59 = vsub.f32 %v11097_v19, %v11322_v38  ;;  %v12138_v15 = vld [vmem:[#allocation27_spill] sm:$0xff] }
 0x56e   : > { %v5737_v26 = vmax.f32 %v5736_v47, 0.0  ;;  %v5342_v47 = vmul.f32 %v11280_v17, %v11117_v18  ;;  %v12069_v18 = vld [vmem:[#allocation17_spill] sm:$0xff]  ;;  %12088 = vst [vmem:[#allocation10_spill] sm:$0xff] %v11495_v32 }
 0x56f   : > { %v5349_v5 = vmul.f32 %v11280_v17, %v12069_v18  ;;  %v5354_v18 = vmul.f32 %v11280_v17, %v12074_v43  ;;  %v11452_v43 = vadd.f32 %v6304_v50, %v11292_v29  ;;  %v11476_v29 = vadd.f32 %v6304_v50, %v11326_v30  ;;  %12087 = vst [vmem:[#allocation17_spill] sm:$0xff] %v11493_v11 }
 0x570   : > { %v5770_v52 = vadd.f32 1e-05, %v5737_v26  ;;  %v5350_v26 = vmul.f32 %v11280_v17, %v12070_v27  ;;  %v5355_v27 = vmul.f32 %v11280_v17, %v12075_v40  ;;  %v11455_v40 = vadd.f32 %v6304_v50, %v11296_v44 }
 0x571   : > { %12080 = vst [vmem:[#allocation12_spill] sm:$0xff] %v11476_v29  ;;  %v11479_v44 = vadd.f32 %v6304_v50, %v11330_v12  ;;  %v11489_v31 = vadd.f32 %v6304_v50, %v5342_v47  ;;  %v11497_v30 = vadd.f32 %v6304_v50, %v5346_v51  ;;  %v11499_v12 = vadd.f32 %v6304_v50, %v5347_v21 }
 0x572   : > { %8381 = vrsqrt.f32 %v5770_v52  ;;  %v5357_v52 = vmul.f32 %v11280_v17, %v12077_v4  ;;  %v11461_v4 = vadd.f32 %v6304_v50, %v11304_v35  ;;  %v11470_v17 = vadd.f32 %v6304_v50, %v11316_v13 }
 0x573   : > { %12081 = vst [vmem:[#allocation4_spill] sm:$0xff] %v11479_v44  ;;  %v11485_v35 = vadd.f32 %v6304_v50, %v11338_v61  ;;  %12085 = vst [vmem:[#allocation15_spill] sm:$0xff] %v11489_v31  ;;  %v11491_v13 = vadd.f32 %v6304_v50, %v5343_v14  ;;  %v11501_v44 = vadd.f32 %v6304_v50, %v5348_v39 }
 0x574   : > { %12089 = vst [vmem:[#allocation16_spill] sm:$0xff] %v11497_v30  ;;  %12090 = vst [vmem:[#allocation18_spill] sm:$0xff] %v11499_v12  ;;  %v11503_v25 = vadd.f32 %v6304_v50, %v5349_v5  ;;  %v11505_v61 = vadd.f32 %v6304_v50, %v5350_v26  ;;  %v11509_v47 = vadd.f32 %v6304_v50, %v5352_v63 }
 0x575   : > { %12083 = vst [vmem:[#allocation5_spill] sm:$0xff] %v11485_v35  ;;  %12086 = vst [vmem:[#allocation7_spill] sm:$0xff] %v11491_v13  ;;  %v11511_v14 = vadd.f32 %v6304_v50, %v5353_v16  ;;  %v11513_v56 = vadd.f32 %v6304_v50, %v5354_v18  ;;  %v11515_v32 = vadd.f32 %v6304_v50, %v5355_v27 }
 0x576   : > { %12091 = vst [vmem:[#allocation19_spill] sm:$0xff] %v11501_v44  ;;  %12092 = vst [vmem:[#allocation8_spill] sm:$0xff] %v11503_v25  ;;  %v11517_v51 = vadd.f32 %v6304_v50, %v5356_v1  ;;  %v11519_v21 = vadd.f32 %v6304_v50, %v5357_v52  ;;  %v11521_v39 = vadd.f32 %v6304_v50, %v5358_v8  ;;  %v12142_v25 = vld [vmem:[#allocation29_spill] sm:$0xff] }
 0x577   : > { %12093 = vst [vmem:[#allocation9_spill] sm:$0xff] %v11505_v61  ;;  %12095 = vst [vmem:[#allocation20_spill] sm:$0xff] %v11509_v47  ;;  %v12102_v5 = vsub.f32 %v10893_v48, %v11322_v38  ;;  %v12104_v16 = vsub.f32 %v10901_v46, %v11322_v38  ;;  %v12105_v1 = vsub.f32 %v10899_v7, %v11322_v38  ;;  %v12140_v61 = vld [vmem:[#allocation30_spill] sm:$0xff] }
 0x578   : > { %12096 = vst [vmem:[#allocation21_spill] sm:$0xff] %v11511_v14  ;;  %12097 = vst [vmem:[#allocation31_spill] sm:$0xff] %v11513_v56  ;;  %v12106_v50 = vsub.f32 %v10911_v20, %v11322_v38  ;;  %v12107_v48 = vsub.f32 %v10906_v41, %v11322_v38  ;;  %v12109_v46 = vsub.f32 %v10916_v53, %v11322_v38  ;;  %v12136_v56 = vld [vmem:[#allocation28_spill] sm:$0xff] }
 0x579   : > { %12098 = vst [vmem:[#allocation32_spill] sm:$0xff] %v11515_v32  ;;  %12099 = vst [vmem:[#allocation33_spill] sm:$0xff] %v11517_v51  ;;  %v12110_v7 = vsub.f32 %v10944_v9, %v11322_v38  ;;  %v12111_v20 = vsub.f32 %v10934_v10, %v11322_v38  ;;  %v12112_v41 = vsub.f32 %v12061_v28, %v11322_v38  ;;  %v12132_v51 = vld [vmem:[#allocation26_spill] sm:$0xff]  ;;  %v12134_v32 = vld [vmem:[#allocation25_spill] sm:$0xff] }
 0x57a   : > { %12100 = vst [vmem:[#allocation34_spill] sm:$0xff] %v11519_v21  ;;  %12101 = vst [vmem:[#allocation35_spill] sm:$0xff] %v11521_v39  ;;  %v12114_v53 = vsub.f32 %v11007_v54, %v11322_v38  ;;  %v12115_v9 = vsub.f32 %v11002_v58, %v11322_v38  ;;  %v12116_v10 = vsub.f32 %v11019_v37, %v11322_v38  ;;  %v12126_v39 = vld [vmem:[#allocation3_spill] sm:$0xff] }
 0x57b   : > { %v12117_v28 = vsub.f32 %v11012_v57, %v11322_v38  ;;  %v12119_v54 = vsub.f32 %v11022_v45, %v11322_v38  ;;  %v12120_v58 = vsub.f32 %v11035_v24, %v11322_v38  ;;  %v12121_v37 = vsub.f32 %v11032_v0, %v11322_v38  ;;  %v6338_v0 = vld [vmem:[%s11746_s11] ss:$0 sm:$0xff]  ;;  %v12130_v21 = vld [vmem:[#allocation23_spill] sm:$0xff] }
 0x57c   : > { %v8382_v34 = vpop.eup %8381  ;;  %v12122_v57 = vsub.f32 %v11119_v6, %v11322_v38  ;;  %v12127_v24 = vsub.f32 %v12126_v39, %v11322_v38  ;;  %v12131_v19 = vsub.f32 %v12130_v21, %v11322_v38  ;;  %v12135_v39 = vsub.f32 %v12134_v32, %v11322_v38 }
 0x57d   : > { %v5772_v26 = vmul.f32 %v8382_v34, %v12102_v5  ;;  %v5773_v63 = vmul.f32 %v8382_v34, %v12103_v60  ;;  %v5774_v18 = vmul.f32 %v8382_v34, %v12104_v16  ;;  %v5775_v27 = vmul.f32 %v8382_v34, %v12105_v1 }
 0x57e   : > { %v5776_v52 = vmul.f32 %v8382_v34, %v12106_v50  ;;  %v5777_v8 = vmul.f32 %v8382_v34, %v12107_v48  ;;  %v5778_v5 = vmul.f32 %v8382_v34, %v12108_v55  ;;  %v5779_v60 = vmul.f32 %v8382_v34, %v12109_v46 }
 0x57f   : > { %v5780_v16 = vmul.f32 %v8382_v34, %v12110_v7  ;;  %v5781_v1 = vmul.f32 %v8382_v34, %v12111_v20  ;;  %v5782_v50 = vmul.f32 %v8382_v34, %v12112_v41  ;;  %v5783_v48 = vmul.f32 %v8382_v34, %v12113_v36 }
 0x580   : > { %v5784_v55 = vmul.f32 %v8382_v34, %v12114_v53  ;;  %v5785_v46 = vmul.f32 %v8382_v34, %v12115_v9  ;;  %v5786_v7 = vmul.f32 %v8382_v34, %v12116_v10  ;;  %v5787_v20 = vmul.f32 %v8382_v34, %v12117_v28 }
 0x581   : > { %v5788_v41 = vmul.f32 %v8382_v34, %v12118_v22  ;;  %v5789_v36 = vmul.f32 %v8382_v34, %v12119_v54  ;;  %v5790_v53 = vmul.f32 %v8382_v34, %v12120_v58  ;;  %v5791_v9 = vmul.f32 %v8382_v34, %v12121_v37  ;;  %v12124_v22 = vld [vmem:[#allocation22_spill] sm:$0xff]  ;;  %v12128_v37 = vld [vmem:[#allocation24_spill] sm:$0xff] }
 0x582   : > { %v5792_v10 = vmul.f32 %v8382_v34, %v12122_v57  ;;  %v5793_v28 = vmul.f32 %v8382_v34, %v12123_v59  ;;  %v12125_v45 = vsub.f32 %v12124_v22, %v11322_v38  ;;  %v5795_v58 = vmul.f32 %v8382_v34, %v12127_v24 }
 0x583   : > { %v12129_v6 = vsub.f32 %v12128_v37, %v11322_v38  ;;  %v5797_v59 = vmul.f32 %v8382_v34, %v12131_v19  ;;  %v12133_v22 = vsub.f32 %v12132_v51, %v11322_v38  ;;  %v5799_v24 = vmul.f32 %v8382_v34, %v12135_v39 }
 0x584   : > { %v5794_v54 = vmul.f32 %v8382_v34, %v12125_v45  ;;  %v12137_v14 = vsub.f32 %v12136_v56, %v11322_v38  ;;  %v12139_v37 = vsub.f32 %v12138_v15, %v11322_v38  ;;  %v12141_v21 = vsub.f32 %v12140_v61, %v11322_v38 }
 0x585   : > { %v5796_v57 = vmul.f32 %v8382_v34, %v12129_v6  ;;  %v5798_v45 = vmul.f32 %v8382_v34, %v12133_v22  ;;  %v12143_v51 = vsub.f32 %v12142_v25, %v11322_v38  ;;  %v5811_v44 = vmul.f32 %v6338_v0, %v5772_v26 }
 0x586   : > { %v5800_v47 = vmul.f32 %v8382_v34, %v12137_v14  ;;  %v5801_v6 = vmul.f32 %v8382_v34, %v12139_v37  ;;  %v5802_v19 = vmul.f32 %v8382_v34, %v12141_v21  ;;  %v5812_v12 = vmul.f32 %v6338_v0, %v5773_v63 }
 0x587   : > { %v5803_v22 = vmul.f32 %v8382_v34, %v12143_v51  ;;  %v5813_v32 = vmul.f32 %v6338_v0, %v5774_v18  ;;  %v5814_v39 = vmul.f32 %v6338_v0, %v5775_v27  ;;  %v5815_v30 = vmul.f32 %v6338_v0, %v5776_v52  ;;  %v6339_v27 = vld [vmem:[%s11747_s12] ss:$0 sm:$0xff] }
 0x588   : > { %v5816_v11 = vmul.f32 %v6338_v0, %v5777_v8  ;;  %v5817_v56 = vmul.f32 %v6338_v0, %v5778_v5  ;;  %v5818_v14 = vmul.f32 %v6338_v0, %v5779_v60  ;;  %v5819_v13 = vmul.f32 %v6338_v0, %v5780_v16 }
 0x589   : > { %v5820_v31 = vmul.f32 %v6338_v0, %v5781_v1  ;;  %v5821_v15 = vmul.f32 %v6338_v0, %v5782_v50  ;;  %v5822_v37 = vmul.f32 %v6338_v0, %v5783_v48  ;;  %v5823_v23 = vmul.f32 %v6338_v0, %v5784_v55 }
 0x58a   : > { %v5824_v35 = vmul.f32 %v6338_v0, %v5785_v46  ;;  %v5825_v61 = vmul.f32 %v6338_v0, %v5786_v7  ;;  %v5826_v21 = vmul.f32 %v6338_v0, %v5787_v20  ;;  %v5827_v2 = vmul.f32 %v6338_v0, %v5788_v41 }
 0x58b   : > { %v5828_v29 = vmul.f32 %v6338_v0, %v5789_v36  ;;  %v5829_v38 = vmul.f32 %v6338_v0, %v5790_v53  ;;  %v5830_v25 = vmul.f32 %v6338_v0, %v5791_v9  ;;  %v5831_v34 = vmul.f32 %v6338_v0, %v5792_v10 }
 0x58c   : > { %v5832_v26 = vmul.f32 %v6338_v0, %v5793_v28  ;;  %v5833_v63 = vmul.f32 %v6338_v0, %v5794_v54  ;;  %v5834_v18 = vmul.f32 %v6338_v0, %v5795_v58  ;;  %v5835_v52 = vmul.f32 %v6338_v0, %v5796_v57 }
 0x58d   : > { %v5836_v8 = vmul.f32 %v6338_v0, %v5797_v59  ;;  %v5837_v5 = vmul.f32 %v6338_v0, %v5798_v45  ;;  %v5838_v60 = vmul.f32 %v6338_v0, %v5799_v24  ;;  %v5839_v16 = vmul.f32 %v6338_v0, %v5800_v47 }
 0x58e   : > { %v5840_v1 = vmul.f32 %v6338_v0, %v5801_v6  ;;  %v5841_v50 = vmul.f32 %v6338_v0, %v5802_v19  ;;  %v5842_v48 = vmul.f32 %v6338_v0, %v5803_v22  ;;  %v5850_v55 = vadd.f32 %v6339_v27, %v5811_v44 }
 0x58f   : > { %v5851_v46 = vadd.f32 %v6339_v27, %v5812_v12  ;;  %v5852_v7 = vadd.f32 %v6339_v27, %v5813_v32  ;;  %v5853_v20 = vadd.f32 %v6339_v27, %v5814_v39  ;;  %v5854_v41 = vadd.f32 %v6339_v27, %v5815_v30 }
 0x590   : > { %v5855_v36 = vadd.f32 %v6339_v27, %v5816_v11  ;;  %v5856_v53 = vadd.f32 %v6339_v27, %v5817_v56  ;;  %v5857_v9 = vadd.f32 %v6339_v27, %v5818_v14  ;;  %v5858_v10 = vadd.f32 %v6339_v27, %v5819_v13 }
 0x591   : > { %v5859_v28 = vadd.f32 %v6339_v27, %v5820_v31  ;;  %v5860_v54 = vadd.f32 %v6339_v27, %v5821_v15  ;;  %v5861_v58 = vadd.f32 %v6339_v27, %v5822_v37  ;;  %v5862_v57 = vadd.f32 %v6339_v27, %v5823_v23 }
 0x592   : > { %v5863_v59 = vadd.f32 %v6339_v27, %v5824_v35  ;;  %v5864_v45 = vadd.f32 %v6339_v27, %v5825_v61  ;;  %v5865_v24 = vadd.f32 %v6339_v27, %v5826_v21  ;;  %v5866_v47 = vadd.f32 %v6339_v27, %v5827_v2 }
 0x593   : > { %v5867_v6 = vadd.f32 %v6339_v27, %v5828_v29  ;;  %v5868_v19 = vadd.f32 %v6339_v27, %v5829_v38  ;;  %v5869_v0 = vadd.f32 %v6339_v27, %v5830_v25  ;;  %v5870_v44 = vadd.f32 %v6339_v27, %v5831_v34  ;;  %v12144_v25 = vld [vmem:[#allocation13_spill] sm:$0xff] }
 0x594   : > { %v5871_v12 = vadd.f32 %v6339_v27, %v5832_v26  ;;  %v5872_v51 = vadd.f32 %v6339_v27, %v5833_v63  ;;  %v5873_v22 = vadd.f32 %v6339_v27, %v5834_v18  ;;  %v5874_v30 = vadd.f32 %v6339_v27, %v5835_v52  ;;  %v12145_v26 = vld [vmem:[#allocation12_spill] sm:$0xff]  ;;  %v12147_v18 = vld [vmem:[#allocation6_spill] sm:$0xff] }
 0x595   : > { %v5875_v11 = vadd.f32 %v6339_v27, %v5836_v8  ;;  %v5876_v32 = vadd.f32 %v6339_v27, %v5837_v5  ;;  %v5877_v39 = vadd.f32 %v6339_v27, %v5838_v60  ;;  %v5878_v13 = vadd.f32 %v6339_v27, %v5839_v16  ;;  %v12146_v63 = vld [vmem:[#allocation4_spill] sm:$0xff] }
 0x596   : > { %v5879_v31 = vadd.f32 %v6339_v27, %v5840_v1  ;;  %v5880_v56 = vadd.f32 %v6339_v27, %v5841_v50  ;;  %v5881_v14 = vadd.f32 %v6339_v27, %v5842_v48  ;;  %v5882_v35 = vadd.f32 %v5850_v55, %v11446_v3  ;;  %v12148_v27 = vld [vmem:[#allocation5_spill] sm:$0xff]  ;;  %v12154_v1 = vld [vmem:[#allocation16_spill] sm:$0xff]  ;;  %v12155_v48 = vld [vmem:[#allocation18_spill] sm:$0xff] }
 0x597   : > { %v5883_v23 = vadd.f32 %v5851_v46, %v11449_v42  ;;  %v5884_v29 = vadd.f32 %v5852_v7, %v11452_v43  ;;  %v5885_v2 = vadd.f32 %v5853_v20, %v11455_v40  ;;  %v5886_v15 = vadd.f32 %v5854_v41, %v11458_v62  ;;  %v12149_v62 = vld [vmem:[#allocation14_spill] sm:$0xff]  ;;  %v12156_v46 = vld [vmem:[#allocation19_spill] sm:$0xff]  ;;  %v12157_v20 = vld [vmem:[#allocation8_spill] sm:$0xff] }
 0x598   : > { %v5887_v37 = vadd.f32 %v5855_v36, %v11461_v4  ;;  %v5888_v61 = vadd.f32 %v5856_v53, %v11464_v49  ;;  %v5889_v21 = vadd.f32 %v5857_v9, %v11467_v33  ;;  %v5890_v38 = vadd.f32 %v5858_v10, %v11470_v17  ;;  %v12150_v4 = vld [vmem:[#allocation15_spill] sm:$0xff]  ;;  %v12152_v33 = vld [vmem:[#allocation17_spill] sm:$0xff]  ;;  %v12153_v17 = vld [vmem:[#allocation10_spill] sm:$0xff] }
 0x599   : > { %v5891_v34 = vadd.f32 %v5859_v28, %v12144_v25  ;;  %v5892_v3 = vadd.f32 %v5860_v54, %v12145_v26  ;;  %v5893_v42 = vadd.f32 %v5861_v58, %v12146_v63  ;;  %v5894_v43 = vadd.f32 %v5862_v57, %v12147_v18  ;;  %v12151_v49 = vld [vmem:[#allocation7_spill] sm:$0xff]  ;;  %v12158_v36 = vld [vmem:[#allocation9_spill] sm:$0xff]  ;;  %v12160_v28 = vld [vmem:[#allocation20_spill] sm:$0xff] }
 0x59a   : > { %v5895_v40 = vadd.f32 %v5863_v59, %v12148_v27  ;;  %v5896_v52 = vadd.f32 %v5864_v45, %v12149_v62  ;;  %v5897_v8 = vadd.f32 %v5865_v24, %v12150_v4  ;;  %v5898_v5 = vadd.f32 %v5866_v47, %v12151_v49  ;;  %v12159_v9 = vld [vmem:[#allocation11_spill] sm:$0xff]  ;;  %v12161_v58 = vld [vmem:[#allocation21_spill] sm:$0xff]  ;;  %v12163_v24 = vld [vmem:[#allocation32_spill] sm:$0xff] }
 0x59b   : > { %v5899_v60 = vadd.f32 %v5867_v6, %v12152_v33  ;;  %v5900_v16 = vadd.f32 %v5868_v19, %v12153_v17  ;;  %v5901_v50 = vadd.f32 %v5869_v0, %v12154_v1  ;;  %v11646_v55 = vadd.f32 %v5870_v44, %v12155_v48  ;;  %v12162_v59 = vld [vmem:[#allocation31_spill] sm:$0xff]  ;;  %v12164_v6 = vld [vmem:[#allocation33_spill] sm:$0xff]  ;;  %v12165_v0 = vld [vmem:[#allocation34_spill] sm:$0xff] }
 0x59c   : > { %v11649_v7 = vadd.f32 %v5871_v12, %v12156_v46  ;;  %v11652_v41 = vadd.f32 %v5872_v51, %v12157_v20  ;;  %v11655_v53 = vadd.f32 %v5873_v22, %v12158_v36  ;;  %v11658_v10 = vadd.f32 %v5874_v30, %v12159_v9  ;;  %v12166_v12 = vld [vmem:[#allocation35_spill] sm:$0xff] }
 0x59d   : > { %v11661_v54 = vadd.f32 %v5875_v11, %v12160_v28  ;;  %v11664_v57 = vadd.f32 %v5876_v32, %v12161_v58  ;;  %v11667_v45 = vadd.f32 %v5877_v39, %v12162_v59  ;;  %v11677_v47 = vadd.f32 %v5878_v13, %v12163_v24 }
 0x59e   : > { %v11680_v19 = vadd.f32 %v5879_v31, %v12164_v6  ;;  %v11683_v44 = vadd.f32 %v5880_v56, %v12165_v0  ;;  %v11686_v51 = vadd.f32 %v5881_v14, %v12166_v12  ;;  %v5914_v22 = vmax.f32 %v5882_v35, 0.0 }
 0x59f   : > { %v5915_v30 = vmax.f32 %v5883_v23, 0.0  ;;  %v5916_v11 = vmax.f32 %v5884_v29, 0.0  ;;  %v5917_v32 = vmax.f32 %v5885_v2, 0.0  ;;  %v5918_v39 = vmax.f32 %v5886_v15, 0.0 }
 0x5a0   : > { %v5919_v13 = vmax.f32 %v5887_v37, 0.0  ;;  %v5920_v25 = vmax.f32 %v5888_v61, 0.0  ;;  %v5921_v31 = vmax.f32 %v5889_v21, 0.0  ;;  %v5922_v26 = vmax.f32 %v5890_v38, 0.0  ;;  %5946 = vst [vmem:[%s11674_s17] sm:$0xff] %v5914_v22 }
 0x5a1   : > { %v5923_v56 = vmax.f32 %v5891_v34, 0.0  ;;  %v5924_v63 = vmax.f32 %v5892_v3, 0.0  ;;  %v5925_v18 = vmax.f32 %v5893_v42, 0.0  ;;  %5947 = vst [vmem:[%s11674_s17 + $0x8] sm:$0xff] %v5915_v30  ;;  %5948 = vst [vmem:[%s11674_s17 + $0x10] sm:$0xff] %v5916_v11  ;;  %v5926_v14 = vmax.f32 %v5894_v43, 0.0 }
 0x5a2   : > { %5949 = vst [vmem:[%s11674_s17 + $0x18] sm:$0xff] %v5917_v32  ;;  %v5927_v35 = vmax.f32 %v5895_v40, 0.0  ;;  %v5928_v23 = vmax.f32 %v5896_v52, 0.0  ;;  %v5929_v29 = vmax.f32 %v5897_v8, 0.0  ;;  %5950 = vst [vmem:[%s11674_s17 + $0x20] sm:$0xff] %v5918_v39  ;;  %v5930_v2 = vmax.f32 %v5898_v5, 0.0 }
 0x5a3   : > { %5951 = vst [vmem:[%s11674_s17 + $0x28] sm:$0xff] %v5919_v13  ;;  %5952 = vst [vmem:[%s11674_s17 + $0x30] sm:$0xff] %v5920_v25  ;;  %v5931_v15 = vmax.f32 %v5899_v60, 0.0  ;;  %v5932_v37 = vmax.f32 %v5900_v16, 0.0  ;;  %v5933_v61 = vmax.f32 %v5901_v50, 0.0  ;;  %v5934_v21 = vmax.f32 %v11646_v55, 0.0 }
 0x5a4   : > { %5953 = vst [vmem:[%s11674_s17 + $0x38] sm:$0xff] %v5921_v31  ;;  %5954 = vst [vmem:[%s11674_s17 + $0x40] sm:$0xff] %v5922_v26  ;;  %v5935_v38 = vmax.f32 %v11649_v7, 0.0  ;;  %v5936_v34 = vmax.f32 %v11652_v41, 0.0  ;;  %v5937_v3 = vmax.f32 %v11655_v53, 0.0  ;;  %v5938_v42 = vmax.f32 %v11658_v10, 0.0 }
 0x5a5   : > { %5955 = vst [vmem:[%s11674_s17 + $0x48] sm:$0xff] %v5923_v56  ;;  %5956 = vst [vmem:[%s11674_s17 + $0x50] sm:$0xff] %v5924_v63  ;;  %v5939_v43 = vmax.f32 %v11661_v54, 0.0  ;;  %v5940_v27 = vmax.f32 %v11664_v57, 0.0  ;;  %v5941_v40 = vmax.f32 %v11667_v45, 0.0  ;;  %v5942_v62 = vmax.f32 %v11677_v47, 0.0 }
 0x5a6   : > { %5957 = vst [vmem:[%s11674_s17 + $0x58] sm:$0xff] %v5925_v18  ;;  %5958 = vst [vmem:[%s11674_s17 + $0x60] sm:$0xff] %v5926_v14  ;;  %v5943_v52 = vmax.f32 %v11680_v19, 0.0  ;;  %v5944_v4 = vmax.f32 %v11683_v44, 0.0  ;;  %v5945_v8 = vmax.f32 %v11686_v51, 0.0 }
 0x5a7   : > { %5959 = vst [vmem:[%s11674_s17 + $0x68] sm:$0xff] %v5927_v35  ;;  %5960 = vst [vmem:[%s11674_s17 + $0x70] sm:$0xff] %v5928_v23 }
 0x5a8   : > { %5961 = vst [vmem:[%s11674_s17 + $0x78] sm:$0xff] %v5929_v29  ;;  %5962 = vst [vmem:[%s11674_s17 + $0x80] sm:$0xff] %v5930_v2 }
 0x5a9   : > { %5963 = vst [vmem:[%s11674_s17 + $0x88] sm:$0xff] %v5931_v15  ;;  %5964 = vst [vmem:[%s11674_s17 + $0x90] sm:$0xff] %v5932_v37 }
 0x5aa   : > { %5965 = vst [vmem:[%s11674_s17 + $0x98] sm:$0xff] %v5933_v61  ;;  %5966 = vst [vmem:[%s11674_s17 + $0xa0] sm:$0xff] %v5934_v21 }
 0x5ab   : > { %5967 = vst [vmem:[%s11674_s17 + $0xa8] sm:$0xff] %v5935_v38  ;;  %5968 = vst [vmem:[%s11674_s17 + $0xb0] sm:$0xff] %v5936_v34 }
 0x5ac   : > { %5969 = vst [vmem:[%s11674_s17 + $0xb8] sm:$0xff] %v5937_v3  ;;  %5970 = vst [vmem:[%s11674_s17 + $0xc0] sm:$0xff] %v5938_v42 }
 0x5ad   : > { %5971 = vst [vmem:[%s11674_s17 + $0xc8] sm:$0xff] %v5939_v43  ;;  %5972 = vst [vmem:[%s11674_s17 + $0xd0] sm:$0xff] %v5940_v27 }
 0x5ae   : > { %5973 = vst [vmem:[%s11674_s17 + $0xd8] sm:$0xff] %v5941_v40  ;;  %5974 = vst [vmem:[%s11674_s17 + $0xe0] sm:$0xff] %v5942_v62 }
 0x5af   : > { %5975 = vst [vmem:[%s11674_s17 + $0xe8] sm:$0xff] %v5943_v52  ;;  %5976 = vst [vmem:[%s11674_s17 + $0xf0] sm:$0xff] %v5944_v4 }
 0x5b0   : > { %5977 = vst [vmem:[%s11674_s17 + $0xf8] sm:$0xff] %v5945_v8 }
 0x5b1 PF: > { %s23_s25 = sadd.s32 1, %s8422_s25  }
 0x5b2   : > { %p20_p4 = scmp.ge.s32.totalorder %s23_s25, 4  }
 0x5b4   :  { %22 = sbr.rel (!%p20_p4) target bundleno = 1 (0x1), region = 110 }

</bundles_post_ra>
